<compile_context>
chip_gen: v5e
topology: v5e:2x2
jax: 0.10.0
libtpu: 0.0.40
codegen_flags: <defaults>
</compile_context>

<pallas_src>
import functools

import jax
import jax.numpy as jnp
from jax import lax
from jax.experimental import pallas as pl
from jax.experimental.pallas import tpu as pltpu

MXU_DTYPE = jnp.bfloat16            # MXU / activation dtype; accumulation is f32.
VMEM_LIMIT_BYTES = 32 * 1024 * 1024  # safe on v5e/v6e/v7x, explicit budget.


def _round_up(x, m):
    return (x + m - 1) // m * m


# ----------------------------- Pallas kernels ------------------------------

def _oct_high_kernel(a_ref, b_ref, wa_ref, wb_ref, shift_ref, o_ref, *,
                     rows_h, rows_l, rw, hl):
    """y_h = ReLU(conv_h2h(x_h) + up2(conv_l2h(x_l)) + shift), fully fused.

    a_ref : ((hh+3)*rw, 2*cin_h)  column-pair-packed, zero-padded high image.
            6 taps at offsets kh*rw + q (kh in 0..2, q in 0..1).
    b_ref : ((hl+3)*rw, cin_l)    zero-padded low image (unpacked).
            9 taps at offsets kh*rw + kw, run at LOW resolution.
    wa_ref: (6, 2*cin_h, 2*cout_h)  packed h2h weights (BN scale folded).
    wb_ref: (9, cin_l, 2*cout_h)    l2h weights with duplicated output halves
            (realises the nearest width-upsample for free).
    o_ref : (hl, 2, rw, 2*cout_h)   == (hh, rw, 2*cout_h) viewed contiguously.
    """
    c2 = o_ref.shape[-1]
    acc_h = jnp.zeros((rows_h, c2), jnp.float32)
    acc_l = jnp.zeros((rows_l, c2), jnp.float32)
    for kh in range(3):
        for q in range(2):                       # packed column-pair taps (h2h)
            off = kh * rw + q
            acc_h = acc_h + jnp.dot(a_ref[pl.ds(off, rows_h), :],
                                    wa_ref[kh * 2 + q],
                                    preferred_element_type=jnp.float32)
        for kw in range(3):                      # low-resolution taps (l2h)
            off = kh * rw + kw
            acc_l = acc_l + jnp.dot(b_ref[pl.ds(off, rows_l), :],
                                    wb_ref[kh * 3 + kw],
                                    preferred_element_type=jnp.float32)
    # nearest 2x height-upsample of the l->h result: each low-res row block
    # (rw rows, rw % 8 == 0 so the split is sublane-tile aligned) feeds the
    # two high-res rows of its pair via a leading-dim broadcast.
    ah = acc_h.reshape(hl, 2, rw, c2)
    al = acc_l.reshape(hl, 1, rw, c2)
    y = ah + al + shift_ref[...]
    o_ref[...] = jnp.maximum(y, 0.0).astype(o_ref.dtype)


def _oct_low_kernel(x_ref, w_ref, shift_ref, o_ref, *, rows, rw):
    """y_l = ReLU(conv_h2l(avgpool2(x_h)) + conv_l2l(x_l) + shift).

    Both convs are fused into one matmul per tap: the wrapper concatenates the
    (avg-pooled) high and low inputs along channels and the weights along Cin,
    and packs adjacent W columns into the channel dim (6 taps, doubled K & N).
    """
    c2 = o_ref.shape[-1]
    acc = jnp.zeros((rows, c2), jnp.float32)
    for kh in range(3):
        for q in range(2):
            off = kh * rw + q
            acc = acc + jnp.dot(x_ref[pl.ds(off, rows), :], w_ref[kh * 2 + q],
                                preferred_element_type=jnp.float32)
    o_ref[...] = jnp.maximum(acc + shift_ref[...], 0.0).astype(o_ref.dtype)


def _maxpool2_kernel(x_ref, o_ref):
    # x_ref: (tb, 2, W/2, 2*C); vertical pairs on dim 1, horizontal pairs in lanes.
    c = o_ref.shape[-1]
    x = x_ref[...]
    v = jnp.maximum(x[:, 0], x[:, 1])
    o_ref[...] = jnp.maximum(v[..., :c], v[..., c:]).astype(o_ref.dtype)


def _avgpool2_kernel(x_ref, o_ref):
    c = o_ref.shape[-1]
    x = x_ref[...].astype(jnp.float32)
    v = x[:, 0] + x[:, 1]
    o_ref[...] = ((v[..., :c] + v[..., c:]) * 0.25).astype(o_ref.dtype)


# ----------------------------- Pallas wrappers ------------------------------

def _pool2x2(x, kernel, out_dtype=None):
    """Single-pass 2x2/stride-2 pooling: one HBM read, one (bf16) write."""
    n, h, w, c = x.shape
    out_dtype = x.dtype if out_dtype is None else out_dtype
    m2, w2 = n * (h // 2), w // 2
    xr = x.reshape(m2, 2, w2, 2 * c)
    # derive the row tile from a small VMEM budget (double-buffered in+out),
    # instead of a fixed constant (v5e default scoped VMEM is only 16 MiB).
    row_bytes = 2 * (2 * w2 * 2 * c * x.dtype.itemsize
                     + w2 * c * jnp.dtype(out_dtype).itemsize)
    tb = min(m2, max(8, (4 * 1024 * 1024) // max(row_bytes, 1)))
    out = pl.pallas_call(
        kernel,
        out_shape=jax.ShapeDtypeStruct((m2, w2, c), out_dtype),
        grid=(pl.cdiv(m2, tb),),
        in_specs=[pl.BlockSpec((tb, 2, w2, 2 * c), lambda i: (i, 0, 0, 0))],
        out_specs=pl.BlockSpec((tb, w2, c), lambda i: (i, 0, 0)),
        compiler_params=pltpu.CompilerParams(
            dimension_semantics=("parallel",),
            vmem_limit_bytes=VMEM_LIMIT_BYTES),
    )(xr)
    return out.reshape(n, h // 2, w2, c)


def maxpool2(x, out_dtype=None):
    return _pool2x2(x, _maxpool2_kernel, out_dtype)


def avgpool2(x, out_dtype=None):
    return _pool2x2(x, _avgpool2_kernel, out_dtype)


def _call_high(a_flat, b_flat, wa, wb, shift2, *, rw, hl, out_dtype):
    n, la, ca = a_flat.shape
    _, lb, cb = b_flat.shape
    c2 = wa.shape[-1]
    rows_h, rows_l = 2 * hl * rw, hl * rw
    kern = functools.partial(_oct_high_kernel, rows_h=rows_h, rows_l=rows_l,
                             rw=rw, hl=hl)
    return pl.pallas_call(
        kern,
        out_shape=jax.ShapeDtypeStruct((n, hl, 2, rw, c2), out_dtype),
        grid=(n,),   # one image per step; "parallel" for megacore sharding
        in_specs=[
            pl.BlockSpec((None, la, ca), lambda i: (i, 0, 0)),
            pl.BlockSpec((None, lb, cb), lambda i: (i, 0, 0)),
            pl.BlockSpec(wa.shape, lambda i: (0, 0, 0)),     # weights resident
            pl.BlockSpec(wb.shape, lambda i: (0, 0, 0)),
            pl.BlockSpec((1, c2), lambda i: (0, 0)),
        ],
        out_specs=pl.BlockSpec((None, hl, 2, rw, c2), lambda i: (i, 0, 0, 0, 0)),
        compiler_params=pltpu.CompilerParams(
            dimension_semantics=("parallel",),
            vmem_limit_bytes=VMEM_LIMIT_BYTES),
    )(a_flat, b_flat, wa, wb, shift2)


def _call_low(x_flat, w, shift2, *, rows, rw, out_dtype):
    n, lx, cx = x_flat.shape
    c2 = w.shape[-1]
    kern = functools.partial(_oct_low_kernel, rows=rows, rw=rw)
    return pl.pallas_call(
        kern,
        out_shape=jax.ShapeDtypeStruct((n, rows, c2), out_dtype),
        grid=(n,),
        in_specs=[
            pl.BlockSpec((None, lx, cx), lambda i: (i, 0, 0)),
            pl.BlockSpec(w.shape, lambda i: (0, 0, 0)),
            pl.BlockSpec((1, c2), lambda i: (0, 0)),
        ],
        out_specs=pl.BlockSpec((None, rows, c2), lambda i: (i, 0, 0)),
        compiler_params=pltpu.CompilerParams(
            dimension_semantics=("parallel",),
            vmem_limit_bytes=VMEM_LIMIT_BYTES),
    )(x_flat, w, shift2)


# --------------------- layout helpers (wrapper-side, cheap) ------------------

def _pack_pad_flatten(x, rw):
    """NHWC -> ((h+3)*rw, 2c): zero-pad (1 top/left, slack right/bottom), fold
    adjacent W columns into channels (free reshape), flatten rows."""
    n, h, w, c = x.shape
    xp = jnp.pad(x.astype(MXU_DTYPE),
                 ((0, 0), (1, 2), (1, 2 * rw - w - 1), (0, 0)))
    return xp.reshape(n, (h + 3) * rw, 2 * c)


def _pad_flatten(x, rw):
    """NHWC -> ((h+3)*rw, c): zero-padded, row-flattened (unpacked)."""
    n, h, w, c = x.shape
    xp = jnp.pad(x.astype(MXU_DTYPE),
                 ((0, 0), (1, 2), (1, rw - w - 1), (0, 0)))
    return xp.reshape(n, (h + 3) * rw, c)


def _unflatten_high(y, hh, wh):
    # (n, hl, 2, rw, 2*cout) -> (n, hh, wh, cout); contiguous reshapes + slice,
    # fuses into the next layer's pad (no extra HBM pass for intermediates).
    n, hl, _, rw, c2 = y.shape
    c = c2 // 2
    y = y.reshape(n, hl * 2, rw, 2, c)[:, :, : wh // 2]
    return y.reshape(n, hh, wh, c)


def _unflatten_low(y, h, w, rw):
    # (n, h*rw, 2*cout) -> (n, h, w, cout)
    n, _, c2 = y.shape
    c = c2 // 2
    y = y.reshape(n, h, rw, 2, c)[:, :, : w // 2]
    return y.reshape(n, h, w, c)


# ----------------------------- weight packing -------------------------------

def _taps_from_oihw(w_oihw):
    # (cout, cin, 3, 3) -> (3, 3, cin, cout)
    return jnp.transpose(w_oihw, (2, 3, 1, 0))


def _pack_w2(w_taps, scale):
    """(3,3,cin,cout) -> (6, 2*cin, 2*cout) column-pair-packed taps.

    Tap t = kh*2 + q reads packed input column pj+q; block (a, b) holds
    W[kh, kw=2q+a-b] (zero outside 0..2).  BN scale folded per cout.
    """
    w = w_taps * scale.reshape(1, 1, 1, -1)
    cin, cout = w.shape[2], w.shape[3]
    blocks = jnp.zeros((3, 2, 2, cin, 2, cout), jnp.float32)
    for kh in range(3):
        for q in range(2):
            for a in range(2):
                for b in range(2):
                    kw = 2 * q + a - b
                    if 0 <= kw <= 2:
                        blocks = blocks.at[kh, q, a, :, b, :].set(w[kh, kw])
    return blocks.reshape(6, 2 * cin, 2 * cout).astype(MXU_DTYPE)


def _dup_out2(w_taps, scale):
    """(3,3,cin,cout) -> (9, cin, 2*cout) with duplicated output halves.

    Used for l->h: the conv runs at low resolution; the duplicated halves give
    both high-res columns of a pair the same value (nearest width-upsample)."""
    w = w_taps * scale.reshape(1, 1, 1, -1)
    cin, cout = w.shape[2], w.shape[3]
    w9 = w.reshape(9, cin, cout)
    return jnp.concatenate([w9, w9], axis=-1).astype(MXU_DTYPE)


# ----------------------------- model glue -----------------------------------

def oct_conv_bn_act(x_h, x_l, p, *, out_dtype):
    """One Conv_BN_ACT octave layer (alpha_in = alpha_out = 0.5), NHWC in/out."""
    n, hh, wh, _ = x_h.shape
    _, hl, wl, _ = x_l.shape
    assert hh == 2 * hl and wh == 2 * wl and wl % 2 == 0

    # ---- high-frequency output: ReLU(conv(x_h) + up2(conv(x_l)) + shift) ----
    rw = _round_up(wl + 2, 8)      # shared, 8-aligned flattened row stride
    a_flat = _pack_pad_flatten(x_h, rw)           # ((hh+3)*rw, 2*cin_h)
    b_flat = _pad_flatten(x_l, rw)                # ((hl+3)*rw, cin_l)
    y_h_flat = _call_high(a_flat, b_flat, p["wa_h2h"], p["wb_l2h"],
                          p["shift_h2"], rw=rw, hl=hl, out_dtype=out_dtype)
    y_h = _unflatten_high(y_h_flat, hh, wh)

    # ---- low-frequency output: ReLU(conv(avgpool2(x_h)) + conv(x_l) + shift) ----
    rw_l = wl // 2 + 1
    rows_lo = hl * rw_l
    x_hp = avgpool2(x_h)                          # (n, hl, wl, cin_h), bf16
    x_cat = jnp.concatenate([x_hp, x_l.astype(x_hp.dtype)], axis=-1)
    c_flat = _pack_pad_flatten(x_cat, rw_l)       # ((hl+3)*rw_l, 2*(cin_h+cin_l))
    y_l_flat = _call_low(c_flat, p["w_low"], p["shift_l2"],
                         rows=rows_lo, rw=rw_l, out_dtype=out_dtype)
    y_l = _unflatten_low(y_l_flat, hl, wl, rw_l)
    return y_h, y_l


def down_forward(x_h, x_l, p1, p2):
    """down.forward: OctMaxPool2d(2) then (OctConv => BN => ReLU) * 2. NHWC."""
    h = maxpool2(x_h, out_dtype=MXU_DTYPE)   # f32 in, bf16 out (cast fused)
    l = maxpool2(x_l, out_dtype=MXU_DTYPE)
    h, l = oct_conv_bn_act(h, l, p1, out_dtype=MXU_DTYPE)   # bf16 intermediates
    h, l = oct_conv_bn_act(h, l, p2, out_dtype=jnp.float32)  # f32 final outputs
    return h, l


# ----------------------------- parameters -----------------------------------

def make_layer_params(key, cin, cout):
    cin_l, cout_l = cin // 2, cout // 2
    cin_h, cout_h = cin - cin_l, cout - cout_l
    ks = jax.random.split(key, 12)
    eps = 1e-5

    def conv_w(k, co, ci):
        return 0.1 * jax.random.normal(k, (co, ci, 3, 3), jnp.float32)

    def bn(kg, kb, km, kv, c):
        gamma = 1.0 + 0.1 * jax.random.normal(kg, (c,), jnp.float32)
        beta = 0.1 * jax.random.normal(kb, (c,), jnp.float32)
        mean = 0.1 * jax.random.normal(km, (c,), jnp.float32)
        var = 1.0 + 0.1 * jax.random.uniform(kv, (c,), jnp.float32)
        scale = gamma * lax.rsqrt(var + eps)
        shift = beta - mean * scale
        return scale, shift

    w_h2h = conv_w(ks[0], cout_h, cin_h)
    w_h2l = conv_w(ks[1], cout_l, cin_h)
    w_l2h = conv_w(ks[2], cout_h, cin_l)
    w_l2l = conv_w(ks[3], cout_l, cin_l)
    scale_h, shift_h = bn(ks[4], ks[5], ks[6], ks[7], cout_h)
    scale_l, shift_l = bn(ks[8], ks[9], ks[10], ks[11], cout_l)

    t_cat = jnp.concatenate([_taps_from_oihw(w_h2l), _taps_from_oihw(w_l2l)],
                            axis=2)   # concat along Cin: [h-part, l-part]
    return dict(
        # kernel-side params (BN scale folded into bf16 conv weights)
        wa_h2h=_pack_w2(_taps_from_oihw(w_h2h), scale_h),
        wb_l2h=_dup_out2(_taps_from_oihw(w_l2h), scale_h),
        w_low=_pack_w2(t_cat, scale_l),
        shift_h2=jnp.tile(shift_h, 2).reshape(1, -1),
        shift_l2=jnp.tile(shift_l, 2).reshape(1, -1),
        # raw params for the references
        w_h2h=w_h2h, w_h2l=w_h2l, w_l2h=w_l2h, w_l2l=w_l2l,
        scale_h=scale_h, shift_h=shift_h, scale_l=scale_l, shift_l=shift_l,
    )


# ----------------------------- pure-JAX reference ----------------------------

def ref_down(x_h, x_l, p1, p2, conv_dtype=jnp.float32, act_dtype=jnp.float32):
    def conv(x, w_oihw, scale):
        w = jnp.transpose(w_oihw * scale[:, None, None, None], (2, 3, 1, 0))
        return lax.conv_general_dilated(
            x.astype(conv_dtype), w.astype(conv_dtype), (1, 1), "SAME",
            dimension_numbers=("NHWC", "HWIO", "NHWC"),
            preferred_element_type=jnp.float32)

    def maxp(x):
        x = x.astype(act_dtype)
        return jnp.maximum(jnp.maximum(x[:, 0::2, 0::2], x[:, 1::2, 0::2]),
                           jnp.maximum(x[:, 0::2, 1::2], x[:, 1::2, 1::2]))

    def avgp(x):
        x = x.astype(jnp.float32)
        return ((x[:, 0::2, 0::2] + x[:, 1::2, 0::2])
                + (x[:, 0::2, 1::2] + x[:, 1::2, 1::2])) * 0.25

    def up2(x):
        return jnp.repeat(jnp.repeat(x, 2, axis=1), 2, axis=2)

    def layer(h, l, p, out_dtype):
        y_h = conv(h, p["w_h2h"], p["scale_h"]) + up2(conv(l, p["w_l2h"], p["scale_h"]))
        y_h = jnp.maximum(y_h + p["shift_h"], 0.0)
        y_l = conv(avgp(h), p["w_h2l"], p["scale_l"]) + conv(l, p["w_l2l"], p["scale_l"])
        y_l = jnp.maximum(y_l + p["shift_l"], 0.0)
        return y_h.astype(out_dtype), y_l.astype(out_dtype)

    h, l = maxp(x_h), maxp(x_l)
    h, l = layer(h, l, p1, act_dtype)
    h, l = layer(h, l, p2, jnp.float32)
    return h, l


# ----------------------------- main ------------------------------------------

if __name__ == "__main__":
    key = jax.random.PRNGKey(0)
    N, IN_CH, OUT_CH, H, W = 2, 8, 16, 16, 16
    cin_l = IN_CH // 2
    cin_h = IN_CH - cin_l

    kx, kl, kp1, kp2 = jax.random.split(key, 4)
    # PyTorch-style NCHW octave input tuple: high-freq full res, low-freq half res.
    x_h_nchw = jax.random.normal(kx, (N, cin_h, H, W), jnp.float32)
    x_l_nchw = jax.random.normal(kl, (N, cin_l, H // 2, W // 2), jnp.float32)

    p1 = make_layer_params(kp1, IN_CH, OUT_CH)
    p2 = make_layer_params(kp2, OUT_CH, OUT_CH)

    # NCHW -> NHWC (kernel layout: channels on the TPU lane dim)
    x_h = jnp.transpose(x_h_nchw, (0, 2, 3, 1))
    x_l = jnp.transpose(x_l_nchw, (0, 2, 3, 1))

    fwd = jax.jit(down_forward)
    y_h, y_l = fwd(x_h, x_l, p1, p2)
    y_h, y_l = jax.block_until_ready((y_h, y_l))

    # 1) exact-math check: reference with the same bf16 rounding points.
    r_h, r_l = ref_down(x_h, x_l, p1, p2, conv_dtype=MXU_DTYPE, act_dtype=MXU_DTYPE)
    assert jnp.allclose(y_h, r_h, rtol=5e-3, atol=5e-3), "high branch mismatch"
    assert jnp.allclose(y_l, r_l, rtol=5e-3, atol=5e-3), "low branch mismatch"

    # 2) sanity check against the full-float32 reference (bf16 quantisation only).
    r_h32, r_l32 = ref_down(x_h, x_l, p1, p2)
    assert jnp.allclose(y_h, r_h32, rtol=1e-1, atol=1e-1), "high branch drift vs f32"
    assert jnp.allclose(y_l, r_l32, rtol=1e-1, atol=1e-1), "low branch drift vs f32"

    # back to PyTorch NCHW output convention:
    # high (N, out/2, H/2, W/2), low (N, out/2, H/4, W/4)
    out_h_nchw = jnp.transpose(y_h, (0, 3, 1, 2))
    out_l_nchw = jnp.transpose(y_l, (0, 3, 1, 2))
    assert out_h_nchw.shape == (N, OUT_CH - OUT_CH // 2, H // 2, W // 2)
    assert out_l_nchw.shape == (N, OUT_CH // 2, H // 4, W // 4)

    print("KERNEL_OK")
</pallas_src>

<mosaic_0001>
module attributes {stable_mosaic.version = 11 : i64} {
  func.func @_maxpool2_kernel(%arg0: i32, %arg1: memref<16x2x8x8xf32, #tpu.memory_space<vmem>>, %arg2: memref<16x8x4xbf16, #tpu.memory_space<vmem>>) attributes {dimension_semantics = [#tpu.dimension_semantics<parallel>], iteration_bounds = array<i64: 1>, scalar_prefetch = 0 : i64, scratch_operands = 0 : i64, tpu.core_type = #tpu.core_type<tc>, window_params = [{transform_indices = @transform_0, window_bounds = array<i64: 16, 2, 8, 8>}, {transform_indices = @transform_1, window_bounds = array<i64: 16, 8, 4>}]} {
    %c0 = arith.constant 0 : index
    %c0_0 = arith.constant 0 : index
    %c0_1 = arith.constant 0 : index
    %c0_2 = arith.constant 0 : index
    %0 = vector.load %arg1[%c0, %c0_0, %c0_1, %c0_2] : memref<16x2x8x8xf32, #tpu.memory_space<vmem>>, vector<16x2x8x8xf32>
    %1 = vector.extract_strided_slice %0 {offsets = [0, 0, 0, 0], sizes = [16, 1, 8, 8], strides = [1, 1, 1, 1]} : vector<16x2x8x8xf32> to vector<16x1x8x8xf32>
    %2 = vector.shape_cast %1 : vector<16x1x8x8xf32> to vector<16x8x8xf32>
    %3 = vector.extract_strided_slice %0 {offsets = [0, 1, 0, 0], sizes = [16, 1, 8, 8], strides = [1, 1, 1, 1]} : vector<16x2x8x8xf32> to vector<16x1x8x8xf32>
    %4 = vector.shape_cast %3 : vector<16x1x8x8xf32> to vector<16x8x8xf32>
    %5 = arith.maximumf %2, %4 : vector<16x8x8xf32>
    %6 = vector.extract_strided_slice %5 {offsets = [0, 0, 0], sizes = [16, 8, 4], strides = [1, 1, 1]} : vector<16x8x8xf32> to vector<16x8x4xf32>
    %7 = vector.extract_strided_slice %5 {offsets = [0, 0, 4], sizes = [16, 8, 4], strides = [1, 1, 1]} : vector<16x8x8xf32> to vector<16x8x4xf32>
    %8 = arith.maximumf %6, %7 : vector<16x8x4xf32>
    %9 = arith.truncf %8 : vector<16x8x4xf32> to vector<16x8x4xbf16>
    %c0_3 = arith.constant 0 : index
    %c0_4 = arith.constant 0 : index
    %c0_5 = arith.constant 0 : index
    %10 = vector.load %arg2[%c0_3, %c0_4, %c0_5] : memref<16x8x4xbf16, #tpu.memory_space<vmem>>, vector<16x8x4xbf16>
    tpu.vector_store %arg2[%c0_3, %c0_4, %c0_5], %9 {strides = array<i32>} : memref<16x8x4xbf16, #tpu.memory_space<vmem>>, vector<16x8x4xbf16>,
    return
  }
  func.func @transform_0(%arg0: i32) -> (i32, i32, i32, i32) {
    %c0_i32 = arith.constant 0 : i32
    %c0_i32_0 = arith.constant 0 : i32
    %c0_i32_1 = arith.constant 0 : i32
    %c0_i32_2 = arith.constant 0 : i32
    return %arg0, %c0_i32, %c0_i32_0, %c0_i32_1 : i32, i32, i32, i32
  }
  func.func @transform_1(%arg0: i32) -> (i32, i32, i32) {
    %c0_i32 = arith.constant 0 : i32
    %c0_i32_0 = arith.constant 0 : i32
    %c0_i32_1 = arith.constant 0 : i32
    return %arg0, %c0_i32, %c0_i32_0 : i32, i32, i32
  }
}

module attributes {stable_mosaic.version = 11 : i64} {
  func.func @_maxpool2_kernel(%arg0: i32, %arg1: memref<8x2x4x8xf32, #tpu.memory_space<vmem>>, %arg2: memref<8x4x4xbf16, #tpu.memory_space<vmem>>) attributes {dimension_semantics = [#tpu.dimension_semantics<parallel>], iteration_bounds = array<i64: 1>, scalar_prefetch = 0 : i64, scratch_operands = 0 : i64, tpu.core_type = #tpu.core_type<tc>, window_params = [{transform_indices = @transform_0, window_bounds = array<i64: 8, 2, 4, 8>}, {transform_indices = @transform_1, window_bounds = array<i64: 8, 4, 4>}]} {
    %c0 = arith.constant 0 : index
    %c0_0 = arith.constant 0 : index
    %c0_1 = arith.constant 0 : index
    %c0_2 = arith.constant 0 : index
    %0 = vector.load %arg1[%c0, %c0_0, %c0_1, %c0_2] : memref<8x2x4x8xf32, #tpu.memory_space<vmem>>, vector<8x2x4x8xf32>
    %1 = vector.extract_strided_slice %0 {offsets = [0, 0, 0, 0], sizes = [8, 1, 4, 8], strides = [1, 1, 1, 1]} : vector<8x2x4x8xf32> to vector<8x1x4x8xf32>
    %2 = vector.shape_cast %1 : vector<8x1x4x8xf32> to vector<8x4x8xf32>
    %3 = vector.extract_strided_slice %0 {offsets = [0, 1, 0, 0], sizes = [8, 1, 4, 8], strides = [1, 1, 1, 1]} : vector<8x2x4x8xf32> to vector<8x1x4x8xf32>
    %4 = vector.shape_cast %3 : vector<8x1x4x8xf32> to vector<8x4x8xf32>
    %5 = arith.maximumf %2, %4 : vector<8x4x8xf32>
    %6 = vector.extract_strided_slice %5 {offsets = [0, 0, 0], sizes = [8, 4, 4], strides = [1, 1, 1]} : vector<8x4x8xf32> to vector<8x4x4xf32>
    %7 = vector.extract_strided_slice %5 {offsets = [0, 0, 4], sizes = [8, 4, 4], strides = [1, 1, 1]} : vector<8x4x8xf32> to vector<8x4x4xf32>
    %8 = arith.maximumf %6, %7 : vector<8x4x4xf32>
    %9 = arith.truncf %8 : vector<8x4x4xf32> to vector<8x4x4xbf16>
    %c0_3 = arith.constant 0 : index
    %c0_4 = arith.constant 0 : index
    %c0_5 = arith.constant 0 : index
    %10 = vector.load %arg2[%c0_3, %c0_4, %c0_5] : memref<8x4x4xbf16, #tpu.memory_space<vmem>>, vector<8x4x4xbf16>
    tpu.vector_store %arg2[%c0_3, %c0_4, %c0_5], %9 {strides = array<i32>} : memref<8x4x4xbf16, #tpu.memory_space<vmem>>, vector<8x4x4xbf16>,
    return
  }
  func.func @transform_0(%arg0: i32) -> (i32, i32, i32, i32) {
    %c0_i32 = arith.constant 0 : i32
    %c0_i32_0 = arith.constant 0 : i32
    %c0_i32_1 = arith.constant 0 : i32
    %c0_i32_2 = arith.constant 0 : i32
    return %arg0, %c0_i32, %c0_i32_0, %c0_i32_1 : i32, i32, i32, i32
  }
  func.func @transform_1(%arg0: i32) -> (i32, i32, i32) {
    %c0_i32 = arith.constant 0 : i32
    %c0_i32_0 = arith.constant 0 : i32
    %c0_i32_1 = arith.constant 0 : i32
    return %arg0, %c0_i32, %c0_i32_0 : i32, i32, i32
  }
}

module attributes {stable_mosaic.version = 11 : i64} {
  func.func @_oct_high_kernel(%arg0: i32, %arg1: memref<1x88x8xbf16, #tpu.memory_space<vmem>>, %arg2: memref<1x56x4xbf16, #tpu.memory_space<vmem>>, %arg3: memref<6x8x16xbf16, #tpu.memory_space<vmem>>, %arg4: memref<9x4x16xbf16, #tpu.memory_space<vmem>>, %arg5: memref<1x16xf32, #tpu.memory_space<vmem>>, %arg6: memref<1x4x2x8x16xbf16, #tpu.memory_space<vmem>>) attributes {dimension_semantics = [#tpu.dimension_semantics<parallel>], iteration_bounds = array<i64: 2>, scalar_prefetch = 0 : i64, scratch_operands = 0 : i64, tpu.core_type = #tpu.core_type<tc>, window_params = [{transform_indices = @transform_0, window_bounds = array<i64: 1, 88, 8>}, {transform_indices = @transform_1, window_bounds = array<i64: 1, 56, 4>}, {pipeline_mode = #tpu.pipeline_mode<synchronous>, transform_indices = @transform_2, window_bounds = array<i64: 6, 8, 16>}, {pipeline_mode = #tpu.pipeline_mode<synchronous>, transform_indices = @transform_3, window_bounds = array<i64: 9, 4, 16>}, {pipeline_mode = #tpu.pipeline_mode<synchronous>, transform_indices = @transform_4, window_bounds = array<i64: 1, 16>}, {transform_indices = @transform_5, window_bounds = array<i64: 1, 4, 2, 8, 16>}]} {
    %cst = arith.constant 0.000000e+00 : f32
    %0 = vector.broadcast %cst : f32 to vector<64x16xf32>
    %cst_0 = arith.constant 0.000000e+00 : f32
    %1 = vector.broadcast %cst_0 : f32 to vector<32x16xf32>
    %c0 = arith.constant 0 : index
    %c0_1 = arith.constant 0 : index
    %c0_2 = arith.constant 0 : index
    %2 = vector.load %arg1[%c0, %c0_1, %c0_2] : memref<1x88x8xbf16, #tpu.memory_space<vmem>>, vector<1x64x8xbf16>
    %3 = vector.shape_cast %2 : vector<1x64x8xbf16> to vector<64x8xbf16>
    %c0_3 = arith.constant 0 : index
    %c0_4 = arith.constant 0 : index
    %c0_5 = arith.constant 0 : index
    %4 = vector.load %arg3[%c0_3, %c0_4, %c0_5] : memref<6x8x16xbf16, #tpu.memory_space<vmem>>, vector<1x8x16xbf16>
    %5 = vector.shape_cast %4 : vector<1x8x16xbf16> to vector<8x16xbf16>
    %cst_6 = arith.constant dense<0.000000e+00> : vector<64x16xf32>
    %6 = tpu.matmul %3, %5, %cst_6 {dimension_numbers = #tpu.dot_dimension_numbers<[1], [0], [0], [1], [0, 0, 1, 1], [], []>} : vector<64x8xbf16>, vector<8x16xbf16>, vector<64x16xf32> -> vector<64x16xf32>
    %7 = arith.addf %0, %6 : vector<64x16xf32>
    %c0_7 = arith.constant 0 : index
    %c1 = arith.constant 1 : index
    %c0_8 = arith.constant 0 : index
    %8 = vector.load %arg1[%c0_7, %c1, %c0_8] : memref<1x88x8xbf16, #tpu.memory_space<vmem>>, vector<1x64x8xbf16>
    %9 = vector.shape_cast %8 : vector<1x64x8xbf16> to vector<64x8xbf16>
    %c1_9 = arith.constant 1 : index
    %c0_10 = arith.constant 0 : index
    %c0_11 = arith.constant 0 : index
    %10 = vector.load %arg3[%c1_9, %c0_10, %c0_11] : memref<6x8x16xbf16, #tpu.memory_space<vmem>>, vector<1x8x16xbf16>
    %11 = vector.shape_cast %10 : vector<1x8x16xbf16> to vector<8x16xbf16>
    %cst_12 = arith.constant dense<0.000000e+00> : vector<64x16xf32>
    %12 = tpu.matmul %9, %11, %cst_12 {dimension_numbers = #tpu.dot_dimension_numbers<[1], [0], [0], [1], [0, 0, 1, 1], [], []>} : vector<64x8xbf16>, vector<8x16xbf16>, vector<64x16xf32> -> vector<64x16xf32>
    %13 = arith.addf %7, %12 : vector<64x16xf32>
    %c0_13 = arith.constant 0 : index
    %c0_14 = arith.constant 0 : index
    %c0_15 = arith.constant 0 : index
    %14 = vector.load %arg2[%c0_13, %c0_14, %c0_15] : memref<1x56x4xbf16, #tpu.memory_space<vmem>>, vector<1x32x4xbf16>
    %15 = vector.shape_cast %14 : vector<1x32x4xbf16> to vector<32x4xbf16>
    %c0_16 = arith.constant 0 : index
    %c0_17 = arith.constant 0 : index
    %c0_18 = arith.constant 0 : index
    %16 = vector.load %arg4[%c0_16, %c0_17, %c0_18] : memref<9x4x16xbf16, #tpu.memory_space<vmem>>, vector<1x4x16xbf16>
    %17 = vector.shape_cast %16 : vector<1x4x16xbf16> to vector<4x16xbf16>
    %cst_19 = arith.constant dense<0.000000e+00> : vector<32x16xf32>
    %18 = tpu.matmul %15, %17, %cst_19 {dimension_numbers = #tpu.dot_dimension_numbers<[1], [0], [0], [1], [0, 0, 1, 1], [], []>} : vector<32x4xbf16>, vector<4x16xbf16>, vector<32x16xf32> -> vector<32x16xf32>
    %19 = arith.addf %1, %18 : vector<32x16xf32>
    %c0_20 = arith.constant 0 : index
    %c1_21 = arith.constant 1 : index
    %c0_22 = arith.constant 0 : index
    %20 = vector.load %arg2[%c0_20, %c1_21, %c0_22] : memref<1x56x4xbf16, #tpu.memory_space<vmem>>, vector<1x32x4xbf16>
    %21 = vector.shape_cast %20 : vector<1x32x4xbf16> to vector<32x4xbf16>
    %c1_23 = arith.constant 1 : index
    %c0_24 = arith.constant 0 : index
    %c0_25 = arith.constant 0 : index
    %22 = vector.load %arg4[%c1_23, %c0_24, %c0_25] : memref<9x4x16xbf16, #tpu.memory_space<vmem>>, vector<1x4x16xbf16>
    %23 = vector.shape_cast %22 : vector<1x4x16xbf16> to vector<4x16xbf16>
    %cst_26 = arith.constant dense<0.000000e+00> : vector<32x16xf32>
    %24 = tpu.matmul %21, %23, %cst_26 {dimension_numbers = #tpu.dot_dimension_numbers<[1], [0], [0], [1], [0, 0, 1, 1], [], []>} : vector<32x4xbf16>, vector<4x16xbf16>, vector<32x16xf32> -> vector<32x16xf32>
    %25 = arith.addf %19, %24 : vector<32x16xf32>
    %c0_27 = arith.constant 0 : index
    %c2 = arith.constant 2 : index
    %c0_28 = arith.constant 0 : index
    %26 = vector.load %arg2[%c0_27, %c2, %c0_28] : memref<1x56x4xbf16, #tpu.memory_space<vmem>>, vector<1x32x4xbf16>
    %27 = vector.shape_cast %26 : vector<1x32x4xbf16> to vector<32x4xbf16>
    %c2_29 = arith.constant 2 : index
    %c0_30 = arith.constant 0 : index
    %c0_31 = arith.constant 0 : index
    %28 = vector.load %arg4[%c2_29, %c0_30, %c0_31] : memref<9x4x16xbf16, #tpu.memory_space<vmem>>, vector<1x4x16xbf16>
    %29 = vector.shape_cast %28 : vector<1x4x16xbf16> to vector<4x16xbf16>
    %cst_32 = arith.constant dense<0.000000e+00> : vector<32x16xf32>
    %30 = tpu.matmul %27, %29, %cst_32 {dimension_numbers = #tpu.dot_dimension_numbers<[1], [0], [0], [1], [0, 0, 1, 1], [], []>} : vector<32x4xbf16>, vector<4x16xbf16>, vector<32x16xf32> -> vector<32x16xf32>
    %31 = arith.addf %25, %30 : vector<32x16xf32>
    %c0_33 = arith.constant 0 : index
    %c8 = arith.constant 8 : index
    %c0_34 = arith.constant 0 : index
    %32 = vector.load %arg1[%c0_33, %c8, %c0_34] : memref<1x88x8xbf16, #tpu.memory_space<vmem>>, vector<1x64x8xbf16>
    %33 = vector.shape_cast %32 : vector<1x64x8xbf16> to vector<64x8xbf16>
    %c2_35 = arith.constant 2 : index
    %c0_36 = arith.constant 0 : index
    %c0_37 = arith.constant 0 : index
    %34 = vector.load %arg3[%c2_35, %c0_36, %c0_37] : memref<6x8x16xbf16, #tpu.memory_space<vmem>>, vector<1x8x16xbf16>
    %35 = vector.shape_cast %34 : vector<1x8x16xbf16> to vector<8x16xbf16>
    %cst_38 = arith.constant dense<0.000000e+00> : vector<64x16xf32>
    %36 = tpu.matmul %33, %35, %cst_38 {dimension_numbers = #tpu.dot_dimension_numbers<[1], [0], [0], [1], [0, 0, 1, 1], [], []>} : vector<64x8xbf16>, vector<8x16xbf16>, vector<64x16xf32> -> vector<64x16xf32>
    %37 = arith.addf %13, %36 : vector<64x16xf32>
    %c0_39 = arith.constant 0 : index
    %c9 = arith.constant 9 : index
    %c0_40 = arith.constant 0 : index
    %38 = vector.load %arg1[%c0_39, %c9, %c0_40] : memref<1x88x8xbf16, #tpu.memory_space<vmem>>, vector<1x64x8xbf16>
    %39 = vector.shape_cast %38 : vector<1x64x8xbf16> to vector<64x8xbf16>
    %c3 = arith.constant 3 : index
    %c0_41 = arith.constant 0 : index
    %c0_42 = arith.constant 0 : index
    %40 = vector.load %arg3[%c3, %c0_41, %c0_42] : memref<6x8x16xbf16, #tpu.memory_space<vmem>>, vector<1x8x16xbf16>
    %41 = vector.shape_cast %40 : vector<1x8x16xbf16> to vector<8x16xbf16>
    %cst_43 = arith.constant dense<0.000000e+00> : vector<64x16xf32>
    %42 = tpu.matmul %39, %41, %cst_43 {dimension_numbers = #tpu.dot_dimension_numbers<[1], [0], [0], [1], [0, 0, 1, 1], [], []>} : vector<64x8xbf16>, vector<8x16xbf16>, vector<64x16xf32> -> vector<64x16xf32>
    %43 = arith.addf %37, %42 : vector<64x16xf32>
    %c0_44 = arith.constant 0 : index
    %c8_45 = arith.constant 8 : index
    %c0_46 = arith.constant 0 : index
    %44 = vector.load %arg2[%c0_44, %c8_45, %c0_46] : memref<1x56x4xbf16, #tpu.memory_space<vmem>>, vector<1x32x4xbf16>
    %45 = vector.shape_cast %44 : vector<1x32x4xbf16> to vector<32x4xbf16>
    %c3_47 = arith.constant 3 : index
    %c0_48 = arith.constant 0 : index
    %c0_49 = arith.constant 0 : index
    %46 = vector.load %arg4[%c3_47, %c0_48, %c0_49] : memref<9x4x16xbf16, #tpu.memory_space<vmem>>, vector<1x4x16xbf16>
    %47 = vector.shape_cast %46 : vector<1x4x16xbf16> to vector<4x16xbf16>
    %cst_50 = arith.constant dense<0.000000e+00> : vector<32x16xf32>
    %48 = tpu.matmul %45, %47, %cst_50 {dimension_numbers = #tpu.dot_dimension_numbers<[1], [0], [0], [1], [0, 0, 1, 1], [], []>} : vector<32x4xbf16>, vector<4x16xbf16>, vector<32x16xf32> -> vector<32x16xf32>
    %49 = arith.addf %31, %48 : vector<32x16xf32>
    %c0_51 = arith.constant 0 : index
    %c9_52 = arith.constant 9 : index
    %c0_53 = arith.constant 0 : index
    %50 = vector.load %arg2[%c0_51, %c9_52, %c0_53] : memref<1x56x4xbf16, #tpu.memory_space<vmem>>, vector<1x32x4xbf16>
    %51 = vector.shape_cast %50 : vector<1x32x4xbf16> to vector<32x4xbf16>
    %c4 = arith.constant 4 : index
    %c0_54 = arith.constant 0 : index
    %c0_55 = arith.constant 0 : index
    %52 = vector.load %arg4[%c4, %c0_54, %c0_55] : memref<9x4x16xbf16, #tpu.memory_space<vmem>>, vector<1x4x16xbf16>
    %53 = vector.shape_cast %52 : vector<1x4x16xbf16> to vector<4x16xbf16>
    %cst_56 = arith.constant dense<0.000000e+00> : vector<32x16xf32>
    %54 = tpu.matmul %51, %53, %cst_56 {dimension_numbers = #tpu.dot_dimension_numbers<[1], [0], [0], [1], [0, 0, 1, 1], [], []>} : vector<32x4xbf16>, vector<4x16xbf16>, vector<32x16xf32> -> vector<32x16xf32>
    %55 = arith.addf %49, %54 : vector<32x16xf32>
    %c0_57 = arith.constant 0 : index
    %c10 = arith.constant 10 : index
    %c0_58 = arith.constant 0 : index
    %56 = vector.load %arg2[%c0_57, %c10, %c0_58] : memref<1x56x4xbf16, #tpu.memory_space<vmem>>, vector<1x32x4xbf16>
    %57 = vector.shape_cast %56 : vector<1x32x4xbf16> to vector<32x4xbf16>
    %c5 = arith.constant 5 : index
    %c0_59 = arith.constant 0 : index
    %c0_60 = arith.constant 0 : index
    %58 = vector.load %arg4[%c5, %c0_59, %c0_60] : memref<9x4x16xbf16, #tpu.memory_space<vmem>>, vector<1x4x16xbf16>
    %59 = vector.shape_cast %58 : vector<1x4x16xbf16> to vector<4x16xbf16>
    %cst_61 = arith.constant dense<0.000000e+00> : vector<32x16xf32>
    %60 = tpu.matmul %57, %59, %cst_61 {dimension_numbers = #tpu.dot_dimension_numbers<[1], [0], [0], [1], [0, 0, 1, 1], [], []>} : vector<32x4xbf16>, vector<4x16xbf16>, vector<32x16xf32> -> vector<32x16xf32>
    %61 = arith.addf %55, %60 : vector<32x16xf32>
    %c0_62 = arith.constant 0 : index
    %c16 = arith.constant 16 : index
    %c0_63 = arith.constant 0 : index
    %62 = vector.load %arg1[%c0_62, %c16, %c0_63] : memref<1x88x8xbf16, #tpu.memory_space<vmem>>, vector<1x64x8xbf16>
    %63 = vector.shape_cast %62 : vector<1x64x8xbf16> to vector<64x8xbf16>
    %c4_64 = arith.constant 4 : index
    %c0_65 = arith.constant 0 : index
    %c0_66 = arith.constant 0 : index
    %64 = vector.load %arg3[%c4_64, %c0_65, %c0_66] : memref<6x8x16xbf16, #tpu.memory_space<vmem>>, vector<1x8x16xbf16>
    %65 = vector.shape_cast %64 : vector<1x8x16xbf16> to vector<8x16xbf16>
    %cst_67 = arith.constant dense<0.000000e+00> : vector<64x16xf32>
    %66 = tpu.matmul %63, %65, %cst_67 {dimension_numbers = #tpu.dot_dimension_numbers<[1], [0], [0], [1], [0, 0, 1, 1], [], []>} : vector<64x8xbf16>, vector<8x16xbf16>, vector<64x16xf32> -> vector<64x16xf32>
    %67 = arith.addf %43, %66 : vector<64x16xf32>
    %c0_68 = arith.constant 0 : index
    %c17 = arith.constant 17 : index
    %c0_69 = arith.constant 0 : index
    %68 = vector.load %arg1[%c0_68, %c17, %c0_69] : memref<1x88x8xbf16, #tpu.memory_space<vmem>>, vector<1x64x8xbf16>
    %69 = vector.shape_cast %68 : vector<1x64x8xbf16> to vector<64x8xbf16>
    %c5_70 = arith.constant 5 : index
    %c0_71 = arith.constant 0 : index
    %c0_72 = arith.constant 0 : index
    %70 = vector.load %arg3[%c5_70, %c0_71, %c0_72] : memref<6x8x16xbf16, #tpu.memory_space<vmem>>, vector<1x8x16xbf16>
    %71 = vector.shape_cast %70 : vector<1x8x16xbf16> to vector<8x16xbf16>
    %cst_73 = arith.constant dense<0.000000e+00> : vector<64x16xf32>
    %72 = tpu.matmul %69, %71, %cst_73 {dimension_numbers = #tpu.dot_dimension_numbers<[1], [0], [0], [1], [0, 0, 1, 1], [], []>} : vector<64x8xbf16>, vector<8x16xbf16>, vector<64x16xf32> -> vector<64x16xf32>
    %73 = arith.addf %67, %72 : vector<64x16xf32>
    %c0_74 = arith.constant 0 : index
    %c16_75 = arith.constant 16 : index
    %c0_76 = arith.constant 0 : index
    %74 = vector.load %arg2[%c0_74, %c16_75, %c0_76] : memref<1x56x4xbf16, #tpu.memory_space<vmem>>, vector<1x32x4xbf16>
    %75 = vector.shape_cast %74 : vector<1x32x4xbf16> to vector<32x4xbf16>
    %c6 = arith.constant 6 : index
    %c0_77 = arith.constant 0 : index
    %c0_78 = arith.constant 0 : index
    %76 = vector.load %arg4[%c6, %c0_77, %c0_78] : memref<9x4x16xbf16, #tpu.memory_space<vmem>>, vector<1x4x16xbf16>
    %77 = vector.shape_cast %76 : vector<1x4x16xbf16> to vector<4x16xbf16>
    %cst_79 = arith.constant dense<0.000000e+00> : vector<32x16xf32>
    %78 = tpu.matmul %75, %77, %cst_79 {dimension_numbers = #tpu.dot_dimension_numbers<[1], [0], [0], [1], [0, 0, 1, 1], [], []>} : vector<32x4xbf16>, vector<4x16xbf16>, vector<32x16xf32> -> vector<32x16xf32>
    %79 = arith.addf %61, %78 : vector<32x16xf32>
    %c0_80 = arith.constant 0 : index
    %c17_81 = arith.constant 17 : index
    %c0_82 = arith.constant 0 : index
    %80 = vector.load %arg2[%c0_80, %c17_81, %c0_82] : memref<1x56x4xbf16, #tpu.memory_space<vmem>>, vector<1x32x4xbf16>
    %81 = vector.shape_cast %80 : vector<1x32x4xbf16> to vector<32x4xbf16>
    %c7 = arith.constant 7 : index
    %c0_83 = arith.constant 0 : index
    %c0_84 = arith.constant 0 : index
    %82 = vector.load %arg4[%c7, %c0_83, %c0_84] : memref<9x4x16xbf16, #tpu.memory_space<vmem>>, vector<1x4x16xbf16>
    %83 = vector.shape_cast %82 : vector<1x4x16xbf16> to vector<4x16xbf16>
    %cst_85 = arith.constant dense<0.000000e+00> : vector<32x16xf32>
    %84 = tpu.matmul %81, %83, %cst_85 {dimension_numbers = #tpu.dot_dimension_numbers<[1], [0], [0], [1], [0, 0, 1, 1], [], []>} : vector<32x4xbf16>, vector<4x16xbf16>, vector<32x16xf32> -> vector<32x16xf32>
    %85 = arith.addf %79, %84 : vector<32x16xf32>
    %c0_86 = arith.constant 0 : index
    %c18 = arith.constant 18 : index
    %c0_87 = arith.constant 0 : index
    %86 = vector.load %arg2[%c0_86, %c18, %c0_87] : memref<1x56x4xbf16, #tpu.memory_space<vmem>>, vector<1x32x4xbf16>
    %87 = vector.shape_cast %86 : vector<1x32x4xbf16> to vector<32x4xbf16>
    %c8_88 = arith.constant 8 : index
    %c0_89 = arith.constant 0 : index
    %c0_90 = arith.constant 0 : index
    %88 = vector.load %arg4[%c8_88, %c0_89, %c0_90] : memref<9x4x16xbf16, #tpu.memory_space<vmem>>, vector<1x4x16xbf16>
    %89 = vector.shape_cast %88 : vector<1x4x16xbf16> to vector<4x16xbf16>
    %cst_91 = arith.constant dense<0.000000e+00> : vector<32x16xf32>
    %90 = tpu.matmul %87, %89, %cst_91 {dimension_numbers = #tpu.dot_dimension_numbers<[1], [0], [0], [1], [0, 0, 1, 1], [], []>} : vector<32x4xbf16>, vector<4x16xbf16>, vector<32x16xf32> -> vector<32x16xf32>
    %91 = arith.addf %85, %90 : vector<32x16xf32>
    %92 = vector.shape_cast %73 : vector<64x16xf32> to vector<4x2x8x16xf32>
    %93 = vector.shape_cast %91 : vector<32x16xf32> to vector<4x1x8x16xf32>
    %94 = vector.broadcast %93 : vector<4x1x8x16xf32> to vector<4x2x8x16xf32>
    %95 = arith.addf %92, %94 : vector<4x2x8x16xf32>
    %c0_92 = arith.constant 0 : index
    %c0_93 = arith.constant 0 : index
    %96 = vector.load %arg5[%c0_92, %c0_93] : memref<1x16xf32, #tpu.memory_space<vmem>>, vector<1x16xf32>
    %97 = vector.shape_cast %96 : vector<1x16xf32> to vector<1x1x1x16xf32>
    %98 = vector.broadcast %97 : vector<1x1x1x16xf32> to vector<4x2x8x16xf32>
    %99 = arith.addf %95, %98 : vector<4x2x8x16xf32>
    %cst_94 = arith.constant 0.000000e+00 : f32
    %100 = vector.broadcast %cst_94 : f32 to vector<4x2x8x16xf32>
    %101 = arith.maximumf %99, %100 : vector<4x2x8x16xf32>
    %102 = arith.truncf %101 : vector<4x2x8x16xf32> to vector<4x2x8x16xbf16>
    %c0_95 = arith.constant 0 : index
    %c0_96 = arith.constant 0 : index
    %c0_97 = arith.constant 0 : index
    %c0_98 = arith.constant 0 : index
    %c0_99 = arith.constant 0 : index
    %103 = vector.load %arg6[%c0_95, %c0_96, %c0_97, %c0_98, %c0_99] : memref<1x4x2x8x16xbf16, #tpu.memory_space<vmem>>, vector<1x4x2x8x16xbf16>
    %104 = vector.shape_cast %103 : vector<1x4x2x8x16xbf16> to vector<4x2x8x16xbf16>
    %105 = vector.shape_cast %102 : vector<4x2x8x16xbf16> to vector<1x4x2x8x16xbf16>
    tpu.vector_store %arg6[%c0_95, %c0_96, %c0_97, %c0_98, %c0_99], %105 {strides = array<i32>} : memref<1x4x2x8x16xbf16, #tpu.memory_space<vmem>>, vector<1x4x2x8x16xbf16>,
    return
  }
  func.func @transform_0(%arg0: i32) -> (i32, i32, i32) {
    %c0_i32 = arith.constant 0 : i32
    %c0_i32_0 = arith.constant 0 : i32
    %c0_i32_1 = arith.constant 0 : i32
    return %arg0, %c0_i32, %c0_i32_0 : i32, i32, i32
  }
  func.func @transform_1(%arg0: i32) -> (i32, i32, i32) {
    %c0_i32 = arith.constant 0 : i32
    %c0_i32_0 = arith.constant 0 : i32
    %c0_i32_1 = arith.constant 0 : i32
    return %arg0, %c0_i32, %c0_i32_0 : i32, i32, i32
  }
  func.func @transform_2(%arg0: i32) -> (i32, i32, i32) {
    %c0_i32 = arith.constant 0 : i32
    %c0_i32_0 = arith.constant 0 : i32
    %c0_i32_1 = arith.constant 0 : i32
    %c0_i32_2 = arith.constant 0 : i32
    return %c0_i32, %c0_i32_0, %c0_i32_1 : i32, i32, i32
  }
  func.func @transform_3(%arg0: i32) -> (i32, i32, i32) {
    %c0_i32 = arith.constant 0 : i32
    %c0_i32_0 = arith.constant 0 : i32
    %c0_i32_1 = arith.constant 0 : i32
    %c0_i32_2 = arith.constant 0 : i32
    return %c0_i32, %c0_i32_0, %c0_i32_1 : i32, i32, i32
  }
  func.func @transform_4(%arg0: i32) -> (i32, i32) {
    %c0_i32 = arith.constant 0 : i32
    %c0_i32_0 = arith.constant 0 : i32
    %c0_i32_1 = arith.constant 0 : i32
    return %c0_i32, %c0_i32_0 : i32, i32
  }
  func.func @transform_5(%arg0: i32) -> (i32, i32, i32, i32, i32) {
    %c0_i32 = arith.constant 0 : i32
    %c0_i32_0 = arith.constant 0 : i32
    %c0_i32_1 = arith.constant 0 : i32
    %c0_i32_2 = arith.constant 0 : i32
    %c0_i32_3 = arith.constant 0 : i32
    return %arg0, %c0_i32, %c0_i32_0, %c0_i32_1, %c0_i32_2 : i32, i32, i32, i32, i32
  }
}

module attributes {stable_mosaic.version = 11 : i64} {
  func.func @_avgpool2_kernel(%arg0: i32, %arg1: memref<8x2x4x16xbf16, #tpu.memory_space<vmem>>, %arg2: memref<8x4x8xbf16, #tpu.memory_space<vmem>>) attributes {dimension_semantics = [#tpu.dimension_semantics<parallel>], iteration_bounds = array<i64: 1>, scalar_prefetch = 0 : i64, scratch_operands = 0 : i64, tpu.core_type = #tpu.core_type<tc>, window_params = [{transform_indices = @transform_0, window_bounds = array<i64: 8, 2, 4, 16>}, {transform_indices = @transform_1, window_bounds = array<i64: 8, 4, 8>}]} {
    %c0 = arith.constant 0 : index
    %c0_0 = arith.constant 0 : index
    %c0_1 = arith.constant 0 : index
    %c0_2 = arith.constant 0 : index
    %0 = vector.load %arg1[%c0, %c0_0, %c0_1, %c0_2] : memref<8x2x4x16xbf16, #tpu.memory_space<vmem>>, vector<8x2x4x16xbf16>
    %1 = arith.extf %0 : vector<8x2x4x16xbf16> to vector<8x2x4x16xf32>
    %2 = vector.extract_strided_slice %1 {offsets = [0, 0, 0, 0], sizes = [8, 1, 4, 16], strides = [1, 1, 1, 1]} : vector<8x2x4x16xf32> to vector<8x1x4x16xf32>
    %3 = vector.shape_cast %2 : vector<8x1x4x16xf32> to vector<8x4x16xf32>
    %4 = vector.extract_strided_slice %1 {offsets = [0, 1, 0, 0], sizes = [8, 1, 4, 16], strides = [1, 1, 1, 1]} : vector<8x2x4x16xf32> to vector<8x1x4x16xf32>
    %5 = vector.shape_cast %4 : vector<8x1x4x16xf32> to vector<8x4x16xf32>
    %6 = arith.addf %3, %5 : vector<8x4x16xf32>
    %7 = vector.extract_strided_slice %6 {offsets = [0, 0, 0], sizes = [8, 4, 8], strides = [1, 1, 1]} : vector<8x4x16xf32> to vector<8x4x8xf32>
    %8 = vector.extract_strided_slice %6 {offsets = [0, 0, 8], sizes = [8, 4, 8], strides = [1, 1, 1]} : vector<8x4x16xf32> to vector<8x4x8xf32>
    %9 = arith.addf %7, %8 : vector<8x4x8xf32>
    %cst = arith.constant 2.500000e-01 : f32
    %10 = vector.broadcast %cst : f32 to vector<8x4x8xf32>
    %11 = arith.mulf %9, %10 : vector<8x4x8xf32>
    %12 = arith.truncf %11 : vector<8x4x8xf32> to vector<8x4x8xbf16>
    %c0_3 = arith.constant 0 : index
    %c0_4 = arith.constant 0 : index
    %c0_5 = arith.constant 0 : index
    %13 = vector.load %arg2[%c0_3, %c0_4, %c0_5] : memref<8x4x8xbf16, #tpu.memory_space<vmem>>, vector<8x4x8xbf16>
    tpu.vector_store %arg2[%c0_3, %c0_4, %c0_5], %12 {strides = array<i32>} : memref<8x4x8xbf16, #tpu.memory_space<vmem>>, vector<8x4x8xbf16>,
    return
  }
  func.func @transform_0(%arg0: i32) -> (i32, i32, i32, i32) {
    %c0_i32 = arith.constant 0 : i32
    %c0_i32_0 = arith.constant 0 : i32
    %c0_i32_1 = arith.constant 0 : i32
    %c0_i32_2 = arith.constant 0 : i32
    return %arg0, %c0_i32, %c0_i32_0, %c0_i32_1 : i32, i32, i32, i32
  }
  func.func @transform_1(%arg0: i32) -> (i32, i32, i32) {
    %c0_i32 = arith.constant 0 : i32
    %c0_i32_0 = arith.constant 0 : i32
    %c0_i32_1 = arith.constant 0 : i32
    return %arg0, %c0_i32, %c0_i32_0 : i32, i32, i32
  }
}

module attributes {stable_mosaic.version = 11 : i64} {
  func.func @_avgpool2_kernel(%arg0: i32, %arg1: memref<8x2x4x8xbf16, #tpu.memory_space<vmem>>, %arg2: memref<8x4x4xbf16, #tpu.memory_space<vmem>>) attributes {dimension_semantics = [#tpu.dimension_semantics<parallel>], iteration_bounds = array<i64: 1>, scalar_prefetch = 0 : i64, scratch_operands = 0 : i64, tpu.core_type = #tpu.core_type<tc>, window_params = [{transform_indices = @transform_0, window_bounds = array<i64: 8, 2, 4, 8>}, {transform_indices = @transform_1, window_bounds = array<i64: 8, 4, 4>}]} {
    %c0 = arith.constant 0 : index
    %c0_0 = arith.constant 0 : index
    %c0_1 = arith.constant 0 : index
    %c0_2 = arith.constant 0 : index
    %0 = vector.load %arg1[%c0, %c0_0, %c0_1, %c0_2] : memref<8x2x4x8xbf16, #tpu.memory_space<vmem>>, vector<8x2x4x8xbf16>
    %1 = arith.extf %0 : vector<8x2x4x8xbf16> to vector<8x2x4x8xf32>
    %2 = vector.extract_strided_slice %1 {offsets = [0, 0, 0, 0], sizes = [8, 1, 4, 8], strides = [1, 1, 1, 1]} : vector<8x2x4x8xf32> to vector<8x1x4x8xf32>
    %3 = vector.shape_cast %2 : vector<8x1x4x8xf32> to vector<8x4x8xf32>
    %4 = vector.extract_strided_slice %1 {offsets = [0, 1, 0, 0], sizes = [8, 1, 4, 8], strides = [1, 1, 1, 1]} : vector<8x2x4x8xf32> to vector<8x1x4x8xf32>
    %5 = vector.shape_cast %4 : vector<8x1x4x8xf32> to vector<8x4x8xf32>
    %6 = arith.addf %3, %5 : vector<8x4x8xf32>
    %7 = vector.extract_strided_slice %6 {offsets = [0, 0, 0], sizes = [8, 4, 4], strides = [1, 1, 1]} : vector<8x4x8xf32> to vector<8x4x4xf32>
    %8 = vector.extract_strided_slice %6 {offsets = [0, 0, 4], sizes = [8, 4, 4], strides = [1, 1, 1]} : vector<8x4x8xf32> to vector<8x4x4xf32>
    %9 = arith.addf %7, %8 : vector<8x4x4xf32>
    %cst = arith.constant 2.500000e-01 : f32
    %10 = vector.broadcast %cst : f32 to vector<8x4x4xf32>
    %11 = arith.mulf %9, %10 : vector<8x4x4xf32>
    %12 = arith.truncf %11 : vector<8x4x4xf32> to vector<8x4x4xbf16>
    %c0_3 = arith.constant 0 : index
    %c0_4 = arith.constant 0 : index
    %c0_5 = arith.constant 0 : index
    %13 = vector.load %arg2[%c0_3, %c0_4, %c0_5] : memref<8x4x4xbf16, #tpu.memory_space<vmem>>, vector<8x4x4xbf16>
    tpu.vector_store %arg2[%c0_3, %c0_4, %c0_5], %12 {strides = array<i32>} : memref<8x4x4xbf16, #tpu.memory_space<vmem>>, vector<8x4x4xbf16>,
    return
  }
  func.func @transform_0(%arg0: i32) -> (i32, i32, i32, i32) {
    %c0_i32 = arith.constant 0 : i32
    %c0_i32_0 = arith.constant 0 : i32
    %c0_i32_1 = arith.constant 0 : i32
    %c0_i32_2 = arith.constant 0 : i32
    return %arg0, %c0_i32, %c0_i32_0, %c0_i32_1 : i32, i32, i32, i32
  }
  func.func @transform_1(%arg0: i32) -> (i32, i32, i32) {
    %c0_i32 = arith.constant 0 : i32
    %c0_i32_0 = arith.constant 0 : i32
    %c0_i32_1 = arith.constant 0 : i32
    return %arg0, %c0_i32, %c0_i32_0 : i32, i32, i32
  }
}

module attributes {stable_mosaic.version = 11 : i64} {
  func.func @_oct_low_kernel(%arg0: i32, %arg1: memref<1x21x16xbf16, #tpu.memory_space<vmem>>, %arg2: memref<6x16x16xbf16, #tpu.memory_space<vmem>>, %arg3: memref<1x16xf32, #tpu.memory_space<vmem>>, %arg4: memref<1x12x16xbf16, #tpu.memory_space<vmem>>) attributes {dimension_semantics = [#tpu.dimension_semantics<parallel>], iteration_bounds = array<i64: 2>, scalar_prefetch = 0 : i64, scratch_operands = 0 : i64, tpu.core_type = #tpu.core_type<tc>, window_params = [{transform_indices = @transform_0, window_bounds = array<i64: 1, 21, 16>}, {pipeline_mode = #tpu.pipeline_mode<synchronous>, transform_indices = @transform_1, window_bounds = array<i64: 6, 16, 16>}, {pipeline_mode = #tpu.pipeline_mode<synchronous>, transform_indices = @transform_2, window_bounds = array<i64: 1, 16>}, {transform_indices = @transform_3, window_bounds = array<i64: 1, 12, 16>}]} {
    %cst = arith.constant 0.000000e+00 : f32
    %0 = vector.broadcast %cst : f32 to vector<12x16xf32>
    %c0 = arith.constant 0 : index
    %c0_0 = arith.constant 0 : index
    %c0_1 = arith.constant 0 : index
    %1 = vector.load %arg1[%c0, %c0_0, %c0_1] : memref<1x21x16xbf16, #tpu.memory_space<vmem>>, vector<1x12x16xbf16>
    %2 = vector.shape_cast %1 : vector<1x12x16xbf16> to vector<12x16xbf16>
    %c0_2 = arith.constant 0 : index
    %c0_3 = arith.constant 0 : index
    %c0_4 = arith.constant 0 : index
    %3 = vector.load %arg2[%c0_2, %c0_3, %c0_4] : memref<6x16x16xbf16, #tpu.memory_space<vmem>>, vector<1x16x16xbf16>
    %4 = vector.shape_cast %3 : vector<1x16x16xbf16> to vector<16x16xbf16>
    %cst_5 = arith.constant dense<0.000000e+00> : vector<12x16xf32>
    %5 = tpu.matmul %2, %4, %cst_5 {dimension_numbers = #tpu.dot_dimension_numbers<[1], [0], [0], [1], [0, 0, 1, 1], [], []>} : vector<12x16xbf16>, vector<16x16xbf16>, vector<12x16xf32> -> vector<12x16xf32>
    %6 = arith.addf %0, %5 : vector<12x16xf32>
    %c0_6 = arith.constant 0 : index
    %c1 = arith.constant 1 : index
    %c0_7 = arith.constant 0 : index
    %7 = vector.load %arg1[%c0_6, %c1, %c0_7] : memref<1x21x16xbf16, #tpu.memory_space<vmem>>, vector<1x12x16xbf16>
    %8 = vector.shape_cast %7 : vector<1x12x16xbf16> to vector<12x16xbf16>
    %c1_8 = arith.constant 1 : index
    %c0_9 = arith.constant 0 : index
    %c0_10 = arith.constant 0 : index
    %9 = vector.load %arg2[%c1_8, %c0_9, %c0_10] : memref<6x16x16xbf16, #tpu.memory_space<vmem>>, vector<1x16x16xbf16>
    %10 = vector.shape_cast %9 : vector<1x16x16xbf16> to vector<16x16xbf16>
    %cst_11 = arith.constant dense<0.000000e+00> : vector<12x16xf32>
    %11 = tpu.matmul %8, %10, %cst_11 {dimension_numbers = #tpu.dot_dimension_numbers<[1], [0], [0], [1], [0, 0, 1, 1], [], []>} : vector<12x16xbf16>, vector<16x16xbf16>, vector<12x16xf32> -> vector<12x16xf32>
    %12 = arith.addf %6, %11 : vector<12x16xf32>
    %c0_12 = arith.constant 0 : index
    %c3 = arith.constant 3 : index
    %c0_13 = arith.constant 0 : index
    %13 = vector.load %arg1[%c0_12, %c3, %c0_13] : memref<1x21x16xbf16, #tpu.memory_space<vmem>>, vector<1x12x16xbf16>
    %14 = vector.shape_cast %13 : vector<1x12x16xbf16> to vector<12x16xbf16>
    %c2 = arith.constant 2 : index
    %c0_14 = arith.constant 0 : index
    %c0_15 = arith.constant 0 : index
    %15 = vector.load %arg2[%c2, %c0_14, %c0_15] : memref<6x16x16xbf16, #tpu.memory_space<vmem>>, vector<1x16x16xbf16>
    %16 = vector.shape_cast %15 : vector<1x16x16xbf16> to vector<16x16xbf16>
    %cst_16 = arith.constant dense<0.000000e+00> : vector<12x16xf32>
    %17 = tpu.matmul %14, %16, %cst_16 {dimension_numbers = #tpu.dot_dimension_numbers<[1], [0], [0], [1], [0, 0, 1, 1], [], []>} : vector<12x16xbf16>, vector<16x16xbf16>, vector<12x16xf32> -> vector<12x16xf32>
    %18 = arith.addf %12, %17 : vector<12x16xf32>
    %c0_17 = arith.constant 0 : index
    %c4 = arith.constant 4 : index
    %c0_18 = arith.constant 0 : index
    %19 = vector.load %arg1[%c0_17, %c4, %c0_18] : memref<1x21x16xbf16, #tpu.memory_space<vmem>>, vector<1x12x16xbf16>
    %20 = vector.shape_cast %19 : vector<1x12x16xbf16> to vector<12x16xbf16>
    %c3_19 = arith.constant 3 : index
    %c0_20 = arith.constant 0 : index
    %c0_21 = arith.constant 0 : index
    %21 = vector.load %arg2[%c3_19, %c0_20, %c0_21] : memref<6x16x16xbf16, #tpu.memory_space<vmem>>, vector<1x16x16xbf16>
    %22 = vector.shape_cast %21 : vector<1x16x16xbf16> to vector<16x16xbf16>
    %cst_22 = arith.constant dense<0.000000e+00> : vector<12x16xf32>
    %23 = tpu.matmul %20, %22, %cst_22 {dimension_numbers = #tpu.dot_dimension_numbers<[1], [0], [0], [1], [0, 0, 1, 1], [], []>} : vector<12x16xbf16>, vector<16x16xbf16>, vector<12x16xf32> -> vector<12x16xf32>
    %24 = arith.addf %18, %23 : vector<12x16xf32>
    %c0_23 = arith.constant 0 : index
    %c6 = arith.constant 6 : index
    %c0_24 = arith.constant 0 : index
    %25 = vector.load %arg1[%c0_23, %c6, %c0_24] : memref<1x21x16xbf16, #tpu.memory_space<vmem>>, vector<1x12x16xbf16>
    %26 = vector.shape_cast %25 : vector<1x12x16xbf16> to vector<12x16xbf16>
    %c4_25 = arith.constant 4 : index
    %c0_26 = arith.constant 0 : index
    %c0_27 = arith.constant 0 : index
    %27 = vector.load %arg2[%c4_25, %c0_26, %c0_27] : memref<6x16x16xbf16, #tpu.memory_space<vmem>>, vector<1x16x16xbf16>
    %28 = vector.shape_cast %27 : vector<1x16x16xbf16> to vector<16x16xbf16>
    %cst_28 = arith.constant dense<0.000000e+00> : vector<12x16xf32>
    %29 = tpu.matmul %26, %28, %cst_28 {dimension_numbers = #tpu.dot_dimension_numbers<[1], [0], [0], [1], [0, 0, 1, 1], [], []>} : vector<12x16xbf16>, vector<16x16xbf16>, vector<12x16xf32> -> vector<12x16xf32>
    %30 = arith.addf %24, %29 : vector<12x16xf32>
    %c0_29 = arith.constant 0 : index
    %c7 = arith.constant 7 : index
    %c0_30 = arith.constant 0 : index
    %31 = vector.load %arg1[%c0_29, %c7, %c0_30] : memref<1x21x16xbf16, #tpu.memory_space<vmem>>, vector<1x12x16xbf16>
    %32 = vector.shape_cast %31 : vector<1x12x16xbf16> to vector<12x16xbf16>
    %c5 = arith.constant 5 : index
    %c0_31 = arith.constant 0 : index
    %c0_32 = arith.constant 0 : index
    %33 = vector.load %arg2[%c5, %c0_31, %c0_32] : memref<6x16x16xbf16, #tpu.memory_space<vmem>>, vector<1x16x16xbf16>
    %34 = vector.shape_cast %33 : vector<1x16x16xbf16> to vector<16x16xbf16>
    %cst_33 = arith.constant dense<0.000000e+00> : vector<12x16xf32>
    %35 = tpu.matmul %32, %34, %cst_33 {dimension_numbers = #tpu.dot_dimension_numbers<[1], [0], [0], [1], [0, 0, 1, 1], [], []>} : vector<12x16xbf16>, vector<16x16xbf16>, vector<12x16xf32> -> vector<12x16xf32>
    %36 = arith.addf %30, %35 : vector<12x16xf32>
    %c0_34 = arith.constant 0 : index
    %c0_35 = arith.constant 0 : index
    %37 = vector.load %arg3[%c0_34, %c0_35] : memref<1x16xf32, #tpu.memory_space<vmem>>, vector<1x16xf32>
    %38 = vector.broadcast %37 : vector<1x16xf32> to vector<12x16xf32>
    %39 = arith.addf %36, %38 : vector<12x16xf32>
    %cst_36 = arith.constant 0.000000e+00 : f32
    %40 = vector.broadcast %cst_36 : f32 to vector<12x16xf32>
    %41 = arith.maximumf %39, %40 : vector<12x16xf32>
    %42 = arith.truncf %41 : vector<12x16xf32> to vector<12x16xbf16>
    %c0_37 = arith.constant 0 : index
    %c0_38 = arith.constant 0 : index
    %c0_39 = arith.constant 0 : index
    %43 = vector.load %arg4[%c0_37, %c0_38, %c0_39] : memref<1x12x16xbf16, #tpu.memory_space<vmem>>, vector<1x12x16xbf16>
    %44 = vector.shape_cast %43 : vector<1x12x16xbf16> to vector<12x16xbf16>
    %45 = vector.shape_cast %42 : vector<12x16xbf16> to vector<1x12x16xbf16>
    tpu.vector_store %arg4[%c0_37, %c0_38, %c0_39], %45 {strides = array<i32>} : memref<1x12x16xbf16, #tpu.memory_space<vmem>>, vector<1x12x16xbf16>,
    return
  }
  func.func @transform_0(%arg0: i32) -> (i32, i32, i32) {
    %c0_i32 = arith.constant 0 : i32
    %c0_i32_0 = arith.constant 0 : i32
    %c0_i32_1 = arith.constant 0 : i32
    return %arg0, %c0_i32, %c0_i32_0 : i32, i32, i32
  }
  func.func @transform_1(%arg0: i32) -> (i32, i32, i32) {
    %c0_i32 = arith.constant 0 : i32
    %c0_i32_0 = arith.constant 0 : i32
    %c0_i32_1 = arith.constant 0 : i32
    %c0_i32_2 = arith.constant 0 : i32
    return %c0_i32, %c0_i32_0, %c0_i32_1 : i32, i32, i32
  }
  func.func @transform_2(%arg0: i32) -> (i32, i32) {
    %c0_i32 = arith.constant 0 : i32
    %c0_i32_0 = arith.constant 0 : i32
    %c0_i32_1 = arith.constant 0 : i32
    return %c0_i32, %c0_i32_0 : i32, i32
  }
  func.func @transform_3(%arg0: i32) -> (i32, i32, i32) {
    %c0_i32 = arith.constant 0 : i32
    %c0_i32_0 = arith.constant 0 : i32
    %c0_i32_1 = arith.constant 0 : i32
    return %arg0, %c0_i32, %c0_i32_0 : i32, i32, i32
  }
}

module attributes {stable_mosaic.version = 11 : i64} {
  func.func @_oct_low_kernel(%arg0: i32, %arg1: memref<1x21x32xbf16, #tpu.memory_space<vmem>>, %arg2: memref<6x32x16xbf16, #tpu.memory_space<vmem>>, %arg3: memref<1x16xf32, #tpu.memory_space<vmem>>, %arg4: memref<1x12x16xf32, #tpu.memory_space<vmem>>) attributes {dimension_semantics = [#tpu.dimension_semantics<parallel>], iteration_bounds = array<i64: 2>, scalar_prefetch = 0 : i64, scratch_operands = 0 : i64, tpu.core_type = #tpu.core_type<tc>, window_params = [{transform_indices = @transform_0, window_bounds = array<i64: 1, 21, 32>}, {pipeline_mode = #tpu.pipeline_mode<synchronous>, transform_indices = @transform_1, window_bounds = array<i64: 6, 32, 16>}, {pipeline_mode = #tpu.pipeline_mode<synchronous>, transform_indices = @transform_2, window_bounds = array<i64: 1, 16>}, {transform_indices = @transform_3, window_bounds = array<i64: 1, 12, 16>}]} {
    %cst = arith.constant 0.000000e+00 : f32
    %0 = vector.broadcast %cst : f32 to vector<12x16xf32>
    %c0 = arith.constant 0 : index
    %c0_0 = arith.constant 0 : index
    %c0_1 = arith.constant 0 : index
    %1 = vector.load %arg1[%c0, %c0_0, %c0_1] : memref<1x21x32xbf16, #tpu.memory_space<vmem>>, vector<1x12x32xbf16>
    %2 = vector.shape_cast %1 : vector<1x12x32xbf16> to vector<12x32xbf16>
    %c0_2 = arith.constant 0 : index
    %c0_3 = arith.constant 0 : index
    %c0_4 = arith.constant 0 : index
    %3 = vector.load %arg2[%c0_2, %c0_3, %c0_4] : memref<6x32x16xbf16, #tpu.memory_space<vmem>>, vector<1x32x16xbf16>
    %4 = vector.shape_cast %3 : vector<1x32x16xbf16> to vector<32x16xbf16>
    %cst_5 = arith.constant dense<0.000000e+00> : vector<12x16xf32>
    %5 = tpu.matmul %2, %4, %cst_5 {dimension_numbers = #tpu.dot_dimension_numbers<[1], [0], [0], [1], [0, 0, 1, 1], [], []>} : vector<12x32xbf16>, vector<32x16xbf16>, vector<12x16xf32> -> vector<12x16xf32>
    %6 = arith.addf %0, %5 : vector<12x16xf32>
    %c0_6 = arith.constant 0 : index
    %c1 = arith.constant 1 : index
    %c0_7 = arith.constant 0 : index
    %7 = vector.load %arg1[%c0_6, %c1, %c0_7] : memref<1x21x32xbf16, #tpu.memory_space<vmem>>, vector<1x12x32xbf16>
    %8 = vector.shape_cast %7 : vector<1x12x32xbf16> to vector<12x32xbf16>
    %c1_8 = arith.constant 1 : index
    %c0_9 = arith.constant 0 : index
    %c0_10 = arith.constant 0 : index
    %9 = vector.load %arg2[%c1_8, %c0_9, %c0_10] : memref<6x32x16xbf16, #tpu.memory_space<vmem>>, vector<1x32x16xbf16>
    %10 = vector.shape_cast %9 : vector<1x32x16xbf16> to vector<32x16xbf16>
    %cst_11 = arith.constant dense<0.000000e+00> : vector<12x16xf32>
    %11 = tpu.matmul %8, %10, %cst_11 {dimension_numbers = #tpu.dot_dimension_numbers<[1], [0], [0], [1], [0, 0, 1, 1], [], []>} : vector<12x32xbf16>, vector<32x16xbf16>, vector<12x16xf32> -> vector<12x16xf32>
    %12 = arith.addf %6, %11 : vector<12x16xf32>
    %c0_12 = arith.constant 0 : index
    %c3 = arith.constant 3 : index
    %c0_13 = arith.constant 0 : index
    %13 = vector.load %arg1[%c0_12, %c3, %c0_13] : memref<1x21x32xbf16, #tpu.memory_space<vmem>>, vector<1x12x32xbf16>
    %14 = vector.shape_cast %13 : vector<1x12x32xbf16> to vector<12x32xbf16>
    %c2 = arith.constant 2 : index
    %c0_14 = arith.constant 0 : index
    %c0_15 = arith.constant 0 : index
    %15 = vector.load %arg2[%c2, %c0_14, %c0_15] : memref<6x32x16xbf16, #tpu.memory_space<vmem>>, vector<1x32x16xbf16>
    %16 = vector.shape_cast %15 : vector<1x32x16xbf16> to vector<32x16xbf16>
    %cst_16 = arith.constant dense<0.000000e+00> : vector<12x16xf32>
    %17 = tpu.matmul %14, %16, %cst_16 {dimension_numbers = #tpu.dot_dimension_numbers<[1], [0], [0], [1], [0, 0, 1, 1], [], []>} : vector<12x32xbf16>, vector<32x16xbf16>, vector<12x16xf32> -> vector<12x16xf32>
    %18 = arith.addf %12, %17 : vector<12x16xf32>
    %c0_17 = arith.constant 0 : index
    %c4 = arith.constant 4 : index
    %c0_18 = arith.constant 0 : index
    %19 = vector.load %arg1[%c0_17, %c4, %c0_18] : memref<1x21x32xbf16, #tpu.memory_space<vmem>>, vector<1x12x32xbf16>
    %20 = vector.shape_cast %19 : vector<1x12x32xbf16> to vector<12x32xbf16>
    %c3_19 = arith.constant 3 : index
    %c0_20 = arith.constant 0 : index
    %c0_21 = arith.constant 0 : index
    %21 = vector.load %arg2[%c3_19, %c0_20, %c0_21] : memref<6x32x16xbf16, #tpu.memory_space<vmem>>, vector<1x32x16xbf16>
    %22 = vector.shape_cast %21 : vector<1x32x16xbf16> to vector<32x16xbf16>
    %cst_22 = arith.constant dense<0.000000e+00> : vector<12x16xf32>
    %23 = tpu.matmul %20, %22, %cst_22 {dimension_numbers = #tpu.dot_dimension_numbers<[1], [0], [0], [1], [0, 0, 1, 1], [], []>} : vector<12x32xbf16>, vector<32x16xbf16>, vector<12x16xf32> -> vector<12x16xf32>
    %24 = arith.addf %18, %23 : vector<12x16xf32>
    %c0_23 = arith.constant 0 : index
    %c6 = arith.constant 6 : index
    %c0_24 = arith.constant 0 : index
    %25 = vector.load %arg1[%c0_23, %c6, %c0_24] : memref<1x21x32xbf16, #tpu.memory_space<vmem>>, vector<1x12x32xbf16>
    %26 = vector.shape_cast %25 : vector<1x12x32xbf16> to vector<12x32xbf16>
    %c4_25 = arith.constant 4 : index
    %c0_26 = arith.constant 0 : index
    %c0_27 = arith.constant 0 : index
    %27 = vector.load %arg2[%c4_25, %c0_26, %c0_27] : memref<6x32x16xbf16, #tpu.memory_space<vmem>>, vector<1x32x16xbf16>
    %28 = vector.shape_cast %27 : vector<1x32x16xbf16> to vector<32x16xbf16>
    %cst_28 = arith.constant dense<0.000000e+00> : vector<12x16xf32>
    %29 = tpu.matmul %26, %28, %cst_28 {dimension_numbers = #tpu.dot_dimension_numbers<[1], [0], [0], [1], [0, 0, 1, 1], [], []>} : vector<12x32xbf16>, vector<32x16xbf16>, vector<12x16xf32> -> vector<12x16xf32>
    %30 = arith.addf %24, %29 : vector<12x16xf32>
    %c0_29 = arith.constant 0 : index
    %c7 = arith.constant 7 : index
    %c0_30 = arith.constant 0 : index
    %31 = vector.load %arg1[%c0_29, %c7, %c0_30] : memref<1x21x32xbf16, #tpu.memory_space<vmem>>, vector<1x12x32xbf16>
    %32 = vector.shape_cast %31 : vector<1x12x32xbf16> to vector<12x32xbf16>
    %c5 = arith.constant 5 : index
    %c0_31 = arith.constant 0 : index
    %c0_32 = arith.constant 0 : index
    %33 = vector.load %arg2[%c5, %c0_31, %c0_32] : memref<6x32x16xbf16, #tpu.memory_space<vmem>>, vector<1x32x16xbf16>
    %34 = vector.shape_cast %33 : vector<1x32x16xbf16> to vector<32x16xbf16>
    %cst_33 = arith.constant dense<0.000000e+00> : vector<12x16xf32>
    %35 = tpu.matmul %32, %34, %cst_33 {dimension_numbers = #tpu.dot_dimension_numbers<[1], [0], [0], [1], [0, 0, 1, 1], [], []>} : vector<12x32xbf16>, vector<32x16xbf16>, vector<12x16xf32> -> vector<12x16xf32>
    %36 = arith.addf %30, %35 : vector<12x16xf32>
    %c0_34 = arith.constant 0 : index
    %c0_35 = arith.constant 0 : index
    %37 = vector.load %arg3[%c0_34, %c0_35] : memref<1x16xf32, #tpu.memory_space<vmem>>, vector<1x16xf32>
    %38 = vector.broadcast %37 : vector<1x16xf32> to vector<12x16xf32>
    %39 = arith.addf %36, %38 : vector<12x16xf32>
    %cst_36 = arith.constant 0.000000e+00 : f32
    %40 = vector.broadcast %cst_36 : f32 to vector<12x16xf32>
    %41 = arith.maximumf %39, %40 : vector<12x16xf32>
    %c0_37 = arith.constant 0 : index
    %c0_38 = arith.constant 0 : index
    %c0_39 = arith.constant 0 : index
    %42 = vector.load %arg4[%c0_37, %c0_38, %c0_39] : memref<1x12x16xf32, #tpu.memory_space<vmem>>, vector<1x12x16xf32>
    %43 = vector.shape_cast %42 : vector<1x12x16xf32> to vector<12x16xf32>
    %44 = vector.shape_cast %41 : vector<12x16xf32> to vector<1x12x16xf32>
    tpu.vector_store %arg4[%c0_37, %c0_38, %c0_39], %44 {strides = array<i32>} : memref<1x12x16xf32, #tpu.memory_space<vmem>>, vector<1x12x16xf32>,
    return
  }
  func.func @transform_0(%arg0: i32) -> (i32, i32, i32) {
    %c0_i32 = arith.constant 0 : i32
    %c0_i32_0 = arith.constant 0 : i32
    %c0_i32_1 = arith.constant 0 : i32
    return %arg0, %c0_i32, %c0_i32_0 : i32, i32, i32
  }
  func.func @transform_1(%arg0: i32) -> (i32, i32, i32) {
    %c0_i32 = arith.constant 0 : i32
    %c0_i32_0 = arith.constant 0 : i32
    %c0_i32_1 = arith.constant 0 : i32
    %c0_i32_2 = arith.constant 0 : i32
    return %c0_i32, %c0_i32_0, %c0_i32_1 : i32, i32, i32
  }
  func.func @transform_2(%arg0: i32) -> (i32, i32) {
    %c0_i32 = arith.constant 0 : i32
    %c0_i32_0 = arith.constant 0 : i32
    %c0_i32_1 = arith.constant 0 : i32
    return %c0_i32, %c0_i32_0 : i32, i32
  }
  func.func @transform_3(%arg0: i32) -> (i32, i32, i32) {
    %c0_i32 = arith.constant 0 : i32
    %c0_i32_0 = arith.constant 0 : i32
    %c0_i32_1 = arith.constant 0 : i32
    return %arg0, %c0_i32, %c0_i32_0 : i32, i32, i32
  }
}

module attributes {stable_mosaic.version = 11 : i64} {
  func.func @_oct_high_kernel(%arg0: i32, %arg1: memref<1x88x16xbf16, #tpu.memory_space<vmem>>, %arg2: memref<1x56x8xbf16, #tpu.memory_space<vmem>>, %arg3: memref<6x16x16xbf16, #tpu.memory_space<vmem>>, %arg4: memref<9x8x16xbf16, #tpu.memory_space<vmem>>, %arg5: memref<1x16xf32, #tpu.memory_space<vmem>>, %arg6: memref<1x4x2x8x16xf32, #tpu.memory_space<vmem>>) attributes {dimension_semantics = [#tpu.dimension_semantics<parallel>], iteration_bounds = array<i64: 2>, scalar_prefetch = 0 : i64, scratch_operands = 0 : i64, tpu.core_type = #tpu.core_type<tc>, window_params = [{transform_indices = @transform_0, window_bounds = array<i64: 1, 88, 16>}, {transform_indices = @transform_1, window_bounds = array<i64: 1, 56, 8>}, {pipeline_mode = #tpu.pipeline_mode<synchronous>, transform_indices = @transform_2, window_bounds = array<i64: 6, 16, 16>}, {pipeline_mode = #tpu.pipeline_mode<synchronous>, transform_indices = @transform_3, window_bounds = array<i64: 9, 8, 16>}, {pipeline_mode = #tpu.pipeline_mode<synchronous>, transform_indices = @transform_4, window_bounds = array<i64: 1, 16>}, {transform_indices = @transform_5, window_bounds = array<i64: 1, 4, 2, 8, 16>}]} {
    %cst = arith.constant 0.000000e+00 : f32
    %0 = vector.broadcast %cst : f32 to vector<64x16xf32>
    %cst_0 = arith.constant 0.000000e+00 : f32
    %1 = vector.broadcast %cst_0 : f32 to vector<32x16xf32>
    %c0 = arith.constant 0 : index
    %c0_1 = arith.constant 0 : index
    %c0_2 = arith.constant 0 : index
    %2 = vector.load %arg1[%c0, %c0_1, %c0_2] : memref<1x88x16xbf16, #tpu.memory_space<vmem>>, vector<1x64x16xbf16>
    %3 = vector.shape_cast %2 : vector<1x64x16xbf16> to vector<64x16xbf16>
    %c0_3 = arith.constant 0 : index
    %c0_4 = arith.constant 0 : index
    %c0_5 = arith.constant 0 : index
    %4 = vector.load %arg3[%c0_3, %c0_4, %c0_5] : memref<6x16x16xbf16, #tpu.memory_space<vmem>>, vector<1x16x16xbf16>
    %5 = vector.shape_cast %4 : vector<1x16x16xbf16> to vector<16x16xbf16>
    %cst_6 = arith.constant dense<0.000000e+00> : vector<64x16xf32>
    %6 = tpu.matmul %3, %5, %cst_6 {dimension_numbers = #tpu.dot_dimension_numbers<[1], [0], [0], [1], [0, 0, 1, 1], [], []>} : vector<64x16xbf16>, vector<16x16xbf16>, vector<64x16xf32> -> vector<64x16xf32>
    %7 = arith.addf %0, %6 : vector<64x16xf32>
    %c0_7 = arith.constant 0 : index
    %c1 = arith.constant 1 : index
    %c0_8 = arith.constant 0 : index
    %8 = vector.load %arg1[%c0_7, %c1, %c0_8] : memref<1x88x16xbf16, #tpu.memory_space<vmem>>, vector<1x64x16xbf16>
    %9 = vector.shape_cast %8 : vector<1x64x16xbf16> to vector<64x16xbf16>
    %c1_9 = arith.constant 1 : index
    %c0_10 = arith.constant 0 : index
    %c0_11 = arith.constant 0 : index
    %10 = vector.load %arg3[%c1_9, %c0_10, %c0_11] : memref<6x16x16xbf16, #tpu.memory_space<vmem>>, vector<1x16x16xbf16>
    %11 = vector.shape_cast %10 : vector<1x16x16xbf16> to vector<16x16xbf16>
    %cst_12 = arith.constant dense<0.000000e+00> : vector<64x16xf32>
    %12 = tpu.matmul %9, %11, %cst_12 {dimension_numbers = #tpu.dot_dimension_numbers<[1], [0], [0], [1], [0, 0, 1, 1], [], []>} : vector<64x16xbf16>, vector<16x16xbf16>, vector<64x16xf32> -> vector<64x16xf32>
    %13 = arith.addf %7, %12 : vector<64x16xf32>
    %c0_13 = arith.constant 0 : index
    %c0_14 = arith.constant 0 : index
    %c0_15 = arith.constant 0 : index
    %14 = vector.load %arg2[%c0_13, %c0_14, %c0_15] : memref<1x56x8xbf16, #tpu.memory_space<vmem>>, vector<1x32x8xbf16>
    %15 = vector.shape_cast %14 : vector<1x32x8xbf16> to vector<32x8xbf16>
    %c0_16 = arith.constant 0 : index
    %c0_17 = arith.constant 0 : index
    %c0_18 = arith.constant 0 : index
    %16 = vector.load %arg4[%c0_16, %c0_17, %c0_18] : memref<9x8x16xbf16, #tpu.memory_space<vmem>>, vector<1x8x16xbf16>
    %17 = vector.shape_cast %16 : vector<1x8x16xbf16> to vector<8x16xbf16>
    %cst_19 = arith.constant dense<0.000000e+00> : vector<32x16xf32>
    %18 = tpu.matmul %15, %17, %cst_19 {dimension_numbers = #tpu.dot_dimension_numbers<[1], [0], [0], [1], [0, 0, 1, 1], [], []>} : vector<32x8xbf16>, vector<8x16xbf16>, vector<32x16xf32> -> vector<32x16xf32>
    %19 = arith.addf %1, %18 : vector<32x16xf32>
    %c0_20 = arith.constant 0 : index
    %c1_21 = arith.constant 1 : index
    %c0_22 = arith.constant 0 : index
    %20 = vector.load %arg2[%c0_20, %c1_21, %c0_22] : memref<1x56x8xbf16, #tpu.memory_space<vmem>>, vector<1x32x8xbf16>
    %21 = vector.shape_cast %20 : vector<1x32x8xbf16> to vector<32x8xbf16>
    %c1_23 = arith.constant 1 : index
    %c0_24 = arith.constant 0 : index
    %c0_25 = arith.constant 0 : index
    %22 = vector.load %arg4[%c1_23, %c0_24, %c0_25] : memref<9x8x16xbf16, #tpu.memory_space<vmem>>, vector<1x8x16xbf16>
    %23 = vector.shape_cast %22 : vector<1x8x16xbf16> to vector<8x16xbf16>
    %cst_26 = arith.constant dense<0.000000e+00> : vector<32x16xf32>
    %24 = tpu.matmul %21, %23, %cst_26 {dimension_numbers = #tpu.dot_dimension_numbers<[1], [0], [0], [1], [0, 0, 1, 1], [], []>} : vector<32x8xbf16>, vector<8x16xbf16>, vector<32x16xf32> -> vector<32x16xf32>
    %25 = arith.addf %19, %24 : vector<32x16xf32>
    %c0_27 = arith.constant 0 : index
    %c2 = arith.constant 2 : index
    %c0_28 = arith.constant 0 : index
    %26 = vector.load %arg2[%c0_27, %c2, %c0_28] : memref<1x56x8xbf16, #tpu.memory_space<vmem>>, vector<1x32x8xbf16>
    %27 = vector.shape_cast %26 : vector<1x32x8xbf16> to vector<32x8xbf16>
    %c2_29 = arith.constant 2 : index
    %c0_30 = arith.constant 0 : index
    %c0_31 = arith.constant 0 : index
    %28 = vector.load %arg4[%c2_29, %c0_30, %c0_31] : memref<9x8x16xbf16, #tpu.memory_space<vmem>>, vector<1x8x16xbf16>
    %29 = vector.shape_cast %28 : vector<1x8x16xbf16> to vector<8x16xbf16>
    %cst_32 = arith.constant dense<0.000000e+00> : vector<32x16xf32>
    %30 = tpu.matmul %27, %29, %cst_32 {dimension_numbers = #tpu.dot_dimension_numbers<[1], [0], [0], [1], [0, 0, 1, 1], [], []>} : vector<32x8xbf16>, vector<8x16xbf16>, vector<32x16xf32> -> vector<32x16xf32>
    %31 = arith.addf %25, %30 : vector<32x16xf32>
    %c0_33 = arith.constant 0 : index
    %c8 = arith.constant 8 : index
    %c0_34 = arith.constant 0 : index
    %32 = vector.load %arg1[%c0_33, %c8, %c0_34] : memref<1x88x16xbf16, #tpu.memory_space<vmem>>, vector<1x64x16xbf16>
    %33 = vector.shape_cast %32 : vector<1x64x16xbf16> to vector<64x16xbf16>
    %c2_35 = arith.constant 2 : index
    %c0_36 = arith.constant 0 : index
    %c0_37 = arith.constant 0 : index
    %34 = vector.load %arg3[%c2_35, %c0_36, %c0_37] : memref<6x16x16xbf16, #tpu.memory_space<vmem>>, vector<1x16x16xbf16>
    %35 = vector.shape_cast %34 : vector<1x16x16xbf16> to vector<16x16xbf16>
    %cst_38 = arith.constant dense<0.000000e+00> : vector<64x16xf32>
    %36 = tpu.matmul %33, %35, %cst_38 {dimension_numbers = #tpu.dot_dimension_numbers<[1], [0], [0], [1], [0, 0, 1, 1], [], []>} : vector<64x16xbf16>, vector<16x16xbf16>, vector<64x16xf32> -> vector<64x16xf32>
    %37 = arith.addf %13, %36 : vector<64x16xf32>
    %c0_39 = arith.constant 0 : index
    %c9 = arith.constant 9 : index
    %c0_40 = arith.constant 0 : index
    %38 = vector.load %arg1[%c0_39, %c9, %c0_40] : memref<1x88x16xbf16, #tpu.memory_space<vmem>>, vector<1x64x16xbf16>
    %39 = vector.shape_cast %38 : vector<1x64x16xbf16> to vector<64x16xbf16>
    %c3 = arith.constant 3 : index
    %c0_41 = arith.constant 0 : index
    %c0_42 = arith.constant 0 : index
    %40 = vector.load %arg3[%c3, %c0_41, %c0_42] : memref<6x16x16xbf16, #tpu.memory_space<vmem>>, vector<1x16x16xbf16>
    %41 = vector.shape_cast %40 : vector<1x16x16xbf16> to vector<16x16xbf16>
    %cst_43 = arith.constant dense<0.000000e+00> : vector<64x16xf32>
    %42 = tpu.matmul %39, %41, %cst_43 {dimension_numbers = #tpu.dot_dimension_numbers<[1], [0], [0], [1], [0, 0, 1, 1], [], []>} : vector<64x16xbf16>, vector<16x16xbf16>, vector<64x16xf32> -> vector<64x16xf32>
    %43 = arith.addf %37, %42 : vector<64x16xf32>
    %c0_44 = arith.constant 0 : index
    %c8_45 = arith.constant 8 : index
    %c0_46 = arith.constant 0 : index
    %44 = vector.load %arg2[%c0_44, %c8_45, %c0_46] : memref<1x56x8xbf16, #tpu.memory_space<vmem>>, vector<1x32x8xbf16>
    %45 = vector.shape_cast %44 : vector<1x32x8xbf16> to vector<32x8xbf16>
    %c3_47 = arith.constant 3 : index
    %c0_48 = arith.constant 0 : index
    %c0_49 = arith.constant 0 : index
    %46 = vector.load %arg4[%c3_47, %c0_48, %c0_49] : memref<9x8x16xbf16, #tpu.memory_space<vmem>>, vector<1x8x16xbf16>
    %47 = vector.shape_cast %46 : vector<1x8x16xbf16> to vector<8x16xbf16>
    %cst_50 = arith.constant dense<0.000000e+00> : vector<32x16xf32>
    %48 = tpu.matmul %45, %47, %cst_50 {dimension_numbers = #tpu.dot_dimension_numbers<[1], [0], [0], [1], [0, 0, 1, 1], [], []>} : vector<32x8xbf16>, vector<8x16xbf16>, vector<32x16xf32> -> vector<32x16xf32>
    %49 = arith.addf %31, %48 : vector<32x16xf32>
    %c0_51 = arith.constant 0 : index
    %c9_52 = arith.constant 9 : index
    %c0_53 = arith.constant 0 : index
    %50 = vector.load %arg2[%c0_51, %c9_52, %c0_53] : memref<1x56x8xbf16, #tpu.memory_space<vmem>>, vector<1x32x8xbf16>
    %51 = vector.shape_cast %50 : vector<1x32x8xbf16> to vector<32x8xbf16>
    %c4 = arith.constant 4 : index
    %c0_54 = arith.constant 0 : index
    %c0_55 = arith.constant 0 : index
    %52 = vector.load %arg4[%c4, %c0_54, %c0_55] : memref<9x8x16xbf16, #tpu.memory_space<vmem>>, vector<1x8x16xbf16>
    %53 = vector.shape_cast %52 : vector<1x8x16xbf16> to vector<8x16xbf16>
    %cst_56 = arith.constant dense<0.000000e+00> : vector<32x16xf32>
    %54 = tpu.matmul %51, %53, %cst_56 {dimension_numbers = #tpu.dot_dimension_numbers<[1], [0], [0], [1], [0, 0, 1, 1], [], []>} : vector<32x8xbf16>, vector<8x16xbf16>, vector<32x16xf32> -> vector<32x16xf32>
    %55 = arith.addf %49, %54 : vector<32x16xf32>
    %c0_57 = arith.constant 0 : index
    %c10 = arith.constant 10 : index
    %c0_58 = arith.constant 0 : index
    %56 = vector.load %arg2[%c0_57, %c10, %c0_58] : memref<1x56x8xbf16, #tpu.memory_space<vmem>>, vector<1x32x8xbf16>
    %57 = vector.shape_cast %56 : vector<1x32x8xbf16> to vector<32x8xbf16>
    %c5 = arith.constant 5 : index
    %c0_59 = arith.constant 0 : index
    %c0_60 = arith.constant 0 : index
    %58 = vector.load %arg4[%c5, %c0_59, %c0_60] : memref<9x8x16xbf16, #tpu.memory_space<vmem>>, vector<1x8x16xbf16>
    %59 = vector.shape_cast %58 : vector<1x8x16xbf16> to vector<8x16xbf16>
    %cst_61 = arith.constant dense<0.000000e+00> : vector<32x16xf32>
    %60 = tpu.matmul %57, %59, %cst_61 {dimension_numbers = #tpu.dot_dimension_numbers<[1], [0], [0], [1], [0, 0, 1, 1], [], []>} : vector<32x8xbf16>, vector<8x16xbf16>, vector<32x16xf32> -> vector<32x16xf32>
    %61 = arith.addf %55, %60 : vector<32x16xf32>
    %c0_62 = arith.constant 0 : index
    %c16 = arith.constant 16 : index
    %c0_63 = arith.constant 0 : index
    %62 = vector.load %arg1[%c0_62, %c16, %c0_63] : memref<1x88x16xbf16, #tpu.memory_space<vmem>>, vector<1x64x16xbf16>
    %63 = vector.shape_cast %62 : vector<1x64x16xbf16> to vector<64x16xbf16>
    %c4_64 = arith.constant 4 : index
    %c0_65 = arith.constant 0 : index
    %c0_66 = arith.constant 0 : index
    %64 = vector.load %arg3[%c4_64, %c0_65, %c0_66] : memref<6x16x16xbf16, #tpu.memory_space<vmem>>, vector<1x16x16xbf16>
    %65 = vector.shape_cast %64 : vector<1x16x16xbf16> to vector<16x16xbf16>
    %cst_67 = arith.constant dense<0.000000e+00> : vector<64x16xf32>
    %66 = tpu.matmul %63, %65, %cst_67 {dimension_numbers = #tpu.dot_dimension_numbers<[1], [0], [0], [1], [0, 0, 1, 1], [], []>} : vector<64x16xbf16>, vector<16x16xbf16>, vector<64x16xf32> -> vector<64x16xf32>
    %67 = arith.addf %43, %66 : vector<64x16xf32>
    %c0_68 = arith.constant 0 : index
    %c17 = arith.constant 17 : index
    %c0_69 = arith.constant 0 : index
    %68 = vector.load %arg1[%c0_68, %c17, %c0_69] : memref<1x88x16xbf16, #tpu.memory_space<vmem>>, vector<1x64x16xbf16>
    %69 = vector.shape_cast %68 : vector<1x64x16xbf16> to vector<64x16xbf16>
    %c5_70 = arith.constant 5 : index
    %c0_71 = arith.constant 0 : index
    %c0_72 = arith.constant 0 : index
    %70 = vector.load %arg3[%c5_70, %c0_71, %c0_72] : memref<6x16x16xbf16, #tpu.memory_space<vmem>>, vector<1x16x16xbf16>
    %71 = vector.shape_cast %70 : vector<1x16x16xbf16> to vector<16x16xbf16>
    %cst_73 = arith.constant dense<0.000000e+00> : vector<64x16xf32>
    %72 = tpu.matmul %69, %71, %cst_73 {dimension_numbers = #tpu.dot_dimension_numbers<[1], [0], [0], [1], [0, 0, 1, 1], [], []>} : vector<64x16xbf16>, vector<16x16xbf16>, vector<64x16xf32> -> vector<64x16xf32>
    %73 = arith.addf %67, %72 : vector<64x16xf32>
    %c0_74 = arith.constant 0 : index
    %c16_75 = arith.constant 16 : index
    %c0_76 = arith.constant 0 : index
    %74 = vector.load %arg2[%c0_74, %c16_75, %c0_76] : memref<1x56x8xbf16, #tpu.memory_space<vmem>>, vector<1x32x8xbf16>
    %75 = vector.shape_cast %74 : vector<1x32x8xbf16> to vector<32x8xbf16>
    %c6 = arith.constant 6 : index
    %c0_77 = arith.constant 0 : index
    %c0_78 = arith.constant 0 : index
    %76 = vector.load %arg4[%c6, %c0_77, %c0_78] : memref<9x8x16xbf16, #tpu.memory_space<vmem>>, vector<1x8x16xbf16>
    %77 = vector.shape_cast %76 : vector<1x8x16xbf16> to vector<8x16xbf16>
    %cst_79 = arith.constant dense<0.000000e+00> : vector<32x16xf32>
    %78 = tpu.matmul %75, %77, %cst_79 {dimension_numbers = #tpu.dot_dimension_numbers<[1], [0], [0], [1], [0, 0, 1, 1], [], []>} : vector<32x8xbf16>, vector<8x16xbf16>, vector<32x16xf32> -> vector<32x16xf32>
    %79 = arith.addf %61, %78 : vector<32x16xf32>
    %c0_80 = arith.constant 0 : index
    %c17_81 = arith.constant 17 : index
    %c0_82 = arith.constant 0 : index
    %80 = vector.load %arg2[%c0_80, %c17_81, %c0_82] : memref<1x56x8xbf16, #tpu.memory_space<vmem>>, vector<1x32x8xbf16>
    %81 = vector.shape_cast %80 : vector<1x32x8xbf16> to vector<32x8xbf16>
    %c7 = arith.constant 7 : index
    %c0_83 = arith.constant 0 : index
    %c0_84 = arith.constant 0 : index
    %82 = vector.load %arg4[%c7, %c0_83, %c0_84] : memref<9x8x16xbf16, #tpu.memory_space<vmem>>, vector<1x8x16xbf16>
    %83 = vector.shape_cast %82 : vector<1x8x16xbf16> to vector<8x16xbf16>
    %cst_85 = arith.constant dense<0.000000e+00> : vector<32x16xf32>
    %84 = tpu.matmul %81, %83, %cst_85 {dimension_numbers = #tpu.dot_dimension_numbers<[1], [0], [0], [1], [0, 0, 1, 1], [], []>} : vector<32x8xbf16>, vector<8x16xbf16>, vector<32x16xf32> -> vector<32x16xf32>
    %85 = arith.addf %79, %84 : vector<32x16xf32>
    %c0_86 = arith.constant 0 : index
    %c18 = arith.constant 18 : index
    %c0_87 = arith.constant 0 : index
    %86 = vector.load %arg2[%c0_86, %c18, %c0_87] : memref<1x56x8xbf16, #tpu.memory_space<vmem>>, vector<1x32x8xbf16>
    %87 = vector.shape_cast %86 : vector<1x32x8xbf16> to vector<32x8xbf16>
    %c8_88 = arith.constant 8 : index
    %c0_89 = arith.constant 0 : index
    %c0_90 = arith.constant 0 : index
    %88 = vector.load %arg4[%c8_88, %c0_89, %c0_90] : memref<9x8x16xbf16, #tpu.memory_space<vmem>>, vector<1x8x16xbf16>
    %89 = vector.shape_cast %88 : vector<1x8x16xbf16> to vector<8x16xbf16>
    %cst_91 = arith.constant dense<0.000000e+00> : vector<32x16xf32>
    %90 = tpu.matmul %87, %89, %cst_91 {dimension_numbers = #tpu.dot_dimension_numbers<[1], [0], [0], [1], [0, 0, 1, 1], [], []>} : vector<32x8xbf16>, vector<8x16xbf16>, vector<32x16xf32> -> vector<32x16xf32>
    %91 = arith.addf %85, %90 : vector<32x16xf32>
    %92 = vector.shape_cast %73 : vector<64x16xf32> to vector<4x2x8x16xf32>
    %93 = vector.shape_cast %91 : vector<32x16xf32> to vector<4x1x8x16xf32>
    %94 = vector.broadcast %93 : vector<4x1x8x16xf32> to vector<4x2x8x16xf32>
    %95 = arith.addf %92, %94 : vector<4x2x8x16xf32>
    %c0_92 = arith.constant 0 : index
    %c0_93 = arith.constant 0 : index
    %96 = vector.load %arg5[%c0_92, %c0_93] : memref<1x16xf32, #tpu.memory_space<vmem>>, vector<1x16xf32>
    %97 = vector.shape_cast %96 : vector<1x16xf32> to vector<1x1x1x16xf32>
    %98 = vector.broadcast %97 : vector<1x1x1x16xf32> to vector<4x2x8x16xf32>
    %99 = arith.addf %95, %98 : vector<4x2x8x16xf32>
    %cst_94 = arith.constant 0.000000e+00 : f32
    %100 = vector.broadcast %cst_94 : f32 to vector<4x2x8x16xf32>
    %101 = arith.maximumf %99, %100 : vector<4x2x8x16xf32>
    %c0_95 = arith.constant 0 : index
    %c0_96 = arith.constant 0 : index
    %c0_97 = arith.constant 0 : index
    %c0_98 = arith.constant 0 : index
    %c0_99 = arith.constant 0 : index
    %102 = vector.load %arg6[%c0_95, %c0_96, %c0_97, %c0_98, %c0_99] : memref<1x4x2x8x16xf32, #tpu.memory_space<vmem>>, vector<1x4x2x8x16xf32>
    %103 = vector.shape_cast %102 : vector<1x4x2x8x16xf32> to vector<4x2x8x16xf32>
    %104 = vector.shape_cast %101 : vector<4x2x8x16xf32> to vector<1x4x2x8x16xf32>
    tpu.vector_store %arg6[%c0_95, %c0_96, %c0_97, %c0_98, %c0_99], %104 {strides = array<i32>} : memref<1x4x2x8x16xf32, #tpu.memory_space<vmem>>, vector<1x4x2x8x16xf32>,
    return
  }
  func.func @transform_0(%arg0: i32) -> (i32, i32, i32) {
    %c0_i32 = arith.constant 0 : i32
    %c0_i32_0 = arith.constant 0 : i32
    %c0_i32_1 = arith.constant 0 : i32
    return %arg0, %c0_i32, %c0_i32_0 : i32, i32, i32
  }
  func.func @transform_1(%arg0: i32) -> (i32, i32, i32) {
    %c0_i32 = arith.constant 0 : i32
    %c0_i32_0 = arith.constant 0 : i32
    %c0_i32_1 = arith.constant 0 : i32
    return %arg0, %c0_i32, %c0_i32_0 : i32, i32, i32
  }
  func.func @transform_2(%arg0: i32) -> (i32, i32, i32) {
    %c0_i32 = arith.constant 0 : i32
    %c0_i32_0 = arith.constant 0 : i32
    %c0_i32_1 = arith.constant 0 : i32
    %c0_i32_2 = arith.constant 0 : i32
    return %c0_i32, %c0_i32_0, %c0_i32_1 : i32, i32, i32
  }
  func.func @transform_3(%arg0: i32) -> (i32, i32, i32) {
    %c0_i32 = arith.constant 0 : i32
    %c0_i32_0 = arith.constant 0 : i32
    %c0_i32_1 = arith.constant 0 : i32
    %c0_i32_2 = arith.constant 0 : i32
    return %c0_i32, %c0_i32_0, %c0_i32_1 : i32, i32, i32
  }
  func.func @transform_4(%arg0: i32) -> (i32, i32) {
    %c0_i32 = arith.constant 0 : i32
    %c0_i32_0 = arith.constant 0 : i32
    %c0_i32_1 = arith.constant 0 : i32
    return %c0_i32, %c0_i32_0 : i32, i32
  }
  func.func @transform_5(%arg0: i32) -> (i32, i32, i32, i32, i32) {
    %c0_i32 = arith.constant 0 : i32
    %c0_i32_0 = arith.constant 0 : i32
    %c0_i32_1 = arith.constant 0 : i32
    %c0_i32_2 = arith.constant 0 : i32
    %c0_i32_3 = arith.constant 0 : i32
    return %arg0, %c0_i32, %c0_i32_0, %c0_i32_1, %c0_i32_2 : i32, i32, i32, i32, i32
  }
}

</mosaic_0001>

<bundles_post_ra>
// kernel: down_forward.8
= control target key start
LH: loop header
LB: loop body
LE: loop exit
PB: predicated region body
PF: predicated region fallthrough
CT: control target
= control target key end

     0   :  { %s214_s9 = smov 124   ;;  %vm152_vm0 = vcmask 27648   ;;  %s441_s0 = inlined_call_operand.vmem [shape: f32[16,2,8,8], index: 0, kind: input, shape index: {}]   ;;  %s442_s1 = inlined_call_operand.vmem [shape: bf16[16,8,4], index: 1, kind: output, shape index: {}]  }
   0x1   :  { %v16_v0 = vld [vmem:[%s441_s0 + $0x40] sm:$0xff]  ;;  %v17_v1 = vld [vmem:[%s441_s0 + $0x48] sm:$0xff]  ;;  %v18_v2 = vld [vmem:[%s441_s0 + $0x50] sm:$0xff] }
   0x2   :  { %v19_v3 = vld [vmem:[%s441_s0 + $0x58] sm:$0xff]  ;;  %v237_v4 = vmax.f32 %v16_v0, %v17_v1  ;;  %v8_v5 = vld [vmem:[%s441_s0] sm:$0xff]  ;;  %v9_v6 = vld [vmem:[%s441_s0 + $0x8] sm:$0xff] }
   0x3   :  { %v245_v7 = vmax.f32 %v18_v2, %v19_v3  ;;  %v10_v8 = vld [vmem:[%s441_s0 + $0x10] sm:$0xff]  ;;  %v11_v9 = vld [vmem:[%s441_s0 + $0x18] sm:$0xff]  ;;  %v253_v10 = vmax.f32 %v8_v5, %v9_v6  ;;  %v20_v11 = vld [vmem:[%s441_s0 + $0x60] sm:$0xff] }
   0x4   :  { %v258_v12 = vmax.f32 %v10_v8, %v11_v9  ;;  %v21_v13 = vld [vmem:[%s441_s0 + $0x68] sm:$0xff]  ;;  %v22_v14 = vld [vmem:[%s441_s0 + $0x70] sm:$0xff]  ;;  %v23_v15 = vld [vmem:[%s441_s0 + $0x78] sm:$0xff] }
   0x5   :  { %v184_v16 = vpack.i.bf16 %v245_v7, %v237_v4  ;;  %v12_v17 = vld [vmem:[%s441_s0 + $0x20] sm:$0xff]  ;;  %v13_v18 = vld [vmem:[%s441_s0 + $0x28] sm:$0xff]  ;;  %v14_v19 = vld [vmem:[%s441_s0 + $0x30] sm:$0xff]  ;;  %v286_v22 = vmax.f32 %v20_v11, %v21_v13  ;;  %v288_v23 = vmax.f32 %v22_v14, %v23_v15 }
   0x6   :  { %v174_v20 = vpack.i.bf16 %v258_v12, %v253_v10  ;;  %v15_v21 = vld [vmem:[%s441_s0 + $0x38] sm:$0xff]  ;;  %v291_v24 = vmax.f32 %v12_v17, %v13_v18  ;;  %v36_v26 = vld [vmem:[%s441_s0 + $0xe0] sm:$0xff]  ;;  %v25_v28 = vld [vmem:[%s441_s0 + $0x88] sm:$0xff] }
   0x7   :  { %185 = vrot.lane.b32.xlu1 %v184_v16, %s214_s9  ;;  %v293_v25 = vmax.f32 %v14_v19, %v15_v21  ;;  %v24_v27 = vld [vmem:[%s441_s0 + $0x80] sm:$0xff]  ;;  %v26_v29 = vld [vmem:[%s441_s0 + $0x90] sm:$0xff]  ;;  %v37_v30 = vld [vmem:[%s441_s0 + $0xe8] sm:$0xff]  ;;  %v189_v34 = vpack.i.bf16 %v288_v23, %v286_v22 }
   0x8   :  { %175 = vrot.lane.b32.xlu0 %v174_v20, %s214_s9  ;;  %v38_v31 = vld [vmem:[%s441_s0 + $0xf0] sm:$0xff]  ;;  %v27_v32 = vld [vmem:[%s441_s0 + $0x98] sm:$0xff]  ;;  %v48_v33 = vmax.f32 %v24_v27, %v25_v28  ;;  %v32_v36 = vld [vmem:[%s441_s0 + $0xc0] sm:$0xff]  ;;  %v347_v47 = vmax.f32 %v36_v26, %v37_v30 }
   0x9   :  { %v39_v35 = vld [vmem:[%s441_s0 + $0xf8] sm:$0xff]  ;;  %v49_v37 = vmax.f32 %v26_v29, %v27_v32  ;;  %v28_v38 = vld [vmem:[%s441_s0 + $0xa0] sm:$0xff]  ;;  %v179_v39 = vpack.i.bf16 %v293_v25, %v291_v24  ;;  %v29_v40 = vld [vmem:[%s441_s0 + $0xa8] sm:$0xff] }
   0xa   :  { %v30_v41 = vld [vmem:[%s441_s0 + $0xb0] sm:$0xff]  ;;  %v31_v42 = vld [vmem:[%s441_s0 + $0xb8] sm:$0xff]  ;;  %v33_v43 = vld [vmem:[%s441_s0 + $0xc8] sm:$0xff]  ;;  %v350_v48 = vmax.f32 %v38_v31, %v39_v35  ;;  %v50_v49 = vmax.f32 %v28_v38, %v29_v40 }
   0xb   :  { %v34_v44 = vld [vmem:[%s441_s0 + $0xd0] sm:$0xff]  ;;  %v35_v45 = vld [vmem:[%s441_s0 + $0xd8] sm:$0xff]  ;;  %v194_v46 = vpack.i.bf16 %v49_v37, %v48_v33  ;;  %v51_v50 = vmax.f32 %v30_v41, %v31_v42  ;;  %v354_v51 = vmax.f32 %v32_v36, %v33_v43 }
   0xc   :  { %v356_v52 = vmax.f32 %v34_v44, %v35_v45  ;;  %v209_v53 = vpack.i.bf16 %v350_v48, %v347_v47 }
   0xd   :  { %195 = vrot.lane.b32.xlu2 %v194_v46, %s214_s9  ;;  %v199_v54 = vpack.i.bf16 %v51_v50, %v50_v49 }
   0xe   :  { %v204_v55 = vpack.i.bf16 %v356_v52, %v354_v51 }
   0xf   :  { %190 = vrot.lane.b32.xlu1 %v189_v34, %s214_s9 }
  0x10   :  { %180 = vrot.lane.b32.xlu0 %v179_v39, %s214_s9 }
  0x15   :  { %200 = vrot.lane.b32.xlu2 %v199_v54, %s214_s9 }
  0x17   :  { %210 = vrot.lane.b32.xlu1 %v209_v53, %s214_s9 }
  0x18   :  { %205 = vrot.lane.b32.xlu0 %v204_v55, %s214_s9 }
  0x67   :  { %v196_v56 = vpop.permute.xlu2 %195 }
  0x68   :  { %v198_v57 = vunpack.i.h.bf16 %v196_v56  ;;  %v197_v58 = vunpack.i.l.bf16 %v196_v56 }
  0x6a   :  { %v129_v59 = vmax.f32 %v49_v37, %v198_v57  ;;  %v128_v60 = vmax.f32 %v48_v33, %v197_v58 }
  0x6c   :  { %v145_v61 = vpack.c.bf16 %v129_v59, %v129_v59  ;;  %v144_v62 = vpack.c.bf16 %v128_v60, %v128_v60 }
  0x6e   :  { %162 = vst.msk [vmem:[%s442_s1 + $0x24] sm:$0xf] %vm152_vm0, %v145_v61 }
  0x6f   :  { %161 = vst.msk [vmem:[%s442_s1 + $0x20] sm:$0xf] %vm152_vm0, %v144_v62  ;;  %v201_v63 = vpop.permute.xlu2 %200 }
  0x70   :  { %v203_v0 = vunpack.i.h.bf16 %v201_v63  ;;  %v202_v1 = vunpack.i.l.bf16 %v201_v63 }
  0x72   :  { %v131_v2 = vmax.f32 %v51_v50, %v203_v0  ;;  %v130_v3 = vmax.f32 %v50_v49, %v202_v1 }
  0x74   :  { %v147_v5 = vpack.c.bf16 %v131_v2, %v131_v2  ;;  %v146_v6 = vpack.c.bf16 %v130_v3, %v130_v3 }
  0x76   :  { %164 = vst.msk [vmem:[%s442_s1 + $0x2c] sm:$0xf] %vm152_vm0, %v147_v5 }
  0x77   :  { %163 = vst.msk [vmem:[%s442_s1 + $0x28] sm:$0xf] %vm152_vm0, %v146_v6 }
  0x79   :  { %v186_v8 = vpop.permute.xlu1 %185 }
  0x7a   :  { %v188_v9 = vunpack.i.h.bf16 %v186_v8  ;;  %v187_v11 = vunpack.i.l.bf16 %v186_v8  ;;  %v176_v13 = vpop.permute.xlu0 %175 }
  0x7b   :  { %v178_v14 = vunpack.i.h.bf16 %v176_v13  ;;  %v177_v15 = vunpack.i.l.bf16 %v176_v13 }
  0x7c   :  { %v125_v16 = vmax.f32 %v245_v7, %v188_v9  ;;  %v124_v17 = vmax.f32 %v237_v4, %v187_v11 }
  0x7d   :  { %v121_v18 = vmax.f32 %v258_v12, %v178_v14  ;;  %v120_v19 = vmax.f32 %v253_v10, %v177_v15 }
  0x7e   :  { %v141_v20 = vpack.c.bf16 %v125_v16, %v125_v16  ;;  %v140_v21 = vpack.c.bf16 %v124_v17, %v124_v17 }
  0x7f   :  { %v137_v26 = vpack.c.bf16 %v121_v18, %v121_v18  ;;  %v136_v27 = vpack.c.bf16 %v120_v19, %v120_v19 }
  0x80   :  { %158 = vst.msk [vmem:[%s442_s1 + $0x14] sm:$0xf] %vm152_vm0, %v141_v20 }
  0x81   :  { %157 = vst.msk [vmem:[%s442_s1 + $0x10] sm:$0xf] %vm152_vm0, %v140_v21  ;;  %v191_v7 = vpop.permute.xlu1 %190 }
  0x82   :  { %154 = vst.msk [vmem:[%s442_s1 + $0x4] sm:$0xf] %vm152_vm0, %v137_v26  ;;  %v193_v4 = vunpack.i.h.bf16 %v191_v7  ;;  %v192_v10 = vunpack.i.l.bf16 %v191_v7  ;;  %v181_v12 = vpop.permute.xlu0 %180 }
  0x83   :  { %153 = vst.msk [vmem:[%s442_s1] sm:$0xf] %vm152_vm0, %v136_v27  ;;  %v183_v28 = vunpack.i.h.bf16 %v181_v12  ;;  %v182_v29 = vunpack.i.l.bf16 %v181_v12 }
  0x84   :  { %v127_v30 = vmax.f32 %v288_v23, %v193_v4  ;;  %v126_v31 = vmax.f32 %v286_v22, %v192_v10 }
  0x85   :  { %v123_v32 = vmax.f32 %v293_v25, %v183_v28  ;;  %v122_v33 = vmax.f32 %v291_v24, %v182_v29 }
  0x86   :  { %v143_v34 = vpack.c.bf16 %v127_v30, %v127_v30  ;;  %v142_v35 = vpack.c.bf16 %v126_v31, %v126_v31 }
  0x87   :  { %v139_v36 = vpack.c.bf16 %v123_v32, %v123_v32  ;;  %v138_v37 = vpack.c.bf16 %v122_v33, %v122_v33 }
  0x88   :  { %160 = vst.msk [vmem:[%s442_s1 + $0x1c] sm:$0xf] %vm152_vm0, %v143_v34 }
  0x89   :  { %159 = vst.msk [vmem:[%s442_s1 + $0x18] sm:$0xf] %vm152_vm0, %v142_v35  ;;  %v211_v23 = vpop.permute.xlu1 %210 }
  0x8a   :  { %156 = vst.msk [vmem:[%s442_s1 + $0xc] sm:$0xf] %vm152_vm0, %v139_v36  ;;  %v213_v22 = vunpack.i.h.bf16 %v211_v23  ;;  %v212_v24 = vunpack.i.l.bf16 %v211_v23  ;;  %v206_v25 = vpop.permute.xlu0 %205 }
  0x8b   :  { %155 = vst.msk [vmem:[%s442_s1 + $0x8] sm:$0xf] %vm152_vm0, %v138_v37  ;;  %v208_v38 = vunpack.i.h.bf16 %v206_v25  ;;  %v207_v39 = vunpack.i.l.bf16 %v206_v25 }
  0x8c   :  { %v135_v40 = vmax.f32 %v350_v48, %v213_v22  ;;  %v134_v41 = vmax.f32 %v347_v47, %v212_v24 }
  0x8d   :  { %v133_v42 = vmax.f32 %v356_v52, %v208_v38  ;;  %v132_v43 = vmax.f32 %v354_v51, %v207_v39 }
  0x8e   :  { %v151_v44 = vpack.c.bf16 %v135_v40, %v135_v40  ;;  %v150_v45 = vpack.c.bf16 %v134_v41, %v134_v41 }
  0x8f   :  { %v149_v46 = vpack.c.bf16 %v133_v42, %v133_v42  ;;  %v148_v49 = vpack.c.bf16 %v132_v43, %v132_v43 }
  0x90   :  { %168 = vst.msk [vmem:[%s442_s1 + $0x3c] sm:$0xf] %vm152_vm0, %v151_v44 }
  0x91   :  { %167 = vst.msk [vmem:[%s442_s1 + $0x38] sm:$0xf] %vm152_vm0, %v150_v45 }
  0x92   :  { %166 = vst.msk [vmem:[%s442_s1 + $0x34] sm:$0xf] %vm152_vm0, %v149_v46 }
  0x93   :  { %165 = vst.msk [vmem:[%s442_s1 + $0x30] sm:$0xf] %vm152_vm0, %v148_v49 }

// kernel: down_forward.9
= control target key start
LH: loop header
LB: loop body
LE: loop exit
PB: predicated region body
PF: predicated region fallthrough
CT: control target
= control target key end

     0   :  { %s114_s9 = smov 124   ;;  %vm80_vm0 = vcmask 25600   ;;  %s205_s0 = inlined_call_operand.vmem [shape: f32[8,2,4,8], index: 0, kind: input, shape index: {}]   ;;  %s206_s1 = inlined_call_operand.vmem [shape: bf16[8,4,4], index: 1, kind: output, shape index: {}]  }
   0x1   :  { %v16_v0 = vld [vmem:[%s205_s0 + $0x20] sm:$0xf]  ;;  %v17_v1 = vld [vmem:[%s205_s0 + $0x24] sm:$0xf]  ;;  %v18_v2 = vld [vmem:[%s205_s0 + $0x28] sm:$0xf] }
   0x2   :  { %v19_v3 = vld [vmem:[%s205_s0 + $0x2c] sm:$0xf]  ;;  %v28_v4 = vmax.f32 %v16_v0, %v17_v1  ;;  %v8_v5 = vld [vmem:[%s205_s0] sm:$0xf]  ;;  %v9_v6 = vld [vmem:[%s205_s0 + $0x4] sm:$0xf] }
   0x3   :  { %v29_v7 = vmax.f32 %v18_v2, %v19_v3  ;;  %v10_v8 = vld [vmem:[%s205_s0 + $0x8] sm:$0xf]  ;;  %v11_v9 = vld [vmem:[%s205_s0 + $0xc] sm:$0xf]  ;;  %v24_v10 = vmax.f32 %v8_v5, %v9_v6  ;;  %v20_v11 = vld [vmem:[%s205_s0 + $0x30] sm:$0xf] }
   0x4   :  { %v25_v12 = vmax.f32 %v10_v8, %v11_v9  ;;  %v21_v13 = vld [vmem:[%s205_s0 + $0x34] sm:$0xf]  ;;  %v22_v14 = vld [vmem:[%s205_s0 + $0x38] sm:$0xf]  ;;  %v23_v15 = vld [vmem:[%s205_s0 + $0x3c] sm:$0xf] }
   0x5   :  { %v104_v16 = vpack.i.bf16 %v29_v7, %v28_v4  ;;  %v12_v17 = vld [vmem:[%s205_s0 + $0x10] sm:$0xf]  ;;  %v13_v18 = vld [vmem:[%s205_s0 + $0x14] sm:$0xf]  ;;  %v14_v19 = vld [vmem:[%s205_s0 + $0x18] sm:$0xf]  ;;  %v30_v22 = vmax.f32 %v20_v11, %v21_v13  ;;  %v31_v23 = vmax.f32 %v22_v14, %v23_v15 }
   0x6   :  { %v94_v20 = vpack.i.bf16 %v25_v12, %v24_v10  ;;  %v15_v21 = vld [vmem:[%s205_s0 + $0x1c] sm:$0xf]  ;;  %v26_v24 = vmax.f32 %v12_v17, %v13_v18 }
   0x7   :  { %105 = vrot.lane.b32.xlu1 %v104_v16, %s114_s9  ;;  %v27_v25 = vmax.f32 %v14_v19, %v15_v21  ;;  %v109_v26 = vpack.i.bf16 %v31_v23, %v30_v22 }
   0x8   :  { %95 = vrot.lane.b32.xlu0 %v94_v20, %s114_s9 }
   0x9   :  { %v99_v27 = vpack.i.bf16 %v27_v25, %v26_v24 }
   0xf   :  { %110 = vrot.lane.b32.xlu1 %v109_v26, %s114_s9 }
  0x10   :  { %100 = vrot.lane.b32.xlu0 %v99_v27, %s114_s9 }
  0x79   :  { %v106_v28 = vpop.permute.xlu1 %105 }
  0x7a   :  { %v108_v29 = vunpack.i.h.bf16 %v106_v28  ;;  %v107_v30 = vunpack.i.l.bf16 %v106_v28  ;;  %v96_v31 = vpop.permute.xlu0 %95 }
  0x7b   :  { %v98_v32 = vunpack.i.h.bf16 %v96_v31  ;;  %v97_v33 = vunpack.i.l.bf16 %v96_v31 }
  0x7c   :  { %v69_v34 = vmax.f32 %v29_v7, %v108_v29  ;;  %v68_v35 = vmax.f32 %v28_v4, %v107_v30 }
  0x7d   :  { %v65_v36 = vmax.f32 %v25_v12, %v98_v32  ;;  %v64_v37 = vmax.f32 %v24_v10, %v97_v33 }
  0x7e   :  { %v77_v38 = vpack.c.bf16 %v69_v34, %v69_v34  ;;  %v76_v39 = vpack.c.bf16 %v68_v35, %v68_v35 }
  0x7f   :  { %v73_v40 = vpack.c.bf16 %v65_v36, %v65_v36  ;;  %v72_v41 = vpack.c.bf16 %v64_v37, %v64_v37 }
  0x80   :  { %86 = vst.msk [vmem:[%s206_s1 + $0xa] sm:$0x3] %vm80_vm0, %v77_v38 }
  0x81   :  { %85 = vst.msk [vmem:[%s206_s1 + $0x8] sm:$0x3] %vm80_vm0, %v76_v39  ;;  %v111_v42 = vpop.permute.xlu1 %110 }
  0x82   :  { %82 = vst.msk [vmem:[%s206_s1 + $0x2] sm:$0x3] %vm80_vm0, %v73_v40  ;;  %v113_v43 = vunpack.i.h.bf16 %v111_v42  ;;  %v112_v44 = vunpack.i.l.bf16 %v111_v42  ;;  %v101_v45 = vpop.permute.xlu0 %100 }
  0x83   :  { %81 = vst.msk [vmem:[%s206_s1] sm:$0x3] %vm80_vm0, %v72_v41  ;;  %v103_v46 = vunpack.i.h.bf16 %v101_v45  ;;  %v102_v47 = vunpack.i.l.bf16 %v101_v45 }
  0x84   :  { %v71_v48 = vmax.f32 %v31_v23, %v113_v43  ;;  %v70_v49 = vmax.f32 %v30_v22, %v112_v44 }
  0x85   :  { %v67_v50 = vmax.f32 %v27_v25, %v103_v46  ;;  %v66_v51 = vmax.f32 %v26_v24, %v102_v47 }
  0x86   :  { %v79_v52 = vpack.c.bf16 %v71_v48, %v71_v48  ;;  %v78_v53 = vpack.c.bf16 %v70_v49, %v70_v49 }
  0x87   :  { %v75_v54 = vpack.c.bf16 %v67_v50, %v67_v50  ;;  %v74_v55 = vpack.c.bf16 %v66_v51, %v66_v51 }
  0x88   :  { %88 = vst.msk [vmem:[%s206_s1 + $0xe] sm:$0x3] %vm80_vm0, %v79_v52 }
  0x89   :  { %87 = vst.msk [vmem:[%s206_s1 + $0xc] sm:$0x3] %vm80_vm0, %v78_v53 }
  0x8a   :  { %84 = vst.msk [vmem:[%s206_s1 + $0x6] sm:$0x3] %vm80_vm0, %v75_v54 }
  0x8b   :  { %83 = vst.msk [vmem:[%s206_s1 + $0x4] sm:$0x3] %vm80_vm0, %v74_v55 }

// kernel: down_forward.14
= control target key start
LH: loop header
LB: loop body
LE: loop exit
PB: predicated region body
PF: predicated region fallthrough
CT: control target
= control target key end

     0   :  { %s118_s26 = smov 120   ;;  %vm104_vm0 = vcmask 58368   ;;  %s217_s0 = inlined_call_operand.vmem [shape: bf16[8,2,4,16], index: 0, kind: input, shape index: {}]   ;;  %s218_s1 = inlined_call_operand.vmem [shape: bf16[8,4,8], index: 1, kind: output, shape index: {}]  }
   0x1   :  { %v12_v0 = vld [vmem:[%s217_s0 + $0x8] sm:$0x3]  ;;  %v13_v1 = vld [vmem:[%s217_s0 + $0xa] sm:$0x3]  ;;  %v8_v2 = vld [vmem:[%s217_s0] sm:$0x3] }
   0x2   :  { %v28_v3 = vunpack.c.l.bf16 %v12_v0  ;;  %v29_v4 = vunpack.c.l.bf16 %v13_v1  ;;  %v9_v5 = vld [vmem:[%s217_s0 + $0x2] sm:$0x3]  ;;  %v24_v6 = vunpack.c.l.bf16 %v8_v2  ;;  %v14_v8 = vld [vmem:[%s217_s0 + $0xc] sm:$0x3]  ;;  %v15_v9 = vld [vmem:[%s217_s0 + $0xe] sm:$0x3] }
   0x3   :  { %v25_v7 = vunpack.c.l.bf16 %v9_v5  ;;  %v10_v11 = vld [vmem:[%s217_s0 + $0x4] sm:$0x3]  ;;  %v11_v12 = vld [vmem:[%s217_s0 + $0x6] sm:$0x3]  ;;  %v16_v14 = vld [vmem:[%s217_s0 + $0x10] sm:$0x3]  ;;  %v30_v16 = vunpack.c.l.bf16 %v14_v8  ;;  %v31_v17 = vunpack.c.l.bf16 %v15_v9 }
   0x4   :  { %v42_v10 = vadd.f32 %v29_v4, %v28_v3  ;;  %v17_v15 = vld [vmem:[%s217_s0 + $0x12] sm:$0x3]  ;;  %v32_v18 = vunpack.c.l.bf16 %v16_v14  ;;  %v26_v20 = vunpack.c.l.bf16 %v10_v11  ;;  %v27_v21 = vunpack.c.l.bf16 %v11_v12  ;;  %v18_v22 = vld [vmem:[%s217_s0 + $0x14] sm:$0x3]  ;;  %v19_v23 = vld [vmem:[%s217_s0 + $0x16] sm:$0x3] }
   0x5   :  { %v40_v13 = vadd.f32 %v25_v7, %v24_v6  ;;  %v33_v19 = vunpack.c.l.bf16 %v17_v15  ;;  %v43_v25 = vadd.f32 %v31_v17, %v30_v16  ;;  %v34_v26 = vunpack.c.l.bf16 %v18_v22  ;;  %v22_v29 = vld [vmem:[%s217_s0 + $0x1c] sm:$0x3]  ;;  %v23_v30 = vld [vmem:[%s217_s0 + $0x1e] sm:$0x3]  ;;  %v20_v31 = vld [vmem:[%s217_s0 + $0x18] sm:$0x3] }
   0x6   :  { %60 = vrot.lane.b32.xlu1 %v42_v10, %s118_s26  ;;  %v35_v27 = vunpack.c.l.bf16 %v19_v23  ;;  %v41_v28 = vadd.f32 %v27_v21, %v26_v20  ;;  %v21_v32 = vld [vmem:[%s217_s0 + $0x1a] sm:$0x3]  ;;  %v38_v33 = vunpack.c.l.bf16 %v22_v29  ;;  %v39_v34 = vunpack.c.l.bf16 %v23_v30 }
   0x7   :  { %56 = vrot.lane.b32.xlu0 %v40_v13, %s118_s26  ;;  %v44_v24 = vadd.f32 %v33_v19, %v32_v18  ;;  %v36_v36 = vunpack.c.l.bf16 %v20_v31  ;;  %v37_v37 = vunpack.c.l.bf16 %v21_v32 }
   0x8   :  { %v45_v35 = vadd.f32 %v35_v27, %v34_v26  ;;  %v47_v38 = vadd.f32 %v39_v34, %v38_v33 }
   0x9   :  { %64 = vrot.lane.b32.xlu2 %v44_v24, %s118_s26  ;;  %v46_v39 = vadd.f32 %v37_v37, %v36_v36 }
   0xe   :  { %62 = vrot.lane.b32.xlu1 %v43_v25, %s118_s26 }
   0xf   :  { %58 = vrot.lane.b32.xlu0 %v41_v28, %s118_s26 }
  0x11   :  { %66 = vrot.lane.b32.xlu2 %v45_v35, %s118_s26 }
  0x16   :  { %70 = vrot.lane.b32.xlu1 %v47_v38, %s118_s26 }
  0x17   :  { %68 = vrot.lane.b32.xlu0 %v46_v39, %s118_s26 }
  0x63   :  { %v65_v40 = vpop.permute.xlu2 %64 }
  0x64   :  { %v84_v41 = vadd.f32 %v65_v40, %v44_v24 }
  0x66   :  { %v92_v42 = vmul.f32 0.25, %v84_v41 }
  0x68   :  { %v100_v43 = vpack.c.bf16 %v92_v42, %v92_v42 }
  0x6a   :  { %109 = vst.msk [vmem:[%s218_s1 + $0x8] sm:$0x3] %vm104_vm0, %v100_v43 }
  0x6b   :  { %v67_v44 = vpop.permute.xlu2 %66 }
  0x6c   :  { %v85_v45 = vadd.f32 %v67_v44, %v45_v35 }
  0x6e   :  { %v93_v46 = vmul.f32 0.25, %v85_v45 }
  0x70   :  { %v101_v47 = vpack.c.bf16 %v93_v46, %v93_v46 }
  0x72   :  { %110 = vst.msk [vmem:[%s218_s1 + $0xa] sm:$0x3] %vm104_vm0, %v101_v47 }
  0x78   :  { %v61_v48 = vpop.permute.xlu1 %60 }
  0x79   :  { %v82_v49 = vadd.f32 %v61_v48, %v42_v10  ;;  %v57_v50 = vpop.permute.xlu0 %56 }
  0x7a   :  { %v80_v51 = vadd.f32 %v57_v50, %v40_v13 }
  0x7b   :  { %v90_v52 = vmul.f32 0.25, %v82_v49 }
  0x7c   :  { %v88_v53 = vmul.f32 0.25, %v80_v51 }
  0x7d   :  { %v98_v54 = vpack.c.bf16 %v90_v52, %v90_v52 }
  0x7e   :  { %v96_v55 = vpack.c.bf16 %v88_v53, %v88_v53 }
  0x7f   :  { %107 = vst.msk [vmem:[%s218_s1 + $0x4] sm:$0x3] %vm104_vm0, %v98_v54 }
  0x80   :  { %105 = vst.msk [vmem:[%s218_s1] sm:$0x3] %vm104_vm0, %v96_v55  ;;  %v63_v56 = vpop.permute.xlu1 %62 }
  0x81   :  { %v83_v57 = vadd.f32 %v63_v56, %v43_v25  ;;  %v59_v58 = vpop.permute.xlu0 %58 }
  0x82   :  { %v81_v59 = vadd.f32 %v59_v58, %v41_v28 }
  0x83   :  { %v91_v60 = vmul.f32 0.25, %v83_v57 }
  0x84   :  { %v89_v61 = vmul.f32 0.25, %v81_v59 }
  0x85   :  { %v99_v62 = vpack.c.bf16 %v91_v60, %v91_v60 }
  0x86   :  { %v97_v63 = vpack.c.bf16 %v89_v61, %v89_v61 }
  0x87   :  { %108 = vst.msk [vmem:[%s218_s1 + $0x6] sm:$0x3] %vm104_vm0, %v99_v62 }
  0x88   :  { %106 = vst.msk [vmem:[%s218_s1 + $0x2] sm:$0x3] %vm104_vm0, %v97_v63  ;;  %v71_v0 = vpop.permute.xlu1 %70 }
  0x89   :  { %v87_v1 = vadd.f32 %v71_v0, %v47_v38  ;;  %v69_v2 = vpop.permute.xlu0 %68 }
  0x8a   :  { %v86_v3 = vadd.f32 %v69_v2, %v46_v39 }
  0x8b   :  { %v95_v4 = vmul.f32 0.25, %v87_v1 }
  0x8c   :  { %v94_v5 = vmul.f32 0.25, %v86_v3 }
  0x8d   :  { %v103_v6 = vpack.c.bf16 %v95_v4, %v95_v4 }
  0x8e   :  { %v102_v7 = vpack.c.bf16 %v94_v5, %v94_v5 }
  0x8f   :  { %112 = vst.msk [vmem:[%s218_s1 + $0xe] sm:$0x3] %vm104_vm0, %v103_v6 }
  0x90   :  { %111 = vst.msk [vmem:[%s218_s1 + $0xc] sm:$0x3] %vm104_vm0, %v102_v7 }

// kernel: down_forward.11
= control target key start
LH: loop header
LB: loop body
LE: loop exit
PB: predicated region body
PF: predicated region fallthrough
CT: control target
= control target key end

     0   :  { %s118_s26 = smov 124   ;;  %vm104_vm0 = vcmask 25600   ;;  %s217_s0 = inlined_call_operand.vmem [shape: bf16[8,2,4,8], index: 0, kind: input, shape index: {}]   ;;  %s218_s1 = inlined_call_operand.vmem [shape: bf16[8,4,4], index: 1, kind: output, shape index: {}]  }
   0x1   :  { %v12_v0 = vld [vmem:[%s217_s0 + $0x8] sm:$0x3]  ;;  %v13_v1 = vld [vmem:[%s217_s0 + $0xa] sm:$0x3]  ;;  %v8_v2 = vld [vmem:[%s217_s0] sm:$0x3] }
   0x2   :  { %v28_v3 = vunpack.c.l.bf16 %v12_v0  ;;  %v29_v4 = vunpack.c.l.bf16 %v13_v1  ;;  %v9_v5 = vld [vmem:[%s217_s0 + $0x2] sm:$0x3]  ;;  %v24_v6 = vunpack.c.l.bf16 %v8_v2  ;;  %v14_v8 = vld [vmem:[%s217_s0 + $0xc] sm:$0x3]  ;;  %v15_v9 = vld [vmem:[%s217_s0 + $0xe] sm:$0x3] }
   0x3   :  { %v25_v7 = vunpack.c.l.bf16 %v9_v5  ;;  %v10_v11 = vld [vmem:[%s217_s0 + $0x4] sm:$0x3]  ;;  %v11_v12 = vld [vmem:[%s217_s0 + $0x6] sm:$0x3]  ;;  %v16_v14 = vld [vmem:[%s217_s0 + $0x10] sm:$0x3]  ;;  %v30_v16 = vunpack.c.l.bf16 %v14_v8  ;;  %v31_v17 = vunpack.c.l.bf16 %v15_v9 }
   0x4   :  { %v42_v10 = vadd.f32 %v29_v4, %v28_v3  ;;  %v17_v15 = vld [vmem:[%s217_s0 + $0x12] sm:$0x3]  ;;  %v32_v18 = vunpack.c.l.bf16 %v16_v14  ;;  %v26_v20 = vunpack.c.l.bf16 %v10_v11  ;;  %v27_v21 = vunpack.c.l.bf16 %v11_v12  ;;  %v18_v22 = vld [vmem:[%s217_s0 + $0x14] sm:$0x3]  ;;  %v19_v23 = vld [vmem:[%s217_s0 + $0x16] sm:$0x3] }
   0x5   :  { %v40_v13 = vadd.f32 %v25_v7, %v24_v6  ;;  %v33_v19 = vunpack.c.l.bf16 %v17_v15  ;;  %v43_v25 = vadd.f32 %v31_v17, %v30_v16  ;;  %v34_v26 = vunpack.c.l.bf16 %v18_v22  ;;  %v22_v29 = vld [vmem:[%s217_s0 + $0x1c] sm:$0x3]  ;;  %v23_v30 = vld [vmem:[%s217_s0 + $0x1e] sm:$0x3]  ;;  %v20_v31 = vld [vmem:[%s217_s0 + $0x18] sm:$0x3] }
   0x6   :  { %60 = vrot.lane.b32.xlu1 %v42_v10, %s118_s26  ;;  %v35_v27 = vunpack.c.l.bf16 %v19_v23  ;;  %v41_v28 = vadd.f32 %v27_v21, %v26_v20  ;;  %v21_v32 = vld [vmem:[%s217_s0 + $0x1a] sm:$0x3]  ;;  %v38_v33 = vunpack.c.l.bf16 %v22_v29  ;;  %v39_v34 = vunpack.c.l.bf16 %v23_v30 }
   0x7   :  { %56 = vrot.lane.b32.xlu0 %v40_v13, %s118_s26  ;;  %v44_v24 = vadd.f32 %v33_v19, %v32_v18  ;;  %v36_v36 = vunpack.c.l.bf16 %v20_v31  ;;  %v37_v37 = vunpack.c.l.bf16 %v21_v32 }
   0x8   :  { %v45_v35 = vadd.f32 %v35_v27, %v34_v26  ;;  %v47_v38 = vadd.f32 %v39_v34, %v38_v33 }
   0x9   :  { %64 = vrot.lane.b32.xlu2 %v44_v24, %s118_s26  ;;  %v46_v39 = vadd.f32 %v37_v37, %v36_v36 }
   0xe   :  { %62 = vrot.lane.b32.xlu1 %v43_v25, %s118_s26 }
   0xf   :  { %58 = vrot.lane.b32.xlu0 %v41_v28, %s118_s26 }
  0x11   :  { %66 = vrot.lane.b32.xlu2 %v45_v35, %s118_s26 }
  0x16   :  { %70 = vrot.lane.b32.xlu1 %v47_v38, %s118_s26 }
  0x17   :  { %68 = vrot.lane.b32.xlu0 %v46_v39, %s118_s26 }
  0x63   :  { %v65_v40 = vpop.permute.xlu2 %64 }
  0x64   :  { %v84_v41 = vadd.f32 %v65_v40, %v44_v24 }
  0x66   :  { %v92_v42 = vmul.f32 0.25, %v84_v41 }
  0x68   :  { %v100_v43 = vpack.c.bf16 %v92_v42, %v92_v42 }
  0x6a   :  { %109 = vst.msk [vmem:[%s218_s1 + $0x8] sm:$0x3] %vm104_vm0, %v100_v43 }
  0x6b   :  { %v67_v44 = vpop.permute.xlu2 %66 }
  0x6c   :  { %v85_v45 = vadd.f32 %v67_v44, %v45_v35 }
  0x6e   :  { %v93_v46 = vmul.f32 0.25, %v85_v45 }
  0x70   :  { %v101_v47 = vpack.c.bf16 %v93_v46, %v93_v46 }
  0x72   :  { %110 = vst.msk [vmem:[%s218_s1 + $0xa] sm:$0x3] %vm104_vm0, %v101_v47 }
  0x78   :  { %v61_v48 = vpop.permute.xlu1 %60 }
  0x79   :  { %v82_v49 = vadd.f32 %v61_v48, %v42_v10  ;;  %v57_v50 = vpop.permute.xlu0 %56 }
  0x7a   :  { %v80_v51 = vadd.f32 %v57_v50, %v40_v13 }
  0x7b   :  { %v90_v52 = vmul.f32 0.25, %v82_v49 }
  0x7c   :  { %v88_v53 = vmul.f32 0.25, %v80_v51 }
  0x7d   :  { %v98_v54 = vpack.c.bf16 %v90_v52, %v90_v52 }
  0x7e   :  { %v96_v55 = vpack.c.bf16 %v88_v53, %v88_v53 }
  0x7f   :  { %107 = vst.msk [vmem:[%s218_s1 + $0x4] sm:$0x3] %vm104_vm0, %v98_v54 }
  0x80   :  { %105 = vst.msk [vmem:[%s218_s1] sm:$0x3] %vm104_vm0, %v96_v55  ;;  %v63_v56 = vpop.permute.xlu1 %62 }
  0x81   :  { %v83_v57 = vadd.f32 %v63_v56, %v43_v25  ;;  %v59_v58 = vpop.permute.xlu0 %58 }
  0x82   :  { %v81_v59 = vadd.f32 %v59_v58, %v41_v28 }
  0x83   :  { %v91_v60 = vmul.f32 0.25, %v83_v57 }
  0x84   :  { %v89_v61 = vmul.f32 0.25, %v81_v59 }
  0x85   :  { %v99_v62 = vpack.c.bf16 %v91_v60, %v91_v60 }
  0x86   :  { %v97_v63 = vpack.c.bf16 %v89_v61, %v89_v61 }
  0x87   :  { %108 = vst.msk [vmem:[%s218_s1 + $0x6] sm:$0x3] %vm104_vm0, %v99_v62 }
  0x88   :  { %106 = vst.msk [vmem:[%s218_s1 + $0x2] sm:$0x3] %vm104_vm0, %v97_v63  ;;  %v71_v0 = vpop.permute.xlu1 %70 }
  0x89   :  { %v87_v1 = vadd.f32 %v71_v0, %v47_v38  ;;  %v69_v2 = vpop.permute.xlu0 %68 }
  0x8a   :  { %v86_v3 = vadd.f32 %v69_v2, %v46_v39 }
  0x8b   :  { %v95_v4 = vmul.f32 0.25, %v87_v1 }
  0x8c   :  { %v94_v5 = vmul.f32 0.25, %v86_v3 }
  0x8d   :  { %v103_v6 = vpack.c.bf16 %v95_v4, %v95_v4 }
  0x8e   :  { %v102_v7 = vpack.c.bf16 %v94_v5, %v94_v5 }
  0x8f   :  { %112 = vst.msk [vmem:[%s218_s1 + $0xe] sm:$0x3] %vm104_vm0, %v103_v6 }
  0x90   :  { %111 = vst.msk [vmem:[%s218_s1 + $0xc] sm:$0x3] %vm104_vm0, %v102_v7 }

// kernel: down_forward.10
= control target key start
LH: loop header
LB: loop body
LE: loop exit
PB: predicated region body
PF: predicated region fallthrough
CT: control target
= control target key end

     0   :  { %s1597_s18 = smov 0   ;;  %s1942_s0 = inlined_call_operand.vmem [shape: bf16[2,88,8], index: 0, kind: input, shape index: {}]   ;;  %s1943_s1 = inlined_call_operand.vmem [shape: bf16[2,56,4], index: 1, kind: input, shape index: {}]   ;;  %s1944_s2 = inlined_call_operand.vmem [shape: bf16[6,8,16], index: 2, kind: input, shape index: {}]   ;;  %s1945_s3 = inlined_call_operand.vmem [shape: bf16[9,4,16], index: 3, kind: input, shape index: {}]   ;;  %s1946_s4 = inlined_call_operand.vmem [shape: f32[1,16], index: 4, kind: input, shape index: {}]   ;;  %s1947_s5 = inlined_call_operand.vmem [shape: bf16[2,4,2,8,16], index: 5, kind: output, shape index: {}]  }
   0x1 LB: > { %s1331_s19 = sadd.s32 4294967295, %s1565_s18   ;;  %p1335_p0 = scmp.ge.s32.totalorder %s1565_s18, 1  ;;  %s1565_s18 = sphi %s1597_s18, %s15_s18  }
   0x2   : > { %p197_p1 = scmp.lt.s32.totalorder %s1565_s18, 3 }
   0x4   : > { %p198_p2 = pnand %p1335_p0, %p197_p1 }
   0x5   : > { %p230_p3 = scmp.lt.s32.totalorder (!%p198_p2), %s1331_s19, 1 }
   0x6   : > { %201 = sbr.rel (%p198_p2) target bundleno = 337 (0x151), region = 40 }
   0xb   : > { %v408_v0 = vld [vmem:[%s1945_s3] sm:$0x3]  ;;  %vm452_vm0 = vcmask 1041408   ;;  %vm331_vm1 = vcmask 1043456   ;;  %v1340_v2 = vld [vmem:[%s1944_s2 + $0x4] sm:$0xf] }
   0xc   : > { %v480_v1 = vsel %vm452_vm0, %v408_v0, 0  ;;  %v1349_v3 = vld [vmem:[%s1945_s3 + $0x2] sm:$0x3]  ;;  %s1949_s19 = smov (!%p230_p3, %s1331_s19), 1  ;;  %v333_v4 = vsel %vm331_vm1, %v1340_v2, 0  ;;  %vm445_vm2 = vcmask 31744  }
   0xd   : > { %489 = vmatpush.bf16.msra.mxu3 %v480_v1  ;;  %v454_v5 = vsel %vm452_vm0, %v1349_v3, 0  ;;  %342 = vmatpush.bf16.msra.mxu0 %v333_v4  ;;  %v254_v6 = vld [vmem:[%s1944_s2] sm:$0xf]  ;;  %v1362_v7 = vld [vmem:[%s1944_s2 + $0xc] sm:$0xf]  ;;  %s1534_s7 = smul.u32 44, %s1949_s19 }
   0xe   : > { %463 = vmatpush.bf16.msra.mxu2 %v454_v5  ;;  %v1354_v8 = vld [vmem:[%s1945_s3 + $0x4] sm:$0x3]  ;;  %1528 = vmatpush.bf16.msra.mxu1 %v333_v4  ;;  %v373_v9 = vsel %vm331_vm1, %v254_v6, 0  ;;  %v689_v10 = vsel %vm331_vm1, %v1362_v7, 0  ;;  %v1357_v12 = vld [vmem:[%s1944_s2 + $0x8] sm:$0xf] }
   0xf   : > { %v520_v11 = vsel %vm452_vm0, %v1354_v8, 0  ;;  %s1535_s10 = smul.u32 28, %s1949_s19  ;;  %v567_v13 = vsel %vm331_vm1, %v1357_v12, 0  ;;  %s1640_s13 = scalar_lea.vmem %s1942_s0, %s1534_s7  ;;  %vm281_vm3 = vsmask.f32 7424  ;;  %vm318_vm4 = vcmask 64512  }
  0x10   : > { %v1648_v14 = vld [vmem:[%s1640_s13] sm:$0xff]   ;;  %v1651_v15 = vld [vmem:[%s1640_s13 + $0x8] sm:$0xff]   ;;  %v1654_v16 = vld [vmem:[%s1640_s13 + $0x18] sm:$0xff]   ;;  %vm507_vm5 = vcmask 1046528   ;;  %s1417_s12 = sshll.u32 %s1949_s19, 5  ;;  %vm1255_vm6 = vcmask 125952  }
  0x11   : > { %698 = vmatpush.bf16.msrb.mxu0 %v689_v10  ;;  %576 = vmatpush.bf16.msrb.mxu3 %v567_v13  ;;  %s1645_s16 = scalar_lea.vmem %s1943_s1, %s1535_s10  ;;  %v1657_v17 = vld [vmem:[%s1640_s13 + $0x1c] sm:$0xf]  ;;  %v283_v21 = vshrl.u32 %v1648_v14, 16  ;;  %v285_v22 = vshll.u32 %v1648_v14, 16  ;;  %v290_v23 = vshll.u32 %v1651_v15, 16  ;;  %v306_v24 = vshll.u32 %v1654_v16, 16  ;;  %s1906_s15 = scalar_lea.vmem %s1947_s5, %s1417_s12 }
  0x12   : > { %382 = vmatpush.bf16.msrb.mxu1 %v373_v9  ;;  %529 = vmatpush.bf16.msrb.mxu2 %v520_v11  ;;  %v1660_v18 = vld [vmem:[%s1645_s16] sm:$0xff]   ;;  %v1663_v19 = vld [vmem:[%s1645_s16 + $0x8] sm:$0xff]   ;;  %v409_v32 = vld [vmem:[%s1645_s16 + $0x10] sm:$0x1]  ;;  %v310_v35 = vshrl.u32 %v1654_v16, 16  ;;  %v294_v51 = vshrl.u32 %v1651_v15, 16 }
  0x13   : > { %v1666_v20 = vld [vmem:[%s1645_s16 + $0xc] sm:$0xf]  ;;  %v426_v25 = vshrl.u32 %v1660_v18, 16  ;;  %v428_v26 = vshll.u32 %v1660_v18, 16  ;;  %1352 = vmatmul.msk.bf16.vlgmr.msra.gmra.mxu3 %vm445_vm2, %v1660_v18  ;;  %v255_v27 = vld [vmem:[%s1640_s13 + $0x20] sm:$0x1]  ;;  %v421_v40 = vunpack.c.l.b16 %v409_v32  ;;  %v1442_v2 = vunpack.c.h.b16 %v1660_v18 }
  0x14   : > { %v287_v28 = vrot.slane %v285_v22, 1  ;;  %v292_v29 = vrot.slane %v290_v23, 1  ;;  %v433_v30 = vshll.u32 %v1663_v19, 16  ;;  %v275_v31 = vunpack.c.l.b16 %v255_v27  ;;  %v1367_v44 = vld [vmem:[%s1945_s3 + $0x6] sm:$0x3]  ;;  %v1688_v47 = vld [vmem:[%s1640_s13 + $0x10] sm:$0xff]  }
  0x15   : > { %v430_v33 = vrot.slane %v428_v26, 1  ;;  %v308_v34 = vrot.slane %v306_v24, 1  ;;  %v1690_v48 = vpack.c.b16 %v421_v40, %v421_v40  ;;  %v742_v49 = vsel %vm452_vm0, %v1367_v44, 0  ;;  %v1370_v59 = vld [vmem:[%s1945_s3 + $0x8] sm:$0x3]  ;;  %v1508_v26 = vld [vmem:[%s1640_s13 + $0xc] sm:$0xff]  }
  0x16   : > { %v288_v36 = vor.u32 %v287_v28, %v283_v21  ;;  %v435_v37 = vrot.slane %v433_v30, 1  ;;  %v280_v38 = vpack.c.b16 %v275_v31, %v275_v31  ;;  %v298_v52 = vshll.u32 %v1688_v47, 16  ;;  %v1381_v60 = vld [vmem:[%s1944_s2 + $0x14] sm:$0xf]  ;;  %v501_v1 = vld [vmem:[%s1645_s16] sm:$0xe] }
  0x17   : > { %v431_v39 = vor.u32 %v430_v33, %v426_v25  ;;  %v312_v42 = vor.u32 %v310_v35, %v308_v34  ;;  %v437_v53 = vshrl.u32 %v1663_v19, 16  ;;  %v441_v54 = vshll.u32 %v1690_v48, 16  ;;  %v1402_v4 = vld [vmem:[%s1945_s3 + $0xc] sm:$0x3]  ;;  %v1506_v7 = vld [vmem:[%s1640_s13 + $0x4] sm:$0xff]   ;;  %v1533_v40 = vld [vmem:[%s1640_s13 + $0x14] sm:$0xff]  }
  0x18   : > { %v293_v41 = vsel %vm281_vm3, %v288_v36, %v292_v29  ;;  %v314_v43 = vshll.u32 %v280_v38, 16  ;;  %v296_v55 = vor.u32 %v294_v51, %v292_v29  ;;  %v300_v56 = vrot.slane %v298_v52, 1  ;;  %v1530_v13 = vld [vmem:[%s1640_s13 + $0x4] sm:$0xff]   ;;  %v1532_v21 = vld [vmem:[%s1640_s13 + $0xc] sm:$0xff]  }
  0x19   : > { %1341 = vmatmul.msk.bf16.vlgmr.msra.gmra.mxu0 %vm318_vm4, %v293_v41  ;;  %v436_v45 = vsel %vm281_vm3, %v431_v39, %v435_v37  ;;  %v1701_v57 = vor.u32 %v437_v53, %v435_v37  ;;  %v443_v58 = vrot.slane %v441_v54, 1  ;;  %v814_v61 = vsel %vm452_vm0, %v1370_v59, 0  ;;  %v767_v27 = vld [vmem:[%s1645_s16 + $0x4] sm:$0xf]  ;;  %v1376_v33 = vld [vmem:[%s1944_s2 + $0x10] sm:$0xf] }
  0x1a   : > { %1350 = vmatmul.msk.bf16.vlgmr.msra.gmra.mxu2 %vm445_vm2, %v436_v45  ;;  %v316_v46 = vrot.slane %v314_v43, 1  ;;  %v1026_v62 = vsel %vm331_vm1, %v1381_v60, 0  ;;  %v301_v63 = vsel %vm281_vm3, %v296_v55, %v300_v56  ;;  %v505_v3 = vunpack.c.l.b16 %v501_v1  ;;  %v1561_v35 = vld [vmem:[%s1645_s16 + $0xc] sm:$0xf0]   ;;  %v1373_v43 = vld [vmem:[%s1945_s3 + $0xa] sm:$0x3] }
  0x1b   : > { %823 = vmatpush.bf16.msra.mxu2 %v814_v61  ;;  %1035 = vmatpush.bf16.msra.mxu3 %v1026_v62  ;;  %v444_v0 = vsel %vm281_vm3, %v1701_v57, %v443_v58  ;;  %v302_v5 = vshrl.u32 %v1688_v47, 16  ;;  %v1079_v6 = vsel %vm452_vm0, %v1402_v4, 0  ;;  %v509_v11 = vrot.slane %v1663_v19, 1  ;;  %v1772_v55 = vld [vmem:[%s1640_s13 + $0x20] sm:$0xff]   ;;  %v771_v58 = vld [vmem:[%s1645_s16 + $0x14] sm:$0x1] }
  0x1c   : > { %v317_v50 = vsel %vm281_vm3, %v312_v42, %v316_v46  ;;  %v506_v8 = vpack.c.b16 %v1442_v2, %v505_v3  ;;  %1088 = vmatpush.bf16.msra.mxu0 %v1079_v6  ;;  %v643_v22 = vshll.u32 %v1530_v13, 16  ;;  %v641_v23 = vshrl.u32 %v1530_v13, 16  ;;  %v1512_v3 = vld [vmem:[%s1640_s13 + $0x1c] sm:$0xff]  ;;  %v1418_v6 = vld [vmem:[%s1640_s13 + $0x8] sm:$0xff]  ;;  %v1412_v18 = vld [vmem:[%s1945_s3 + $0x10] sm:$0x3] }
  0x1d   : > { %1344 = vmatmul.msk.bf16.vlgmr.msra.gmra.mxu1 %vm318_vm4, %v317_v50  ;;  %v304_v9 = vor.u32 %v302_v5, %v300_v56  ;;  %v648_v25 = vshll.u32 %v1532_v21, 16  ;;  %v1741_v30 = vunpack.c.l.b16 %v1663_v19  ;;  %v511_v31 = vrot.slane %v1690_v48, 1  ;;  %v1510_v48 = vld [vmem:[%s1640_s13 + $0x14] sm:$0xff]   ;;  %v1562_v56 = vld [vmem:[%s1640_s13 + $0x1c] sm:$0xf0]  }
  0x1e   : > { %751 = vmatpush.bf16.msra.mxu1 %v742_v49  ;;  %v508_v10 = vrot.slane %v506_v8, 1  ;;  %v645_v24 = vrot.slane %v643_v22, 1  ;;  %v779_v32 = vunpack.c.l.b16 %v767_v27  ;;  %v904_v36 = vsel %vm331_vm1, %v1376_v33, 0 }
  0x1f   : > { %v309_v12 = vsel %vm281_vm3, %v304_v9, %v308_v34  ;;  %v650_v29 = vrot.slane %v648_v25, 1  ;;  %v1749_v34 = vld [vmem:[%s1645_s16 + $0x10] sm:$0xff]   ;;  %v512_v38 = vsel %vm507_vm5, %v509_v11, %v511_v31  ;;  %v1760_v41 = vor.u32 %v1561_v35, %v1666_v20 }
  0x20   : > { %v646_v28 = vor.u32 %v645_v24, %v641_v23  ;;  %v784_v39 = vpack.c.b16 %v1741_v30, %v779_v32  ;;  %v652_v44 = vshrl.u32 %v1532_v21, 16  ;;  %v656_v45 = vshll.u32 %v1533_v40, 16 }
  0x21   : > { %v857_v46 = vsel %vm452_vm0, %v1373_v43, 0  ;;  %v795_v20 = vshll.u32 %v1760_v41, 16  ;;  %v783_v61 = vunpack.c.l.b16 %v771_v58  ;;  %v1558_v62 = vor.u32 %v1562_v56, %v1657_v17  ;;  %v614_v17 = vld [vmem:[%s1640_s13 + $0x24] sm:$0x1]  ;;  %v1527_v43 = vld [vmem:[%s1645_s16 + $0xc] sm:$0xff] }
  0x22   : > { %v651_v37 = vsel %vm281_vm3, %v646_v28, %v650_v29  ;;  %v790_v42 = vshll.u32 %v784_v39, 16  ;;  %v788_v49 = vshrl.u32 %v784_v39, 16  ;;  %v654_v51 = vor.u32 %v652_v44, %v650_v29  ;;  %v1405_v29 = vld [vmem:[%s1945_s3 + $0xe] sm:$0x3]  ;;  %v839_v44 = vld [vmem:[%s1645_s16 + $0x4] sm:$0xe] }
  0x23   : > { %1353 = vmatmul.msk.bf16.gmra.mxu3 %vm445_vm2, %v1663_v19  ;;  %v658_v52 = vrot.slane %v656_v45, 1  ;;  %v797_v54 = vrot.slane %v795_v20, 1  ;;  %v664_v1 = vshll.u32 %v1558_v62, 16  ;;  %v799_v4 = vshrl.u32 %v1760_v41, 16  ;;  %v1421_v20 = vld [vmem:[%s1640_s13 + $0x20] sm:$0xff] }
  0x24   : > { %v792_v50 = vrot.slane %v790_v42, 1  ;;  %v978_v22 = vshrl.u32 %v1418_v6, 16  ;;  %v733_v25 = vpack.c.b16 %v1741_v30, %v1442_v2  ;;  %v668_v2 = vshrl.u32 %v1558_v62, 16 }
  0x25   : > { %v659_v59 = vsel %vm281_vm3, %v654_v51, %v658_v52  ;;  %v666_v8 = vrot.slane %v664_v1, 1  ;;  %v801_v9 = vor.u32 %v799_v4, %v797_v54  ;;  %v1151_v32 = vsel %vm452_vm0, %v1405_v29, 0  ;;  %v1501_v4 = vld [vmem:[%s1645_s16 + $0x8] sm:$0xf0] }
  0x26   : > { %v793_v53 = vor.u32 %v792_v50, %v788_v49  ;;  %v1194_v33 = vsel %vm452_vm0, %v1412_v18, 0 }
  0x28   : > { %v798_v60 = vsel %vm281_vm3, %v793_v53, %v797_v54  ;;  %v1001_v54 = vshll.u32 %v1421_v20, 16 }
  0x29   : > { %1342 = vmatmul.msk.bf16.gmra.mxu0 %vm318_vm4, %v301_v63  ;;  %v1781_v63 = vpack.c.b16 %v783_v61, %v783_v61 }
  0x2a   : > { %1351 = vmatmul.msk.bf16.gmra.mxu2 %vm445_vm2, %v444_v0  ;;  %v660_v0 = vshrl.u32 %v1533_v40, 16  ;;  %v1003_v58 = vrot.slane %v1001_v54, 1 }
  0x2b   : > { %v803_v5 = vshll.u32 %v1781_v63, 16  ;;  %v848_v62 = vrot.slane %v1781_v63, 1 }
  0x2d   : > { %1345 = vmatmul.msk.bf16.vlgmr.msrb.gmra.mxu1 %vm318_vm4, %v1648_v14  ;;  %v510_v14 = vsel %vm507_vm5, %v508_v10, %v509_v11  ;;  %v805_v10 = vrot.slane %v803_v5, 1  ;;  %v1419_v11 = vld [vmem:[%s1640_s13 + $0x10] sm:$0xff]  ;;  %v1502_v5 = vld [vmem:[%s1645_s16 + $0x8] sm:$0xe] }
  0x2e   : > { %866 = vmatpush.bf16.msrb.mxu1 %v857_v46  ;;  %v985_v24 = vshll.u32 %v1419_v11, 16  ;;  %v989_v40 = vshrl.u32 %v1419_v11, 16 }
  0x2f   : > { %v806_v21 = vsel %vm281_vm3, %v801_v9, %v805_v10 }
  0x30   : > { %v987_v28 = vrot.slane %v985_v24, 1 }
  0x32   : > { %v991_v45 = vor.u32 %v989_v40, %v987_v28 }
  0x33   : > { %1358 = vmatmul.msk.bf16.vlgmr.msrb.gmra.mxu3 %vm318_vm4, %v1506_v7  ;;  %v662_v7 = vor.u32 %v660_v0, %v658_v52  ;;  %v846_v52 = vrot.slane %v1760_v41, 1 }
  0x35   : > { %v667_v13 = vsel %vm281_vm3, %v662_v7, %v666_v8 }
  0x39   : > { %1343 = vmatmul.msk.bf16.gmra.mxu0 %vm318_vm4, %v309_v12  ;;  %v980_v12 = vshll.u32 %v1418_v6, 16 }
  0x3a   : > { %1355 = vmatmul.msk.bf16.vlgmr.msrb.gmra.mxu2 %vm445_vm2, %v510_v14  ;;  %v634_v14 = vunpack.c.l.b16 %v614_v17  ;;  %v1422_v17 = vld [vmem:[%s1645_s16 + $0x10] sm:$0xff] }
  0x3b   : > { %913 = vmatpush.bf16.msrb.mxu2 %v904_v36  ;;  %v982_v23 = vrot.slane %v980_v12, 1  ;;  %v670_v36 = vor.u32 %v668_v2, %v666_v8 }
  0x3d   : > { %1346 = vmatmul.msk.bf16.gmra.mxu1 %vm318_vm4, %v1651_v15  ;;  %v983_v27 = vor.u32 %v982_v23, %v978_v22 }
  0x3f   : > { %v988_v35 = vsel %vm281_vm3, %v983_v27, %v987_v28  ;;  %v1108_v27 = vld [vmem:[%s1645_s16 + $0x18] sm:$0x1] }
  0x40   : > { %v1120_v18 = vunpack.c.l.b16 %v1108_v27 }
  0x43   : > { %1359 = vmatmul.msk.bf16.gmra.mxu3 %vm318_vm4, %v1508_v26  ;;  %v639_v26 = vpack.c.b16 %v634_v14, %v634_v14  ;;  %v1132_v14 = vshll.u32 %v1422_v17, 16 }
  0x45   : > { %v672_v31 = vshll.u32 %v639_v26, 16  ;;  %v1134_v26 = vrot.slane %v1132_v14, 1 }
  0x47   : > { %v1135_v29 = vsel %vm281_vm3, %v1701_v57, %v1134_v26 }
  0x49   : > { %1363 = vmatmul.msk.bf16.vlgmr.msrb.gmra.mxu0 %vm318_vm4, %v651_v37  ;;  %v674_v37 = vrot.slane %v672_v31, 1 }
  0x4a   : > { %1356 = vmatmul.msk.bf16.gmra.mxu2 %vm445_vm2, %v512_v38  ;;  %1203 = vmatpush.bf16.msrb.mxu0 %v1194_v33  ;;  %v1420_v38 = vld [vmem:[%s1640_s13 + $0x18] sm:$0xff] }
  0x4b   : > { %v675_v39 = vsel %vm281_vm3, %v670_v36, %v674_v37  ;;  %v993_v42 = vshll.u32 %v1420_v38, 16  ;;  %v997_v53 = vshrl.u32 %v1420_v38, 16  ;;  %v1123_v36 = vpack.c.b16 %v1120_v18, %v1120_v18 }
  0x4d   : > { %1347 = vmatmul.msk.bf16.gmra.mxu1 %vm318_vm4, %v1688_v47  ;;  %v995_v46 = vrot.slane %v993_v42, 1  ;;  %v1185_v38 = vrot.slane %v1123_v36, 1  ;;  %v1140_v40 = vshll.u32 %v1123_v36, 16 }
  0x4f   : > { %v996_v49 = vsel %vm281_vm3, %v991_v45, %v995_v46  ;;  %v999_v56 = vor.u32 %v997_v53, %v995_v46 }
  0x53   : > { %1360 = vmatmul.msk.bf16.gmra.mxu3 %vm318_vm4, %v1510_v48  ;;  %v843_v48 = vunpack.c.l.b16 %v839_v44 }
  0x55   : > { %v844_v50 = vpack.c.b16 %v1741_v30, %v843_v48  ;;  %v951_v30 = vld [vmem:[%s1640_s13 + $0x28] sm:$0x1]  ;;  %v1142_v48 = vrot.slane %v1140_v40, 1 }
  0x56   : > { %v971_v41 = vunpack.c.l.b16 %v951_v30 }
  0x57   : > { %v845_v51 = vrot.slane %v844_v50, 1 }
  0x59   : > { %1364 = vmatmul.msk.bf16.gmra.mxu0 %vm318_vm4, %v659_v59  ;;  %v1004_v59 = vsel %vm281_vm3, %v999_v56, %v1003_v58 }
  0x5a   : > { %1371 = vmatmul.msk.bf16.vlgmr.msra.gmra.mxu2 %vm445_vm2, %v798_v60  ;;  %v976_v60 = vpack.c.b16 %v971_v41, %v971_v41 }
  0x5c   : > { %v1009_v0 = vshll.u32 %v976_v60, 16 }
  0x5d   : > { %1348 = vmatmul.msk.bf16.gmra.mxu1 %vm318_vm4, %v1654_v16 }
  0x5e   : > { %v1011_v7 = vrot.slane %v1009_v0, 1 }
  0x63   : > { %1361 = vmatmul.msk.bf16.gmra.mxu3 %vm318_vm4, %v1512_v3  ;;  %v849_v3 = vsel %vm507_vm5, %v846_v52, %v848_v62 }
  0x69   : > { %1365 = vmatmul.msk.bf16.gmra.mxu0 %vm318_vm4, %v667_v13  ;;  %v1183_v13 = vrot.slane %v1422_v17, 1 }
  0x6a   : > { %1372 = vmatmul.msk.bf16.gmra.mxu2 %vm445_vm2, %v806_v21 }
  0x6b   : > { %v1186_v57 = vsel %vm507_vm5, %v1183_v13, %v1185_v38 }
  0x6d   : > { %1368 = vmatmul.msk.bf16.vlgmr.msra.gmra.mxu1 %vm445_vm2, %v733_v25 }
  0x6e   : > { %1160 = vmatpush.bf16.msra.mxu1 %v1151_v32 }
  0x73   : > { %1398 = vmatmul.msk.bf16.vlgmr.msra.gmra.mxu3 %vm318_vm4, %v988_v35 }
  0x79   : > { %1366 = vmatmul.msk.bf16.gmra.mxu0 %vm318_vm4, %v675_v39  ;;  %v1136_v39 = vshrl.u32 %v1422_v17, 16 }
  0x7a   : > { %1377 = vmatmul.msk.bf16.vlgmr.msrb.gmra.mxu2 %vm318_vm4, %v1651_v15  ;;  %v847_v15 = vsel %vm507_vm5, %v845_v51, %v846_v52 }
  0x7b   : > { %v1138_v46 = vor.u32 %v1136_v39, %v1134_v26 }
  0x7d   : > { %1369 = vmatmul.msk.bf16.gmra.mxu1 %vm445_vm2, %v1527_v43 }
  0x83   : > { %1399 = vmatmul.msk.bf16.gmra.mxu3 %vm318_vm4, %v996_v49 }
  0x89   : > { %1403 = vmatmul.msk.bf16.vlgmr.msra.gmra.mxu0 %vm445_vm2, %v1663_v19 }
  0x8a   : > { %1378 = vmatmul.msk.bf16.gmra.mxu2 %vm318_vm4, %v1688_v47  ;;  %v1005_v47 = vshrl.u32 %v1421_v20, 16  ;;  %v1143_v20 = vsel %vm281_vm3, %v1138_v46, %v1142_v48 }
  0x8c   : > { %v1007_v6 = vor.u32 %v1005_v47, %v1003_v58 }
  0x8d   : > { %1374 = vmatmul.msk.bf16.vlgmr.msrb.gmra.mxu1 %vm445_vm2, %v847_v15 }
  0x8e   : > { %v1012_v11 = vsel %vm281_vm3, %v1007_v6, %v1011_v7 }
  0x93   : > { %1400 = vmatmul.msk.bf16.gmra.mxu3 %vm318_vm4, %v1004_v59 }
  0x96   : > { %v491_v61 = vpop.f32.mrf.mxu3  ;;  %v344_v19 = vpop.f32.mrf.mxu0 }
  0x99   : > { %1404 = vmatmul.msk.bf16.gmra.mxu0 %vm445_vm2, %v1749_v34  ;;  %v1503_v34 = vor.u32 %v1502_v5, %v1501_v4 }
  0x9a   : > { %v1835_v1 = vpop.f32.mrf.mxu1  ;;  %1379 = vmatmul.msk.bf16.gmra.mxu2 %vm318_vm4, %v1654_v16 }
  0x9b   : > { %v1182_v16 = vrot.slane %v1503_v34, 1 }
  0x9d   : > { %1375 = vmatmul.msk.bf16.gmra.mxu1 %vm445_vm2, %v849_v3  ;;  %v465_v63 = vpop.f32.mrf.mxu2  ;;  %v1184_v25 = vsel %vm507_vm5, %v1182_v16, %v1183_v13 }
  0x9e   : > { %v492_v8 = vadd.f32 %v491_v61, %v465_v63  ;;  %v493_v9 = vpop.f32.mrf.mxu3  ;;  %v346_v10 = vpop.f32.mrf.mxu0 }
  0xa2   : > { %v1845_v12 = vpop.f32.mrf.mxu1 }
  0xa3   : > { %1401 = vmatmul.msk.bf16.gmra.mxu3 %vm318_vm4, %v1012_v11 }
  0xa5   : > { %v467_v21 = vpop.f32.mrf.mxu2 }
  0xa6   : > { %v494_v22 = vadd.f32 %v493_v9, %v467_v21  ;;  %v496_v23 = vpop.f32.mrf.mxu3  ;;  %v349_v24 = vpop.f32.mrf.mxu0 }
  0xa9   : > { %1413 = vmatmul.msk.bf16.vlgmr.msrb.gmra.mxu0 %vm445_vm2, %v1184_v25 }
  0xaa   : > { %v384_v28 = vpop.f32.mrf.mxu1  ;;  %1380 = vmatmul.msk.bf16.gmra.mxu2 %vm318_vm4, %v1772_v55 }
  0xab   : > { %v385_v2 = vadd.f32 %v384_v28, %v344_v19 }
  0xad   : > { %1410 = vmatmul.msk.bf16.vlgmr.msra.gmra.mxu1 %vm445_vm2, %v1135_v29  ;;  %v470_v31 = vpop.f32.mrf.mxu2 }
  0xae   : > { %v497_v32 = vadd.f32 %v496_v23, %v470_v31  ;;  %v498_v33 = vpop.f32.mrf.mxu3  ;;  %v351_v35 = vpop.f32.mrf.mxu0 }
  0xb2   : > { %v386_v37 = vpop.f32.mrf.mxu1 }
  0xb3   : > { %v387_v42 = vadd.f32 %v386_v37, %v346_v10 }
  0xb5   : > { %v472_v43 = vpop.f32.mrf.mxu2 }
  0xb6   : > { %v499_v44 = vadd.f32 %v498_v33, %v472_v43  ;;  %v578_v55 = vpop.f32.mrf.mxu3  ;;  %v354_v45 = vpop.f32.mrf.mxu0 }
  0xb7   : > { %v598_v49 = vadd.f32 %v578_v55, %v385_v2 }
  0xb9   : > { %1414 = vmatmul.msk.bf16.gmra.mxu0 %vm445_vm2, %v1186_v57 }
  0xba   : > { %v389_v50 = vpop.f32.mrf.mxu1 }
  0xbb   : > { %v390_v51 = vadd.f32 %v389_v50, %v349_v24 }
  0xbd   : > { %1411 = vmatmul.msk.bf16.gmra.mxu1 %vm445_vm2, %v1143_v20  ;;  %v531_v52 = vpop.f32.mrf.mxu2 }
  0xbe   : > { %v1860_v53 = vadd.f32 %v531_v52, %v492_v8  ;;  %v580_v54 = vpop.f32.mrf.mxu3  ;;  %v356_v15 = vpop.f32.mrf.mxu0 }
  0xbf   : > { %v599_v56 = vadd.f32 %v580_v54, %v387_v42 }
  0xc2   : > { %v391_v58 = vpop.f32.mrf.mxu1 }
  0xc3   : > { %v392_v30 = vadd.f32 %v391_v58, %v351_v35 }
  0xc5   : > { %v533_v59 = vpop.f32.mrf.mxu2 }
  0xc6   : > { %v1862_v41 = vadd.f32 %v533_v59, %v494_v22  ;;  %v583_v60 = vpop.f32.mrf.mxu3  ;;  %v700_v61 = vpop.f32.mrf.mxu0 }
  0xc7   : > { %v600_v19 = vadd.f32 %v583_v60, %v390_v51  ;;  %v1864_v62 = vadd.f32 %v700_v61, %v598_v49 }
  0xca   : > { %v394_v47 = vpop.f32.mrf.mxu1 }
  0xcb   : > { %v395_v0 = vadd.f32 %v394_v47, %v354_v45 }
  0xcd   : > { %v536_v3 = vpop.f32.mrf.mxu2 }
  0xce   : > { %v1866_v4 = vadd.f32 %v536_v3, %v497_v32  ;;  %v585_v5 = vpop.f32.mrf.mxu3  ;;  %v702_v6 = vpop.f32.mrf.mxu0 }
  0xcf   : > { %v601_v7 = vadd.f32 %v585_v5, %v392_v30  ;;  %v721_v63 = vadd.f32 %v702_v6, %v599_v56 }
  0xd2   : > { %v396_v8 = vpop.f32.mrf.mxu1 }
  0xd3   : > { %v397_v9 = vadd.f32 %v396_v8, %v356_v15 }
  0xd5   : > { %v538_v10 = vpop.f32.mrf.mxu2 }
  0xd6   : > { %v1868_v17 = vadd.f32 %v538_v10, %v499_v44  ;;  %v588_v34 = vpop.f32.mrf.mxu3  ;;  %v705_v11 = vpop.f32.mrf.mxu0 }
  0xd7   : > { %v602_v16 = vadd.f32 %v588_v34, %v395_v0  ;;  %v1870_v13 = vadd.f32 %v705_v11, %v600_v19 }
  0xda   : > { %v399_v14 = vpop.f32.mrf.mxu1 }
  0xdb   : > { %v400_v21 = vadd.f32 %v399_v14, %v1835_v1 }
  0xdd   : > { %v825_v22 = vpop.f32.mrf.mxu2 }
  0xde   : > { %v590_v23 = vpop.f32.mrf.mxu3  ;;  %v707_v24 = vpop.f32.mrf.mxu0 }
  0xdf   : > { %v603_v25 = vadd.f32 %v590_v23, %v397_v9  ;;  %v723_v26 = vadd.f32 %v707_v24, %v601_v7 }
  0xe2   : > { %v401_v27 = vpop.f32.mrf.mxu1 }
  0xe3   : > { %v1874_v28 = vadd.f32 %v401_v27, %v1845_v12 }
  0xe5   : > { %v827_v29 = vpop.f32.mrf.mxu2 }
  0xe6   : > { %v593_v18 = vpop.f32.mrf.mxu3  ;;  %v710_v2 = vpop.f32.mrf.mxu0 }
  0xe7   : > { %v604_v31 = vadd.f32 %v593_v18, %v400_v21  ;;  %v1876_v32 = vadd.f32 %v710_v2, %v602_v16 }
  0xea   : > { %v753_v33 = vpop.f32.mrf.mxu1 }
  0xeb   : > { %v763_v59 = vadd.f32 %v753_v33, %v1860_v53 }
  0xed   : > { %v830_v35 = vpop.f32.mrf.mxu2  ;;  %v835_v19 = vadd.f32 %v825_v22, %v763_v59  ;;  %v1896_v22 = vld [vmem:[%s1946_s4] ss:$0 sm:$0xff] }
  0xee   : > { %v712_v36 = vpop.f32.mrf.mxu0  ;;  %v1880_v38 = vpop.f32.mrf.mxu3 }
  0xef   : > { %v1878_v37 = vadd.f32 %v712_v36, %v603_v25 }
  0xf2   : > { %v755_v1 = vpop.f32.mrf.mxu1 }
  0xf3   : > { %v764_v5 = vadd.f32 %v755_v1, %v1862_v41 }
  0xf5   : > { %v1882_v39 = vpop.f32.mrf.mxu2  ;;  %v836_v34 = vadd.f32 %v827_v29, %v764_v5 }
  0xf6   : > { %v715_v40 = vpop.f32.mrf.mxu0  ;;  %v1037_v43 = vpop.f32.mrf.mxu3 }
  0xf7   : > { %v1884_v42 = vadd.f32 %v715_v40, %v604_v31 }
  0xfa   : > { %v758_v12 = vpop.f32.mrf.mxu1 }
  0xfb   : > { %v765_v41 = vadd.f32 %v758_v12, %v1866_v4 }
  0xfd   : > { %v915_v44 = vpop.f32.mrf.mxu2  ;;  %v837_v33 = vadd.f32 %v830_v35, %v765_v41 }
  0xfe   : > { %v1886_v55 = vpop.f32.mrf.mxu0  ;;  %v1039_v46 = vpop.f32.mrf.mxu3  ;;  %v935_v6 = vadd.f32 %v915_v44, %v1864_v62 }
 0x100   : > { %v1057_v16 = vadd.f32 %v1037_v43, %v935_v6 }
 0x102   : > { %v760_v45 = vpop.f32.mrf.mxu1 }
 0x103   : > { %v766_v35 = vadd.f32 %v760_v45, %v1868_v17 }
 0x105   : > { %v917_v57 = vpop.f32.mrf.mxu2 }
 0x106   : > { %v1090_v48 = vpop.f32.mrf.mxu0  ;;  %v1042_v51 = vpop.f32.mrf.mxu3  ;;  %v936_v7 = vadd.f32 %v917_v57, %v721_v63 }
 0x108   : > { %v1058_v14 = vadd.f32 %v1039_v46, %v936_v7 }
 0x10a   : > { %v868_v49 = vpop.f32.mrf.mxu1 }
 0x10b   : > { %v878_v0 = vadd.f32 %v868_v49, %v835_v19 }
 0x10d   : > { %v920_v50 = vpop.f32.mrf.mxu2  ;;  %v1100_v8 = vadd.f32 %v1090_v48, %v878_v0 }
 0x10e   : > { %v1092_v20 = vpop.f32.mrf.mxu0  ;;  %v1044_v56 = vpop.f32.mrf.mxu3  ;;  %v937_v24 = vadd.f32 %v920_v50, %v1870_v13 }
 0x110   : > { %v1059_v43 = vadd.f32 %v1042_v51, %v937_v24 }
 0x112   : > { %v870_v52 = vpop.f32.mrf.mxu1 }
 0x113   : > { %v879_v53 = vadd.f32 %v870_v52, %v836_v34 }
 0x115   : > { %v922_v54 = vpop.f32.mrf.mxu2  ;;  %v1101_v2 = vadd.f32 %v1092_v20, %v879_v53 }
 0x116   : > { %v1095_v15 = vpop.f32.mrf.mxu0  ;;  %v1047_v47 = vpop.f32.mrf.mxu3  ;;  %v938_v25 = vadd.f32 %v922_v54, %v723_v26 }
 0x118   : > { %v1060_v44 = vadd.f32 %v1044_v56, %v938_v25  ;;  %v838_v56 = vadd.f32 %v1882_v39, %v766_v35 }
 0x11a   : > { %v873_v58 = vpop.f32.mrf.mxu1 }
 0x11b   : > { %v880_v13 = vadd.f32 %v873_v58, %v837_v33 }
 0x11d   : > { %v925_v60 = vpop.f32.mrf.mxu2  ;;  %v1102_v54 = vadd.f32 %v1095_v15, %v880_v13 }
 0x11e   : > { %v1888_v30 = vpop.f32.mrf.mxu0  ;;  %v1049_v23 = vpop.f32.mrf.mxu3  ;;  %v939_v49 = vadd.f32 %v925_v60, %v1876_v32  ;;  %v605_v32 = vadd.f32 %v1880_v38, %v1874_v28 }
 0x120   : > { %v1061_v60 = vadd.f32 %v1047_v47, %v939_v49  ;;  %v727_v15 = vadd.f32 %v1886_v55, %v605_v32 }
 0x122   : > { %v875_v61 = vpop.f32.mrf.mxu1 }
 0x123   : > { %v881_v0 = vadd.f32 %v875_v61, %v838_v56 }
 0x125   : > { %v927_v9 = vpop.f32.mrf.mxu2  ;;  %v1103_v61 = vadd.f32 %v1888_v30, %v881_v0 }
 0x126   : > { %v1205_v3 = vpop.f32.mrf.mxu0  ;;  %v1052_v50 = vpop.f32.mrf.mxu3  ;;  %v940_v20 = vadd.f32 %v927_v9, %v1878_v37 }
 0x128   : > { %v1062_v37 = vadd.f32 %v1049_v23, %v940_v20 }
 0x12a   : > { %v1162_v10 = vpop.f32.mrf.mxu1 }
 0x12b   : > { %v1172_v11 = vadd.f32 %v1162_v10, %v1100_v8 }
 0x12d   : > { %v1215_v21 = vadd.f32 %v1205_v3, %v1172_v11  ;;  %v930_v4 = vpop.f32.mrf.mxu2 }
 0x12e   : > { %v1207_v27 = vpop.f32.mrf.mxu0  ;;  %v941_v9 = vadd.f32 %v930_v4, %v1884_v42  ;;  %v1054_v47 = vpop.f32.mrf.mxu3 }
 0x12f   : > { %v1219_v62 = vadd.f32 %v1215_v21, %v1057_v16  ;;  %v1220_v63 = vadd.f32 %v1215_v21, %v1058_v14 }
 0x130   : > { %v1063_v14 = vadd.f32 %v1052_v50, %v941_v9 }
 0x131   : > { %v1231_v29 = vadd.f32 %v1896_v22, %v1219_v62  ;;  %v1232_v18 = vadd.f32 %v1896_v22, %v1220_v63 }
 0x132   : > { %v1164_v31 = vpop.f32.mrf.mxu1 }
 0x133   : > { %v1239_v36 = vmax.f32 %v1231_v29, 0.0  ;;  %v1240_v1 = vmax.f32 %v1232_v18, 0.0  ;;  %v1173_v40 = vadd.f32 %v1164_v31, %v1101_v2 }
 0x135   : > { %v1247_v26 = vpack.c.bf16 %v1239_v36, %v1239_v36  ;;  %v1248_v12 = vpack.c.bf16 %v1240_v1, %v1240_v1  ;;  %v1216_v57 = vadd.f32 %v1207_v27, %v1173_v40  ;;  %v932_v7 = vpop.f32.mrf.mxu2 }
 0x136   : > { %v1210_v17 = vpop.f32.mrf.mxu0  ;;  %v942_v10 = vadd.f32 %v932_v7, %v727_v15 }
 0x137   : > { %1256 = vst.msk [vmem:[%s1906_s15] sm:$0xf] %vm1255_vm6, %v1247_v26  ;;  %v1221_v46 = vadd.f32 %v1216_v57, %v1059_v43  ;;  %v1222_v48 = vadd.f32 %v1216_v57, %v1060_v44 }
 0x138   : > { %1257 = vst.msk [vmem:[%s1906_s15 + $0x4] sm:$0xf] %vm1255_vm6, %v1248_v12  ;;  %v1064_v42 = vadd.f32 %v1054_v47, %v942_v10 }
 0x139   : > { %v1233_v51 = vadd.f32 %v1896_v22, %v1221_v46  ;;  %v1234_v52 = vadd.f32 %v1896_v22, %v1222_v48 }
 0x13a   : > { %v1167_v45 = vpop.f32.mrf.mxu1 }
 0x13b   : > { %v1241_v58 = vmax.f32 %v1233_v51, 0.0  ;;  %v1242_v59 = vmax.f32 %v1234_v52, 0.0  ;;  %v1174_v19 = vadd.f32 %v1167_v45, %v1102_v54 }
 0x13d   : > { %v1249_v3 = vpack.c.bf16 %v1241_v58, %v1241_v58  ;;  %v1250_v5 = vpack.c.bf16 %v1242_v59, %v1242_v59  ;;  %v1217_v6 = vadd.f32 %v1210_v17, %v1174_v19 }
 0x13e   : > { %v1212_v53 = vpop.f32.mrf.mxu0 }
 0x13f   : > { %1258 = vst.msk [vmem:[%s1906_s15 + $0x8] sm:$0xf] %vm1255_vm6, %v1249_v3  ;;  %v1223_v39 = vadd.f32 %v1217_v6, %v1061_v60  ;;  %v1224_v8 = vadd.f32 %v1217_v6, %v1062_v37 }
 0x140   : > { %1259 = vst.msk [vmem:[%s1906_s15 + $0xc] sm:$0xf] %vm1255_vm6, %v1250_v5 }
 0x141   : > { %v1235_v28 = vadd.f32 %v1896_v22, %v1223_v39  ;;  %v1236_v38 = vadd.f32 %v1896_v22, %v1224_v8 }
 0x142   : > { %v1169_v34 = vpop.f32.mrf.mxu1 }
 0x143   : > { %v1243_v55 = vmax.f32 %v1235_v28, 0.0  ;;  %v1244_v11 = vmax.f32 %v1236_v38, 0.0  ;;  %v1175_v16 = vadd.f32 %v1169_v34, %v1103_v61 }
 0x145   : > { %v1251_v21 = vpack.c.bf16 %v1243_v55, %v1243_v55  ;;  %v1252_v23 = vpack.c.bf16 %v1244_v11, %v1244_v11  ;;  %v1218_v41 = vadd.f32 %v1212_v53, %v1175_v16 }
 0x147   : > { %1260 = vst.msk [vmem:[%s1906_s15 + $0x10] sm:$0xf] %vm1255_vm6, %v1251_v21  ;;  %v1225_v62 = vadd.f32 %v1218_v41, %v1063_v14  ;;  %v1226_v63 = vadd.f32 %v1218_v41, %v1064_v42 }
 0x148   : > { %1261 = vst.msk [vmem:[%s1906_s15 + $0x14] sm:$0xf] %vm1255_vm6, %v1252_v23 }
 0x149   : > { %v1237_v30 = vadd.f32 %v1896_v22, %v1225_v62  ;;  %v1238_v24 = vadd.f32 %v1896_v22, %v1226_v63 }
 0x14b   : > { %v1245_v25 = vmax.f32 %v1237_v30, 0.0  ;;  %v1246_v27 = vmax.f32 %v1238_v24, 0.0 }
 0x14d   : > { %v1253_v29 = vpack.c.bf16 %v1245_v25, %v1245_v25  ;;  %v1254_v18 = vpack.c.bf16 %v1246_v27, %v1246_v27 }
 0x14f   : > { %1262 = vst.msk [vmem:[%s1906_s15 + $0x18] sm:$0xf] %vm1255_vm6, %v1253_v29 }
 0x150   : > { %1263 = vst.msk [vmem:[%s1906_s15 + $0x1c] sm:$0xf] %vm1255_vm6, %v1254_v18 }
 0x151 PF: > { %s15_s18 = sadd.s32 1, %s1565_s18  }
 0x152   : > { %p12_p4 = scmp.ge.s32.totalorder %s15_s18, 4  }
 0x154   :  { %14 = sbr.rel (!%p12_p4) target bundleno = 1 (0x1), region = 86 }

// kernel: down_forward.12
= control target key start
LH: loop header
LB: loop body
LE: loop exit
PB: predicated region body
PF: predicated region fallthrough
CT: control target
= control target key end

     0   :  { %s580_s12 = smov 0   ;;  %s639_s0 = inlined_call_operand.vmem [shape: bf16[2,21,16], index: 0, kind: input, shape index: {}]   ;;  %s640_s1 = inlined_call_operand.vmem [shape: bf16[6,16,16], index: 1, kind: input, shape index: {}]   ;;  %s641_s2 = inlined_call_operand.vmem [shape: f32[1,16], index: 2, kind: input, shape index: {}]   ;;  %s642_s3 = inlined_call_operand.vmem [shape: bf16[2,12,16], index: 3, kind: output, shape index: {}]  }
   0x1 LB: > { %s480_s13 = sadd.s32 4294967295, %s558_s12   ;;  %p484_p0 = scmp.ge.s32.totalorder %s558_s12, 1  ;;  %s558_s12 = sphi %s580_s12, %s13_s12  }
   0x2   : > { %p137_p1 = scmp.lt.s32.totalorder %s558_s12, 3 }
   0x4   : > { %p138_p2 = pnand %p484_p0, %p137_p1 }
   0x5   : > { %p161_p3 = scmp.lt.s32.totalorder (!%p138_p2), %s480_s13, 1 }
   0x6   : > { %141 = sbr.rel (%p138_p2) target bundleno = 189 (0xbd), region = 32 }
   0xb   : > { %v535_v0 = vld [vmem:[%s640_s1] sm:$0xff]  ;;  %v536_v1 = vld [vmem:[%s640_s1 + $0x8] sm:$0xff]  ;;  %v537_v2 = vld [vmem:[%s640_s1 + $0x10] sm:$0xff]  ;;  %s644_s13 = smov (!%p161_p3, %s480_s13), 1  ;;  %vm198_vm0 = vcmask 130048   ;;  %vm332_vm2 = vcmask 1044480  }
   0xc   : > { %v538_v3 = vld [vmem:[%s640_s1 + $0x18] sm:$0xff]  ;;  %v540_v4 = vld [vmem:[%s640_s1 + $0x20] sm:$0xff]  ;;  %v541_v5 = vld [vmem:[%s640_s1 + $0x28] sm:$0xff]  ;;  %235 = vmatpush.bf16.msra.mxu1 %v535_v0  ;;  %209 = vmatpush.bf16.msra.mxu0 %v536_v1  ;;  %s542_s26 = smul.u32 12, %s644_s13  ;;  %vm368_vm1 = vsmask.f32 4352 }
   0xd   : > { %276 = vmatpush.bf16.msra.mxu2 %v537_v2  ;;  %309 = vmatpush.bf16.msra.mxu3 %v538_v3  ;;  %s534_s5 = sshll.u32 %s644_s13, 3  ;;  %vm421_vm3 = vcmask 125952   ;;  %vm423_vm4 = vcmask 123904  }
   0xe   : > { %s612_s29 = scalar_lea.vmem %s639_s0, %s542_s26  ;;  %s170_s8 = scalar_lea.vmem %s642_s3, %s534_s5 }
   0xf   : > { %v172_v6 = vld [vmem:[%s612_s29] sm:$0xff]   ;;  %v361_v19 = vld [vmem:[%s612_s29 + $0x8] sm:$0x3] }
  0x10   : > { %352 = vmatpush.bf16.msrb.mxu0 %v540_v4  ;;  %402 = vmatpush.bf16.msrb.mxu1 %v541_v5  ;;  %v173_v7 = vld [vmem:[%s612_s29 + $0x4] sm:$0x3]  ;;  %v182_v9 = vunpack.c.l.b16 %v172_v6  ;;  %v242_v12 = vld [vmem:[%s612_s29] sm:$0xe]  ;;  %v250_v13 = vunpack.c.h.b16 %v172_v6  ;;  %v366_v23 = vunpack.c.l.b16 %v361_v19  ;;  %v320_v41 = vld [vmem:[%s612_s29 + $0x8] sm:$0x1] }
  0x11   : > { %v176_v8 = vld [vmem:[%s612_s29 + $0x4] sm:$0x7]  ;;  %v217_v10 = vunpack.c.l.b16 %v173_v7  ;;  %v285_v14 = vld [vmem:[%s612_s29] sm:$0xc]  ;;  %v249_v16 = vunpack.c.l.b16 %v242_v12  ;;  %v329_v46 = vunpack.c.l.b16 %v320_v41  ;;  %v551_v4 = vld [vmem:[%s641_s2] ss:$0 sm:$0xff] }
  0x12   : > { %v183_v11 = vunpack.c.l.b16 %v176_v8  ;;  %v518_v15 = vld [vmem:[%s612_s29] sm:$0x8]  ;;  %v290_v17 = vunpack.c.l.b16 %v285_v14  ;;  %v539_v18 = vld [vmem:[%s612_s29] sm:$0xf0]  ;;  %v367_v28 = vpack.c.b16 %v366_v23, %v366_v23 }
  0x13   : > { %v218_v20 = vpack.c.b16 %v217_v10, %v182_v9  ;;  %v519_v22 = vor.u32 %v539_v18, %v518_v15  ;;  %v251_v24 = vpack.c.b16 %v250_v13, %v249_v16  ;;  %v331_v49 = vpack.c.b16 %v329_v46, %v329_v46 }
  0x14   : > { %v184_v21 = vpack.c.b16 %v183_v11, %v182_v9  ;;  %v291_v25 = vpack.c.b16 %v250_v13, %v290_v17  ;;  %v378_v35 = vshrl.u32 %v367_v28, 16  ;;  %v381_v36 = vshll.u32 %v367_v28, 16 }
  0x15   : > { %499 = vmatmul.msk.bf16.vlgmr.msra.gmra.mxu1 %vm198_vm0, %v218_v20  ;;  %v370_v29 = vshrl.u32 %v519_v22, 16  ;;  %v253_v30 = vshrl.u32 %v251_v24, 16  ;;  %v256_v31 = vshll.u32 %v251_v24, 16  ;;  %v373_v33 = vshll.u32 %v519_v22, 16 }
  0x16   : > { %v186_v26 = vshrl.u32 %v184_v21, 16  ;;  %v188_v27 = vshll.u32 %v184_v21, 16  ;;  %v292_v32 = vrot.slane %v291_v25, 2  ;;  %v380_v44 = vrot.slane %v378_v35, 3 }
  0x17   : > { %v255_v37 = vrot.slane %v253_v30, 1  ;;  %v258_v38 = vrot.slane %v256_v31, 2  ;;  %v372_v40 = vrot.slane %v370_v29, 3  ;;  %v375_v43 = vrot.slane %v373_v33, 4 }
  0x18   : > { %v190_v34 = vrot.slane %v188_v27, 1  ;;  %513 = vmatmul.msk.bf16.vlgmr.msra.gmra.mxu3 %vm198_vm0, %v292_v32  ;;  %v383_v45 = vrot.slane %v381_v36, 4  ;;  %v333_v51 = vrot.slane %v519_v22, 3  ;;  %v334_v52 = vrot.slane %v331_v49, 3 }
  0x19   : > { %v259_v42 = vor.u32 %v258_v38, %v255_v37  ;;  %v376_v47 = vor.u32 %v375_v43, %v372_v40 }
  0x1a   : > { %v191_v39 = vor.u32 %v190_v34, %v186_v26  ;;  %v384_v48 = vor.u32 %v383_v45, %v380_v44  ;;  %v335_v53 = vsel %vm332_vm2, %v333_v51, %v334_v52 }
  0x1b   : > { %506 = vmatmul.msk.bf16.vlgmr.msra.gmra.mxu2 %vm198_vm0, %v259_v42 }
  0x1c   : > { %494 = vmatmul.msk.bf16.vlgmr.msra.gmra.mxu0 %vm198_vm0, %v191_v39  ;;  %v385_v50 = vsel %vm368_vm1, %v376_v47, %v384_v48 }
  0x25   : > { %531 = vmatmul.msk.bf16.vlgmr.msrb.gmra.mxu1 %vm198_vm0, %v385_v50 }
  0x2c   : > { %524 = vmatmul.msk.bf16.vlgmr.msrb.gmra.mxu0 %vm198_vm0, %v335_v53 }
  0x92   : > { %v237_v54 = vpop.f32.mrf.mxu1 }
  0x99   : > { %v211_v55 = vpop.f32.mrf.mxu0 }
  0x9a   : > { %v239_v56 = vpop.f32.mrf.mxu1  ;;  %v238_v59 = vadd.f32 %v237_v54, %v211_v55 }
  0x9b   : > { %v311_v61 = vpop.f32.mrf.mxu3 }
  0x9e   : > { %v278_v57 = vpop.f32.mrf.mxu2 }
  0x9f   : > { %v283_v60 = vadd.f32 %v278_v57, %v238_v59 }
  0xa1   : > { %v213_v58 = vpop.f32.mrf.mxu0  ;;  %v316_v62 = vadd.f32 %v311_v61, %v283_v60 }
  0xa2   : > { %v404_v63 = vpop.f32.mrf.mxu1  ;;  %v240_v2 = vadd.f32 %v239_v56, %v213_v58 }
  0xa3   : > { %v313_v8 = vpop.f32.mrf.mxu3 }
  0xa6   : > { %v280_v0 = vpop.f32.mrf.mxu2 }
  0xa7   : > { %v284_v5 = vadd.f32 %v280_v0, %v240_v2 }
  0xa9   : > { %v354_v1 = vpop.f32.mrf.mxu0  ;;  %v317_v9 = vadd.f32 %v313_v8, %v284_v5 }
  0xaa   : > { %v359_v3 = vadd.f32 %v354_v1, %v316_v62  ;;  %v406_v14 = vpop.f32.mrf.mxu1 }
  0xac   : > { %v409_v6 = vadd.f32 %v404_v63, %v359_v3 }
  0xae   : > { %v415_v7 = vadd.f32 %v551_v4, %v409_v6 }
  0xb0   : > { %v417_v10 = vmax.f32 %v415_v7, 0.0 }
  0xb1   : > { %v356_v11 = vpop.f32.mrf.mxu0 }
  0xb2   : > { %v419_v12 = vpack.c.bf16 %v417_v10, %v417_v10  ;;  %v360_v13 = vadd.f32 %v356_v11, %v317_v9 }
  0xb4   : > { %422 = vst.msk [vmem:[%s170_s8] sm:$0xf] %vm421_vm3, %v419_v12  ;;  %v410_v15 = vadd.f32 %v406_v14, %v360_v13 }
  0xb6   : > { %v416_v16 = vadd.f32 %v551_v4, %v410_v15 }
  0xb8   : > { %v418_v17 = vmax.f32 %v416_v16, 0.0 }
  0xba   : > { %v420_v18 = vpack.c.bf16 %v418_v17, %v418_v17 }
  0xbc   : > { %424 = vst.msk [vmem:[%s170_s8 + $0x4] sm:$0x3] %vm423_vm4, %v420_v18 }
  0xbd PF: > { %s13_s12 = sadd.s32 1, %s558_s12  }
  0xbe   : > { %p10_p4 = scmp.ge.s32.totalorder %s13_s12, 4  }
  0xc0   :  { %12 = sbr.rel (!%p10_p4) target bundleno = 1 (0x1), region = 67 }

// kernel: down_forward.15
= control target key start
LH: loop header
LB: loop body
LE: loop exit
PB: predicated region body
PF: predicated region fallthrough
CT: control target
= control target key end

     0   :  { %s666_s12 = smov 0   ;;  %s743_s0 = inlined_call_operand.vmem [shape: bf16[2,21,32], index: 0, kind: input, shape index: {}]   ;;  %s744_s1 = inlined_call_operand.vmem [shape: bf16[6,32,16], index: 1, kind: input, shape index: {}]   ;;  %s745_s2 = inlined_call_operand.vmem [shape: f32[1,16], index: 2, kind: input, shape index: {}]   ;;  %s746_s3 = inlined_call_operand.vmem [shape: f32[2,12,16], index: 3, kind: output, shape index: {}]  }
   0x1 LB: > { %s526_s13 = sadd.s32 4294967295, %s644_s12   ;;  %p530_p0 = scmp.ge.s32.totalorder %s644_s12, 1  ;;  %s644_s12 = sphi %s666_s12, %s13_s12  }
   0x2   : > { %p137_p1 = scmp.lt.s32.totalorder %s644_s12, 3 }
   0x4   : > { %p138_p2 = pnand %p530_p0, %p137_p1 }
   0x5   : > { %p161_p3 = scmp.lt.s32.totalorder (!%p138_p2), %s526_s13, 1 }
   0x6   : > { %141 = sbr.rel (%p138_p2) target bundleno = 187 (0xbb), region = 32 }
   0xb   : > { %v616_v0 = vld [vmem:[%s744_s1 + $0x8] sm:$0xff]  ;;  %v618_v1 = vld [vmem:[%s744_s1 + $0x18] sm:$0xff]  ;;  %v615_v4 = vld [vmem:[%s744_s1] sm:$0xff]  ;;  %s748_s13 = smov (!%p161_p3, %s526_s13), 1  ;;  %vm208_vm0 = vcmask 261120   ;;  %vm366_vm2 = vcmask 1044480  }
   0xc   : > { %v620_v2 = vld [vmem:[%s744_s1 + $0x28] sm:$0xff]  ;;  %v622_v3 = vld [vmem:[%s744_s1 + $0x38] sm:$0xff]  ;;  %250 = vmatpush.bf16.msra.mxu1 %v616_v0  ;;  %218 = vmatpush.bf16.msra.mxu0 %v618_v1  ;;  %v617_v5 = vld [vmem:[%s744_s1 + $0x10] sm:$0xff]  ;;  %s628_s30 = smul.u32 12, %s748_s13  ;;  %vm410_vm1 = vsmask.f32 4352 }
   0xd   : > { %299 = vmatpush.bf16.msra.mxu2 %v620_v2  ;;  %340 = vmatpush.bf16.msra.mxu3 %v622_v3  ;;  %v619_v6 = vld [vmem:[%s744_s1 + $0x20] sm:$0xff]  ;;  %v621_v7 = vld [vmem:[%s744_s1 + $0x30] sm:$0xff]  ;;  %v625_v8 = vld [vmem:[%s744_s1 + $0x48] sm:$0xff]  ;;  %s614_s19 = sshll.u32 %s748_s13, 4  ;;  %vm467_vm3 = vcmask 130048   ;;  %vm469_vm4 = vcmask 125952  }
   0xe   : > { %v627_v9 = vld [vmem:[%s744_s1 + $0x58] sm:$0xff]  ;;  %s710_s10 = scalar_lea.vmem %s743_s0, %s628_s30  ;;  %v624_v10 = vld [vmem:[%s744_s1 + $0x40] sm:$0xff]  ;;  %v626_v23 = vld [vmem:[%s744_s1 + $0x50] sm:$0xff]  ;;  %s170_s22 = scalar_lea.vmem %s746_s3, %s614_s19 }
   0xf   : > { %v172_v11 = vld [vmem:[%s710_s10] sm:$0xff]   ;;  %v401_v25 = vld [vmem:[%s710_s10 + $0x8] sm:$0x3] }
  0x10   : > { %251 = vmatpush.bf16.msra.mxu1 %v615_v4  ;;  %219 = vmatpush.bf16.msra.mxu0 %v617_v5  ;;  %v173_v12 = vld [vmem:[%s710_s10 + $0x4] sm:$0x3]  ;;  %v186_v14 = vunpack.c.l.b16 %v172_v11  ;;  %v258_v17 = vld [vmem:[%s710_s10] sm:$0xe]  ;;  %v268_v18 = vunpack.c.h.b16 %v172_v11  ;;  %v408_v29 = vunpack.c.l.b16 %v401_v25  ;;  %v352_v47 = vld [vmem:[%s710_s10 + $0x8] sm:$0x1] }
  0x11   : > { %300 = vmatpush.bf16.msra.mxu2 %v619_v6  ;;  %341 = vmatpush.bf16.msra.mxu3 %v621_v7  ;;  %v178_v13 = vld [vmem:[%s710_s10 + $0x4] sm:$0x7]  ;;  %v227_v15 = vunpack.c.l.b16 %v173_v12  ;;  %v309_v19 = vld [vmem:[%s710_s10] sm:$0xc]  ;;  %v267_v21 = vunpack.c.l.b16 %v258_v17  ;;  %v363_v52 = vunpack.c.l.b16 %v352_v47 }
  0x12   : > { %v187_v16 = vunpack.c.l.b16 %v178_v13  ;;  %v588_v20 = vld [vmem:[%s710_s10] sm:$0x8]  ;;  %v316_v22 = vunpack.c.l.b16 %v309_v19  ;;  %v623_v24 = vld [vmem:[%s710_s10] sm:$0xf0]  ;;  %v409_v34 = vpack.c.b16 %v408_v29, %v408_v29 }
  0x13   : > { %v228_v26 = vpack.c.b16 %v227_v15, %v186_v14  ;;  %v589_v28 = vor.u32 %v623_v24, %v588_v20  ;;  %v269_v30 = vpack.c.b16 %v268_v18, %v267_v21  ;;  %v365_v55 = vpack.c.b16 %v363_v52, %v363_v52 }
  0x14   : > { %391 = vmatpush.bf16.msrb.mxu0 %v625_v8  ;;  %449 = vmatpush.bf16.msrb.mxu1 %v627_v9  ;;  %v188_v27 = vpack.c.b16 %v187_v16, %v186_v14  ;;  %v317_v31 = vpack.c.b16 %v268_v18, %v316_v22  ;;  %v420_v41 = vshrl.u32 %v409_v34, 16  ;;  %v423_v42 = vshll.u32 %v409_v34, 16 }
  0x15   : > { %555 = vmatmul.msk.bf16.vlgmr.msra.gmra.mxu1 %vm208_vm0, %v228_v26  ;;  %v412_v35 = vshrl.u32 %v589_v28, 16  ;;  %v271_v36 = vshrl.u32 %v269_v30, 16  ;;  %v274_v37 = vshll.u32 %v269_v30, 16  ;;  %v415_v39 = vshll.u32 %v589_v28, 16 }
  0x16   : > { %v190_v32 = vshrl.u32 %v188_v27, 16  ;;  %v192_v33 = vshll.u32 %v188_v27, 16  ;;  %v318_v38 = vrot.slane %v317_v31, 2  ;;  %v422_v50 = vrot.slane %v420_v41, 3 }
  0x17   : > { %v273_v43 = vrot.slane %v271_v36, 1  ;;  %v276_v44 = vrot.slane %v274_v37, 2  ;;  %v414_v46 = vrot.slane %v412_v35, 3  ;;  %v417_v49 = vrot.slane %v415_v39, 4 }
  0x18   : > { %392 = vmatpush.bf16.msrb.mxu0 %v624_v10  ;;  %450 = vmatpush.bf16.msrb.mxu1 %v626_v23  ;;  %v194_v40 = vrot.slane %v192_v33, 1  ;;  %v425_v51 = vrot.slane %v423_v42, 4  ;;  %v367_v57 = vrot.slane %v589_v28, 3  ;;  %v368_v58 = vrot.slane %v365_v55, 3  ;;  %v637_v10 = vld [vmem:[%s745_s2] ss:$0 sm:$0xff] }
  0x19   : > { %581 = vmatmul.msk.bf16.vlgmr.msra.gmra.mxu3 %vm208_vm0, %v318_v38  ;;  %v277_v48 = vor.u32 %v276_v44, %v273_v43  ;;  %v418_v53 = vor.u32 %v417_v49, %v414_v46 }
  0x1a   : > { %v195_v45 = vor.u32 %v194_v40, %v190_v32  ;;  %v426_v54 = vor.u32 %v425_v51, %v422_v50  ;;  %v369_v59 = vsel %vm366_vm2, %v367_v57, %v368_v58 }
  0x1b   : > { %568 = vmatmul.msk.bf16.vlgmr.msra.gmra.mxu2 %vm208_vm0, %v277_v48 }
  0x1c   : > { %546 = vmatmul.msk.bf16.vlgmr.msra.gmra.mxu0 %vm208_vm0, %v195_v45  ;;  %v427_v56 = vsel %vm410_vm1, %v418_v53, %v426_v54 }
  0x25   : > { %611 = vmatmul.msk.bf16.vlgmr.msrb.gmra.mxu1 %vm208_vm0, %v427_v56 }
  0x2c   : > { %598 = vmatmul.msk.bf16.vlgmr.msrb.gmra.mxu0 %vm208_vm0, %v369_v59 }
  0x92   : > { %v253_v60 = vpop.f32.mrf.mxu1 }
  0x99   : > { %v221_v61 = vpop.f32.mrf.mxu0 }
  0x9a   : > { %v255_v62 = vpop.f32.mrf.mxu1  ;;  %v254_v1 = vadd.f32 %v253_v60, %v221_v61 }
  0x9c   : > { %v343_v3 = vpop.f32.mrf.mxu3 }
  0x9e   : > { %v302_v63 = vpop.f32.mrf.mxu2 }
  0x9f   : > { %v307_v2 = vadd.f32 %v302_v63, %v254_v1 }
  0xa1   : > { %v223_v0 = vpop.f32.mrf.mxu0  ;;  %v348_v4 = vadd.f32 %v343_v3, %v307_v2 }
  0xa2   : > { %v452_v5 = vpop.f32.mrf.mxu1  ;;  %v256_v8 = vadd.f32 %v255_v62, %v223_v0 }
  0xa4   : > { %v345_v14 = vpop.f32.mrf.mxu3 }
  0xa6   : > { %v304_v6 = vpop.f32.mrf.mxu2 }
  0xa7   : > { %v308_v11 = vadd.f32 %v304_v6, %v256_v8 }
  0xa9   : > { %v394_v7 = vpop.f32.mrf.mxu0  ;;  %v349_v15 = vadd.f32 %v345_v14, %v308_v11 }
  0xaa   : > { %v399_v9 = vadd.f32 %v394_v7, %v348_v4  ;;  %v454_v19 = vpop.f32.mrf.mxu1 }
  0xac   : > { %v457_v12 = vadd.f32 %v452_v5, %v399_v9 }
  0xae   : > { %v463_v13 = vadd.f32 %v637_v10, %v457_v12 }
  0xb0   : > { %v465_v16 = vmax.f32 %v463_v13, 0.0 }
  0xb1   : > { %v396_v17 = vpop.f32.mrf.mxu0 }
  0xb2   : > { %468 = vst.msk [vmem:[%s170_s22] sm:$0xff] %vm467_vm3, %v465_v16  ;;  %v400_v18 = vadd.f32 %v396_v17, %v349_v15 }
  0xb4   : > { %v458_v20 = vadd.f32 %v454_v19, %v400_v18 }
  0xb6   : > { %v464_v21 = vadd.f32 %v637_v10, %v458_v20 }
  0xb8   : > { %v466_v22 = vmax.f32 %v464_v21, 0.0 }
  0xba   : > { %470 = vst.msk [vmem:[%s170_s22 + $0x8] sm:$0xf] %vm469_vm4, %v466_v22 }
  0xbb PF: > { %s13_s12 = sadd.s32 1, %s644_s12  }
  0xbc   : > { %p10_p4 = scmp.ge.s32.totalorder %s13_s12, 4  }
  0xbe   :  { %12 = sbr.rel (!%p10_p4) target bundleno = 1 (0x1), region = 67 }

// kernel: down_forward.13
= control target key start
LH: loop header
LB: loop body
LE: loop exit
PB: predicated region body
PF: predicated region fallthrough
CT: control target
= control target key end

     0   :  { %s1646_s18 = smov 0   ;;  %s1985_s0 = inlined_call_operand.vmem [shape: bf16[2,88,16], index: 0, kind: input, shape index: {}]   ;;  %s1986_s1 = inlined_call_operand.vmem [shape: bf16[2,56,8], index: 1, kind: input, shape index: {}]   ;;  %s1987_s2 = inlined_call_operand.vmem [shape: bf16[6,16,16], index: 2, kind: input, shape index: {}]   ;;  %s1988_s3 = inlined_call_operand.vmem [shape: bf16[9,8,16], index: 3, kind: input, shape index: {}]   ;;  %s1989_s4 = inlined_call_operand.vmem [shape: f32[1,16], index: 4, kind: input, shape index: {}]   ;;  %s1990_s5 = inlined_call_operand.vmem [shape: f32[2,4,2,8,16], index: 5, kind: output, shape index: {}]  }
   0x1 LB: > { %s1345_s19 = sadd.s32 4294967295, %s1614_s18   ;;  %p1349_p0 = scmp.ge.s32.totalorder %s1614_s18, 1  ;;  %s1614_s18 = sphi %s1646_s18, %s15_s18  }
   0x2   : > { %p197_p1 = scmp.lt.s32.totalorder %s1614_s18, 3 }
   0x4   : > { %p198_p2 = pnand %p1349_p0, %p197_p1 }
   0x5   : > { %p230_p3 = scmp.lt.s32.totalorder (!%p198_p2), %s1345_s19, 1 }
   0x6   : > { %201 = sbr.rel (%p198_p2) target bundleno = 335 (0x14f), region = 40 }
   0xb   : > { %v415_v0 = vld [vmem:[%s1988_s3] sm:$0xf]  ;;  %vm459_vm0 = vcmask 1043456   ;;  %v1462_v1 = vld [vmem:[%s1987_s2 + $0x8] sm:$0xff]  ;;  %v1372_v3 = vld [vmem:[%s1988_s3 + $0x4] sm:$0xf] }
   0xc   : > { %v487_v2 = vsel %vm459_vm0, %v415_v0, 0  ;;  %s1992_s19 = smov (!%p230_p3, %s1345_s19), 1  ;;  %346 = vmatpush.bf16.msra.mxu0 %v1462_v1  ;;  %v461_v4 = vsel %vm459_vm0, %v1372_v3, 0  ;;  %v1461_v5 = vld [vmem:[%s1987_s2] sm:$0xff]  ;;  %v1464_v6 = vld [vmem:[%s1987_s2 + $0x18] sm:$0xff]  ;;  %1577 = vmatpush.bf16.msra.mxu1 %v1462_v1  ;;  %v1463_v9 = vld [vmem:[%s1987_s2 + $0x10] sm:$0xff] }
   0xd   : > { %496 = vmatpush.bf16.msra.mxu3 %v487_v2  ;;  %v1377_v7 = vld [vmem:[%s1988_s3 + $0x8] sm:$0xf]  ;;  %470 = vmatpush.bf16.msra.mxu2 %v461_v4  ;;  %s1583_s9 = smul.u32 44, %s1992_s19  ;;  %vm452_vm1 = vcmask 64512   ;;  %vm283_vm2 = vsmask.f32 7424 }
   0xe   : > { %v527_v8 = vsel %vm459_vm0, %v1377_v7, 0  ;;  %s1584_s10 = smul.u32 28, %s1992_s19  ;;  %vm326_vm3 = vcmask 130048   ;;  %v1400_v40 = vld [vmem:[%s1988_s3 + $0xc] sm:$0xf]  ;;  %vm514_vm4 = vcmask 1046528  }
   0xf   : > { %s1685_s13 = scalar_lea.vmem %s1985_s0, %s1583_s9  ;;  %v757_v45 = vsel %vm459_vm0, %v1400_v40, 0  ;;  %v1403_v55 = vld [vmem:[%s1988_s3 + $0x10] sm:$0xf]  ;;  %v1470_v56 = vld [vmem:[%s1987_s2 + $0x28] sm:$0xff]  ;;  %v1445_v63 = vld [vmem:[%s1988_s3 + $0x18] sm:$0xf] }
  0x10   : > { %389 = vmatpush.bf16.msrb.mxu1 %v1461_v5  ;;  %713 = vmatpush.bf16.msrb.mxu0 %v1464_v6  ;;  %s1690_s16 = scalar_lea.vmem %s1986_s1, %s1584_s10  ;;  %v1693_v10 = vld [vmem:[%s1685_s13] sm:$0xff]   ;;  %v1696_v11 = vld [vmem:[%s1685_s13 + $0x8] sm:$0xff]   ;;  %v1699_v12 = vld [vmem:[%s1685_s13 + $0x18] sm:$0xff]   ;;  %v829_v57 = vsel %vm459_vm0, %v1403_v55, 0  ;;  %v1102_v1 = vsel %vm459_vm0, %v1445_v63, 0  ;;  %s1460_s12 = sshll.u32 %s1992_s19, 6 }
  0x11   : > { %536 = vmatpush.bf16.msrb.mxu2 %v527_v8  ;;  %587 = vmatpush.bf16.msrb.mxu3 %v1463_v9  ;;  %v1702_v13 = vld [vmem:[%s1685_s13 + $0x1c] sm:$0xf]  ;;  %v1705_v14 = vld [vmem:[%s1690_s16] sm:$0xff]   ;;  %v1708_v15 = vld [vmem:[%s1690_s16 + $0x8] sm:$0xff]   ;;  %v285_v17 = vshrl.u32 %v1693_v10, 16  ;;  %v287_v18 = vshll.u32 %v1693_v10, 16  ;;  %s1949_s15 = scalar_lea.vmem %s1990_s5, %s1460_s12 }
  0x12   : > { %v1711_v16 = vld [vmem:[%s1690_s16 + $0xc] sm:$0xf]  ;;  %v292_v19 = vshll.u32 %v1696_v11, 16  ;;  %v308_v20 = vshll.u32 %v1699_v12, 16  ;;  %v433_v21 = vshrl.u32 %v1705_v14, 16  ;;  %v435_v22 = vshll.u32 %v1705_v14, 16  ;;  %1375 = vmatmul.msk.bf16.vlgmr.msra.gmra.mxu3 %vm452_vm1, %v1705_v14 }
  0x13   : > { %v256_v23 = vld [vmem:[%s1685_s13 + $0x20] sm:$0x1]  ;;  %v289_v24 = vrot.slane %v287_v18, 1  ;;  %v440_v26 = vshll.u32 %v1708_v15, 16  ;;  %v416_v28 = vld [vmem:[%s1690_s16 + $0x10] sm:$0x1]  ;;  %v1491_v61 = vunpack.c.h.b16 %v1705_v14 }
  0x14   : > { %v294_v25 = vrot.slane %v292_v19, 1  ;;  %v277_v27 = vunpack.c.l.b16 %v256_v23  ;;  %v437_v29 = vrot.slane %v435_v22, 1  ;;  %v310_v30 = vrot.slane %v308_v20, 1  ;;  %v1733_v43 = vld [vmem:[%s1685_s13 + $0x10] sm:$0xff]   ;;  %v508_v60 = vld [vmem:[%s1690_s16] sm:$0xe] }
  0x15   : > { %v312_v31 = vshrl.u32 %v1699_v12, 16  ;;  %v290_v32 = vor.u32 %v289_v24, %v285_v17  ;;  %v442_v33 = vrot.slane %v440_v26, 1  ;;  %v428_v36 = vunpack.c.l.b16 %v416_v28  ;;  %1058 = vmatpush.bf16.msra.mxu3 %v1470_v56  ;;  %v1555_v2 = vld [vmem:[%s1685_s13 + $0x4] sm:$0xff]   ;;  %v1455_v14 = vld [vmem:[%s1988_s3 + $0x20] sm:$0xf] }
  0x16   : > { %v282_v34 = vpack.c.b16 %v277_v27, %v277_v27  ;;  %v438_v35 = vor.u32 %v437_v29, %v433_v21  ;;  %v296_v47 = vshrl.u32 %v1696_v11, 16  ;;  %v300_v48 = vshll.u32 %v1733_v43, 16  ;;  %v1579_v8 = vld [vmem:[%s1685_s13 + $0x4] sm:$0xff]   ;;  %v1557_v21 = vld [vmem:[%s1685_s13 + $0xc] sm:$0xff]  }
  0x17   : > { %v295_v37 = vsel %vm283_vm2, %v290_v32, %v294_v25  ;;  %v314_v38 = vor.u32 %v312_v31, %v310_v30  ;;  %v1735_v44 = vpack.c.b16 %v428_v36, %v428_v36  ;;  %v444_v49 = vshrl.u32 %v1708_v15, 16  ;;  %v782_v22 = vld [vmem:[%s1690_s16 + $0x4] sm:$0xf]  ;;  %v1793_v29 = vld [vmem:[%s1690_s16 + $0x10] sm:$0xff]  }
  0x18   : > { %v316_v39 = vshll.u32 %v282_v34, 16  ;;  %1360 = vmatmul.msk.bf16.vlgmr.msra.gmra.mxu0 %vm326_vm3, %v295_v37  ;;  %v443_v41 = vsel %vm283_vm2, %v438_v35, %v442_v33  ;;  %v298_v51 = vor.u32 %v296_v47, %v294_v25  ;;  %v302_v52 = vrot.slane %v300_v48, 1  ;;  %v1465_v28 = vld [vmem:[%s1987_s2 + $0x20] sm:$0xff]  ;;  %v1582_v34 = vld [vmem:[%s1685_s13 + $0x14] sm:$0xff]  }
  0x19   : > { %1373 = vmatmul.msk.bf16.vlgmr.msra.gmra.mxu2 %vm452_vm1, %v443_v41  ;;  %v448_v50 = vshll.u32 %v1735_v44, 16  ;;  %v1746_v53 = vor.u32 %v444_v49, %v442_v33  ;;  %v512_v62 = vunpack.c.l.b16 %v508_v60  ;;  %v304_v0 = vshrl.u32 %v1733_v43, 16  ;;  %1111 = vmatpush.bf16.msra.mxu0 %v1102_v1  ;;  %v1406_v37 = vld [vmem:[%s1988_s3 + $0x14] sm:$0xf]  ;;  %v1815_v49 = vld [vmem:[%s1685_s13 + $0x20] sm:$0xff]  }
  0x1a   : > { %v318_v42 = vrot.slane %v316_v39, 1  ;;  %838 = vmatpush.bf16.msra.mxu2 %v829_v57  ;;  %v303_v58 = vsel %vm283_vm2, %v298_v51, %v302_v52  ;;  %v516_v6 = vrot.slane %v1708_v15, 1  ;;  %v655_v17 = vshll.u32 %v1579_v8, 16  ;;  %v1559_v41 = vld [vmem:[%s1685_s13 + $0x14] sm:$0xff]   ;;  %v1561_v60 = vld [vmem:[%s1685_s13 + $0x1c] sm:$0xff] }
  0x1b   : > { %v450_v54 = vrot.slane %v448_v50, 1  ;;  %v513_v3 = vpack.c.b16 %v1491_v61, %v512_v62  ;;  %v306_v4 = vor.u32 %v304_v0, %v302_v52  ;;  %v653_v18 = vshrl.u32 %v1579_v8, 16  ;;  %v1611_v50 = vld [vmem:[%s1685_s13 + $0x1c] sm:$0xf0]   ;;  %v786_v51 = vld [vmem:[%s1690_s16 + $0x14] sm:$0x1] }
  0x1c   : > { %v319_v46 = vsel %vm283_vm2, %v314_v38, %v318_v42  ;;  %v657_v19 = vrot.slane %v655_v17, 1  ;;  %v1785_v25 = vunpack.c.l.b16 %v1708_v15  ;;  %v518_v26 = vrot.slane %v1735_v44, 1  ;;  %v1466_v0 = vld [vmem:[%s1685_s13 + $0x8] sm:$0xff] }
  0x1d   : > { %1363 = vmatmul.msk.bf16.vlgmr.msra.gmra.mxu1 %vm326_vm3, %v319_v46  ;;  %v451_v59 = vsel %vm283_vm2, %v1746_v53, %v450_v54  ;;  %v515_v5 = vrot.slane %v513_v3, 1  ;;  %v311_v7 = vsel %vm283_vm2, %v306_v4, %v310_v30  ;;  %v794_v27 = vunpack.c.l.b16 %v782_v22  ;;  %v1610_v30 = vld [vmem:[%s1690_s16 + $0xc] sm:$0xf0]  }
  0x1e   : > { %766 = vmatpush.bf16.msra.mxu1 %v757_v45  ;;  %v658_v23 = vor.u32 %v657_v19, %v653_v18  ;;  %v519_v32 = vsel %vm514_vm4, %v516_v6, %v518_v26  ;;  %v1803_v35 = vor.u32 %v1610_v30, %v1711_v16  ;;  %v668_v39 = vshll.u32 %v1582_v34, 16 }
  0x1f   : > { %v517_v9 = vsel %vm514_vm4, %v515_v5, %v516_v6  ;;  %v799_v33 = vpack.c.b16 %v1785_v25, %v794_v27  ;;  %v872_v40 = vsel %vm459_vm0, %v1406_v37, 0  ;;  %v798_v55 = vunpack.c.l.b16 %v786_v51  ;;  %v1467_v5 = vld [vmem:[%s1685_s13 + $0x10] sm:$0xff] }
  0x20   : > { %v810_v16 = vshll.u32 %v1803_v35, 16  ;;  %v670_v46 = vrot.slane %v668_v39, 1  ;;  %v1607_v56 = vor.u32 %v1611_v50, %v1702_v13  ;;  %v814_v62 = vshrl.u32 %v1803_v35, 16  ;;  %v625_v13 = vld [vmem:[%s1685_s13 + $0x24] sm:$0x1]  ;;  %v1576_v37 = vld [vmem:[%s1690_s16 + $0xc] sm:$0xff] }
  0x21   : > { %v805_v36 = vshll.u32 %v799_v33, 16  ;;  %v803_v42 = vshrl.u32 %v799_v33, 16  ;;  %v1824_v57 = vpack.c.b16 %v798_v55, %v798_v55  ;;  %v1000_v6 = vshll.u32 %v1466_v0, 16 }
  0x22   : > { %1376 = vmatmul.msk.bf16.gmra.mxu3 %vm452_vm1, %v1708_v15  ;;  %v812_v48 = vrot.slane %v810_v16, 1  ;;  %v646_v8 = vunpack.c.l.b16 %v625_v13  ;;  %v1005_v18 = vshll.u32 %v1467_v5, 16  ;;  %v748_v19 = vpack.c.b16 %v1785_v25, %v1491_v61  ;;  %v1469_v16 = vld [vmem:[%s1685_s13 + $0x20] sm:$0xff]  ;;  %v1471_v13 = vld [vmem:[%s1690_s16 + $0x10] sm:$0xff] }
  0x23   : > { %v807_v44 = vrot.slane %v805_v36, 1  ;;  %v818_v63 = vshll.u32 %v1824_v57, 16  ;;  %v1002_v17 = vrot.slane %v1000_v6, 1  ;;  %v680_v61 = vshrl.u32 %v1607_v56, 16 }
  0x24   : > { %v816_v3 = vor.u32 %v814_v62, %v812_v48  ;;  %v1007_v22 = vrot.slane %v1005_v18, 1  ;;  %v1217_v27 = vsel %vm459_vm0, %v1455_v14, 0  ;;  %v1550_v62 = vld [vmem:[%s1690_s16 + $0x8] sm:$0xf0] }
  0x25   : > { %v808_v47 = vor.u32 %v807_v44, %v803_v42  ;;  %v820_v4 = vrot.slane %v818_v63, 1  ;;  %v1551_v63 = vld [vmem:[%s1690_s16 + $0x8] sm:$0xe] }
  0x27   : > { %v813_v54 = vsel %vm283_vm2, %v808_v47, %v812_v48  ;;  %v1021_v48 = vshll.u32 %v1469_v16, 16 }
  0x28   : > { %1361 = vmatmul.msk.bf16.gmra.mxu0 %vm326_vm3, %v303_v58  ;;  %v672_v58 = vshrl.u32 %v1582_v34, 16  ;;  %v1009_v34 = vshrl.u32 %v1467_v5, 16 }
  0x29   : > { %1374 = vmatmul.msk.bf16.gmra.mxu2 %vm452_vm1, %v451_v59  ;;  %v676_v59 = vshll.u32 %v1607_v56, 16  ;;  %v1023_v51 = vrot.slane %v1021_v48, 1  ;;  %v863_v56 = vrot.slane %v1824_v57, 1 }
  0x2a   : > { %v674_v1 = vor.u32 %v672_v58, %v670_v46  ;;  %v1011_v39 = vor.u32 %v1009_v34, %v1007_v22 }
  0x2d   : > { %1368 = vmatmul.msk.bf16.vlgmr.msrb.gmra.mxu1 %vm326_vm3, %v1693_v10  ;;  %v1581_v10 = vld [vmem:[%s1685_s13 + $0xc] sm:$0xff]  }
  0x2e   : > { %v660_v20 = vshll.u32 %v1581_v10, 16  ;;  %v664_v38 = vshrl.u32 %v1581_v10, 16  ;;  %881 = vmatpush.bf16.msrb.mxu1 %v872_v40  ;;  %v998_v10 = vshrl.u32 %v1466_v0, 16 }
  0x30   : > { %v662_v24 = vrot.slane %v660_v20, 1  ;;  %v651_v20 = vpack.c.b16 %v646_v8, %v646_v8  ;;  %v1155_v8 = vshll.u32 %v1471_v13, 16 }
  0x32   : > { %1386 = vmatmul.msk.bf16.vlgmr.msrb.gmra.mxu3 %vm326_vm3, %v1555_v2  ;;  %v663_v31 = vsel %vm283_vm2, %v658_v23, %v662_v24  ;;  %v666_v45 = vor.u32 %v664_v38, %v662_v24  ;;  %v678_v2 = vrot.slane %v676_v59, 1  ;;  %v1448_v23 = vld [vmem:[%s1988_s3 + $0x1c] sm:$0xf]  ;;  %v684_v24 = vshll.u32 %v651_v20, 16  ;;  %v854_v38 = vld [vmem:[%s1690_s16 + $0x4] sm:$0xe] }
  0x33   : > { %v1174_v26 = vsel %vm459_vm0, %v1448_v23, 0  ;;  %v1157_v20 = vrot.slane %v1155_v8, 1 }
  0x34   : > { %v671_v52 = vsel %vm283_vm2, %v666_v45, %v670_v46  ;;  %v682_v30 = vor.u32 %v680_v61, %v678_v2  ;;  %v861_v46 = vrot.slane %v1803_v35, 1 }
  0x35   : > { %v1158_v23 = vsel %vm283_vm2, %v1746_v53, %v1157_v20 }
  0x38   : > { %1362 = vmatmul.msk.bf16.gmra.mxu0 %vm326_vm3, %v311_v7  ;;  %v679_v7 = vsel %vm283_vm2, %v674_v1, %v678_v2 }
  0x39   : > { %1378 = vmatmul.msk.bf16.vlgmr.msrb.gmra.mxu2 %vm452_vm1, %v517_v9  ;;  %v821_v9 = vsel %vm283_vm2, %v816_v3, %v820_v4 }
  0x3a   : > { %932 = vmatpush.bf16.msrb.mxu2 %v1465_v28 }
  0x3d   : > { %1369 = vmatmul.msk.bf16.gmra.mxu1 %vm326_vm3, %v1696_v11 }
  0x42   : > { %1387 = vmatmul.msk.bf16.gmra.mxu3 %vm326_vm3, %v1557_v21  ;;  %v1003_v21 = vor.u32 %v1002_v17, %v998_v10 }
  0x44   : > { %v1008_v28 = vsel %vm283_vm2, %v1003_v21, %v1007_v22  ;;  %v1131_v21 = vld [vmem:[%s1690_s16 + $0x18] sm:$0x1] }
  0x45   : > { %v1143_v14 = vunpack.c.l.b16 %v1131_v21 }
  0x48   : > { %1396 = vmatmul.msk.bf16.vlgmr.msrb.gmra.mxu0 %vm326_vm3, %v663_v31  ;;  %v686_v31 = vrot.slane %v684_v24, 1 }
  0x49   : > { %1379 = vmatmul.msk.bf16.gmra.mxu2 %vm452_vm1, %v519_v32  ;;  %1226 = vmatpush.bf16.msrb.mxu0 %v1217_v27  ;;  %v1468_v32 = vld [vmem:[%s1685_s13 + $0x18] sm:$0xff] }
  0x4a   : > { %v687_v33 = vsel %vm283_vm2, %v682_v30, %v686_v31  ;;  %v1013_v36 = vshll.u32 %v1468_v32, 16  ;;  %v1017_v47 = vshrl.u32 %v1468_v32, 16  ;;  %v1146_v30 = vpack.c.b16 %v1143_v14, %v1143_v14 }
  0x4c   : > { %v1015_v40 = vrot.slane %v1013_v36, 1  ;;  %v1208_v32 = vrot.slane %v1146_v30, 1  ;;  %v1163_v34 = vshll.u32 %v1146_v30, 16 }
  0x4d   : > { %1370 = vmatmul.msk.bf16.gmra.mxu1 %vm326_vm3, %v1733_v43 }
  0x4e   : > { %v1016_v42 = vsel %vm283_vm2, %v1011_v39, %v1015_v40  ;;  %v1019_v50 = vor.u32 %v1017_v47, %v1015_v40 }
  0x52   : > { %1388 = vmatmul.msk.bf16.gmra.mxu3 %vm326_vm3, %v1559_v41  ;;  %v858_v41 = vunpack.c.l.b16 %v854_v38 }
  0x54   : > { %v859_v44 = vpack.c.b16 %v1785_v25, %v858_v41  ;;  %v970_v25 = vld [vmem:[%s1685_s13 + $0x28] sm:$0x1]  ;;  %v1165_v41 = vrot.slane %v1163_v34, 1 }
  0x55   : > { %v991_v35 = vunpack.c.l.b16 %v970_v25 }
  0x56   : > { %v860_v45 = vrot.slane %v859_v44, 1 }
  0x58   : > { %1397 = vmatmul.msk.bf16.gmra.mxu0 %vm326_vm3, %v671_v52  ;;  %v1024_v52 = vsel %vm283_vm2, %v1019_v50, %v1023_v51 }
  0x59   : > { %1404 = vmatmul.msk.bf16.vlgmr.msra.gmra.mxu2 %vm452_vm1, %v813_v54  ;;  %v996_v54 = vpack.c.b16 %v991_v35, %v991_v35 }
  0x5b   : > { %v1029_v58 = vshll.u32 %v996_v54, 16 }
  0x5d   : > { %1371 = vmatmul.msk.bf16.gmra.mxu1 %vm326_vm3, %v1699_v12  ;;  %v1031_v1 = vrot.slane %v1029_v58, 1 }
  0x62   : > { %1389 = vmatmul.msk.bf16.gmra.mxu3 %vm326_vm3, %v1561_v60  ;;  %v864_v60 = vsel %vm514_vm4, %v861_v46, %v863_v56 }
  0x68   : > { %1398 = vmatmul.msk.bf16.gmra.mxu0 %vm326_vm3, %v679_v7  ;;  %v1206_v7 = vrot.slane %v1471_v13, 1 }
  0x69   : > { %1405 = vmatmul.msk.bf16.gmra.mxu2 %vm452_vm1, %v821_v9 }
  0x6a   : > { %v1209_v53 = vsel %vm514_vm4, %v1206_v7, %v1208_v32 }
  0x6d   : > { %1401 = vmatmul.msk.bf16.vlgmr.msra.gmra.mxu1 %vm452_vm1, %v748_v19 }
  0x6e   : > { %1183 = vmatpush.bf16.msra.mxu1 %v1174_v26 }
  0x72   : > { %1441 = vmatmul.msk.bf16.vlgmr.msra.gmra.mxu3 %vm326_vm3, %v1008_v28 }
  0x78   : > { %1399 = vmatmul.msk.bf16.gmra.mxu0 %vm326_vm3, %v687_v33  ;;  %v1159_v33 = vshrl.u32 %v1471_v13, 16 }
  0x79   : > { %1415 = vmatmul.msk.bf16.vlgmr.msrb.gmra.mxu2 %vm326_vm3, %v1696_v11  ;;  %v862_v11 = vsel %vm514_vm4, %v860_v45, %v861_v46 }
  0x7a   : > { %v1161_v40 = vor.u32 %v1159_v33, %v1157_v20 }
  0x7d   : > { %1402 = vmatmul.msk.bf16.gmra.mxu1 %vm452_vm1, %v1576_v37 }
  0x82   : > { %1442 = vmatmul.msk.bf16.gmra.mxu3 %vm326_vm3, %v1016_v42 }
  0x88   : > { %1446 = vmatmul.msk.bf16.vlgmr.msra.gmra.mxu0 %vm452_vm1, %v1708_v15 }
  0x89   : > { %1416 = vmatmul.msk.bf16.gmra.mxu2 %vm326_vm3, %v1733_v43  ;;  %v1025_v43 = vshrl.u32 %v1469_v16, 16  ;;  %v1166_v16 = vsel %vm283_vm2, %v1161_v40, %v1165_v41 }
  0x8b   : > { %v1027_v0 = vor.u32 %v1025_v43, %v1023_v51 }
  0x8d   : > { %1407 = vmatmul.msk.bf16.vlgmr.msrb.gmra.mxu1 %vm452_vm1, %v862_v11  ;;  %v1032_v5 = vsel %vm283_vm2, %v1027_v0, %v1031_v1 }
  0x92   : > { %1443 = vmatmul.msk.bf16.gmra.mxu3 %vm326_vm3, %v1024_v52 }
  0x95   : > { %v498_v55 = vpop.f32.mrf.mxu3  ;;  %v348_v15 = vpop.f32.mrf.mxu0 }
  0x98   : > { %1447 = vmatmul.msk.bf16.gmra.mxu0 %vm452_vm1, %v1793_v29  ;;  %v1552_v29 = vor.u32 %v1551_v63, %v1550_v62 }
  0x99   : > { %1417 = vmatmul.msk.bf16.gmra.mxu2 %vm326_vm3, %v1699_v12 }
  0x9a   : > { %v1878_v59 = vpop.f32.mrf.mxu1  ;;  %v1205_v12 = vrot.slane %v1552_v29, 1 }
  0x9c   : > { %v472_v57 = vpop.f32.mrf.mxu2  ;;  %v1207_v19 = vsel %vm514_vm4, %v1205_v12, %v1206_v7 }
  0x9d   : > { %1408 = vmatmul.msk.bf16.gmra.mxu1 %vm452_vm1, %v864_v60  ;;  %v499_v2 = vadd.f32 %v498_v55, %v472_v57  ;;  %v500_v3 = vpop.f32.mrf.mxu3  ;;  %v350_v4 = vpop.f32.mrf.mxu0 }
  0xa2   : > { %v1888_v6 = vpop.f32.mrf.mxu1  ;;  %1444 = vmatmul.msk.bf16.gmra.mxu3 %vm326_vm3, %v1032_v5 }
  0xa4   : > { %v474_v9 = vpop.f32.mrf.mxu2 }
  0xa5   : > { %v501_v10 = vadd.f32 %v500_v3, %v474_v9  ;;  %v503_v17 = vpop.f32.mrf.mxu3  ;;  %v353_v18 = vpop.f32.mrf.mxu0 }
  0xa8   : > { %1456 = vmatmul.msk.bf16.vlgmr.msrb.gmra.mxu0 %vm452_vm1, %v1207_v19 }
  0xa9   : > { %1418 = vmatmul.msk.bf16.gmra.mxu2 %vm326_vm3, %v1815_v49 }
  0xaa   : > { %v391_v22 = vpop.f32.mrf.mxu1 }
  0xab   : > { %v392_v61 = vadd.f32 %v391_v22, %v348_v15 }
  0xac   : > { %v477_v24 = vpop.f32.mrf.mxu2 }
  0xad   : > { %1453 = vmatmul.msk.bf16.vlgmr.msra.gmra.mxu1 %vm452_vm1, %v1158_v23  ;;  %v504_v26 = vadd.f32 %v503_v17, %v477_v24  ;;  %v505_v27 = vpop.f32.mrf.mxu3  ;;  %v355_v28 = vpop.f32.mrf.mxu0 }
  0xb2   : > { %v393_v31 = vpop.f32.mrf.mxu1 }
  0xb3   : > { %v394_v36 = vadd.f32 %v393_v31, %v350_v4 }
  0xb4   : > { %v479_v37 = vpop.f32.mrf.mxu2 }
  0xb5   : > { %v506_v38 = vadd.f32 %v505_v27, %v479_v37  ;;  %v589_v49 = vpop.f32.mrf.mxu3  ;;  %v358_v39 = vpop.f32.mrf.mxu0 }
  0xb6   : > { %v609_v42 = vadd.f32 %v589_v49, %v392_v61 }
  0xb8   : > { %1457 = vmatmul.msk.bf16.gmra.mxu0 %vm452_vm1, %v1209_v53 }
  0xba   : > { %v396_v44 = vpop.f32.mrf.mxu1 }
  0xbb   : > { %v397_v45 = vadd.f32 %v396_v44, %v353_v18 }
  0xbc   : > { %v538_v46 = vpop.f32.mrf.mxu2 }
  0xbd   : > { %1454 = vmatmul.msk.bf16.gmra.mxu1 %vm452_vm1, %v1166_v16  ;;  %v1903_v47 = vadd.f32 %v538_v46, %v499_v2  ;;  %v591_v48 = vpop.f32.mrf.mxu3  ;;  %v360_v11 = vpop.f32.mrf.mxu0 }
  0xbe   : > { %v610_v50 = vadd.f32 %v591_v48, %v394_v36 }
  0xc2   : > { %v398_v51 = vpop.f32.mrf.mxu1 }
  0xc3   : > { %v399_v25 = vadd.f32 %v398_v51, %v355_v28 }
  0xc4   : > { %v540_v52 = vpop.f32.mrf.mxu2 }
  0xc5   : > { %v1905_v35 = vadd.f32 %v540_v52, %v501_v10  ;;  %v594_v54 = vpop.f32.mrf.mxu3  ;;  %v715_v55 = vpop.f32.mrf.mxu0 }
  0xc6   : > { %v611_v15 = vadd.f32 %v594_v54, %v397_v45  ;;  %v1907_v56 = vadd.f32 %v715_v55, %v609_v42 }
  0xca   : > { %v401_v43 = vpop.f32.mrf.mxu1 }
  0xcb   : > { %v402_v58 = vadd.f32 %v401_v43, %v358_v39 }
  0xcc   : > { %v543_v60 = vpop.f32.mrf.mxu2 }
  0xcd   : > { %v1909_v62 = vadd.f32 %v543_v60, %v504_v26  ;;  %v596_v63 = vpop.f32.mrf.mxu3  ;;  %v717_v0 = vpop.f32.mrf.mxu0 }
  0xce   : > { %v612_v1 = vadd.f32 %v596_v63, %v399_v25  ;;  %v736_v57 = vadd.f32 %v717_v0, %v610_v50 }
  0xd2   : > { %v403_v2 = vpop.f32.mrf.mxu1 }
  0xd3   : > { %v404_v3 = vadd.f32 %v403_v2, %v360_v11 }
  0xd4   : > { %v545_v4 = vpop.f32.mrf.mxu2 }
  0xd5   : > { %v1911_v13 = vadd.f32 %v545_v4, %v506_v38  ;;  %v599_v29 = vpop.f32.mrf.mxu3  ;;  %v720_v5 = vpop.f32.mrf.mxu0 }
  0xd6   : > { %v613_v12 = vadd.f32 %v599_v29, %v402_v58  ;;  %v1913_v7 = vadd.f32 %v720_v5, %v611_v15 }
  0xda   : > { %v406_v8 = vpop.f32.mrf.mxu1 }
  0xdb   : > { %v407_v9 = vadd.f32 %v406_v8, %v1878_v59 }
  0xdc   : > { %v840_v10 = vpop.f32.mrf.mxu2 }
  0xdd   : > { %v601_v17 = vpop.f32.mrf.mxu3  ;;  %v722_v18 = vpop.f32.mrf.mxu0 }
  0xde   : > { %v614_v19 = vadd.f32 %v601_v17, %v404_v3  ;;  %v738_v20 = vadd.f32 %v722_v18, %v612_v1 }
  0xe2   : > { %v408_v21 = vpop.f32.mrf.mxu1 }
  0xe3   : > { %v1917_v22 = vadd.f32 %v408_v21, %v1888_v6 }
  0xe4   : > { %v842_v23 = vpop.f32.mrf.mxu2 }
  0xe5   : > { %v604_v14 = vpop.f32.mrf.mxu3  ;;  %v725_v61 = vpop.f32.mrf.mxu0 }
  0xe6   : > { %v615_v24 = vadd.f32 %v604_v14, %v407_v9  ;;  %v1919_v26 = vadd.f32 %v725_v61, %v613_v12 }
  0xea   : > { %v768_v27 = vpop.f32.mrf.mxu1 }
  0xeb   : > { %v778_v52 = vadd.f32 %v768_v27, %v1903_v47 }
  0xec   : > { %v845_v28 = vpop.f32.mrf.mxu2 }
  0xed   : > { %v727_v30 = vpop.f32.mrf.mxu0  ;;  %v1923_v32 = vpop.f32.mrf.mxu3  ;;  %v850_v15 = vadd.f32 %v840_v10, %v778_v52  ;;  %v1939_v10 = vld [vmem:[%s1989_s4] ss:$0 sm:$0xff] }
  0xee   : > { %v1921_v31 = vadd.f32 %v727_v30, %v614_v19 }
  0xf2   : > { %v770_v59 = vpop.f32.mrf.mxu1 }
  0xf3   : > { %v779_v63 = vadd.f32 %v770_v59, %v1905_v35 }
  0xf4   : > { %v1925_v33 = vpop.f32.mrf.mxu2 }
  0xf5   : > { %v730_v34 = vpop.f32.mrf.mxu0  ;;  %v1060_v37 = vpop.f32.mrf.mxu3  ;;  %v851_v29 = vadd.f32 %v842_v23, %v779_v63 }
  0xf6   : > { %v1927_v36 = vadd.f32 %v730_v34, %v615_v24 }
  0xfa   : > { %v773_v6 = vpop.f32.mrf.mxu1 }
  0xfb   : > { %v780_v17 = vadd.f32 %v773_v6, %v1909_v62 }
  0xfc   : > { %v934_v38 = vpop.f32.mrf.mxu2 }
  0xfd   : > { %v1929_v49 = vpop.f32.mrf.mxu0  ;;  %v1062_v40 = vpop.f32.mrf.mxu3  ;;  %v954_v0 = vadd.f32 %v934_v38, %v1907_v56  ;;  %v852_v24 = vadd.f32 %v845_v28, %v780_v17 }
  0xff   : > { %v1080_v12 = vadd.f32 %v1060_v37, %v954_v0 }
 0x102   : > { %v775_v39 = vpop.f32.mrf.mxu1 }
 0x103   : > { %v781_v28 = vadd.f32 %v775_v39, %v1911_v13 }
 0x104   : > { %v936_v53 = vpop.f32.mrf.mxu2 }
 0x105   : > { %v1113_v41 = vpop.f32.mrf.mxu0  ;;  %v1065_v45 = vpop.f32.mrf.mxu3  ;;  %v955_v1 = vadd.f32 %v936_v53, %v736_v57 }
 0x107   : > { %v1081_v8 = vadd.f32 %v1062_v40, %v955_v1 }
 0x10a   : > { %v883_v42 = vpop.f32.mrf.mxu1 }
 0x10b   : > { %v893_v58 = vadd.f32 %v883_v42, %v850_v15 }
 0x10c   : > { %v939_v44 = vpop.f32.mrf.mxu2 }
 0x10d   : > { %v1115_v16 = vpop.f32.mrf.mxu0  ;;  %v1067_v50 = vpop.f32.mrf.mxu3  ;;  %v1123_v2 = vadd.f32 %v1113_v41, %v893_v58  ;;  %v956_v18 = vadd.f32 %v939_v44, %v1913_v7 }
 0x112   : > { %v885_v46 = vpop.f32.mrf.mxu1 }
 0x113   : > { %v894_v47 = vadd.f32 %v885_v46, %v851_v29  ;;  %v853_v46 = vadd.f32 %v1925_v33, %v781_v28 }
 0x114   : > { %v941_v48 = vpop.f32.mrf.mxu2 }
 0x115   : > { %v1118_v11 = vpop.f32.mrf.mxu0  ;;  %v1070_v43 = vpop.f32.mrf.mxu3  ;;  %v957_v21 = vadd.f32 %v941_v48, %v738_v20  ;;  %v1124_v61 = vadd.f32 %v1115_v16, %v894_v47  ;;  %v1082_v20 = vadd.f32 %v1065_v45, %v956_v18 }
 0x117   : > { %v1083_v6 = vadd.f32 %v1067_v50, %v957_v21 }
 0x11a   : > { %v888_v51 = vpop.f32.mrf.mxu1 }
 0x11b   : > { %v895_v7 = vadd.f32 %v888_v51, %v852_v24 }
 0x11c   : > { %v944_v54 = vpop.f32.mrf.mxu2 }
 0x11d   : > { %v1931_v25 = vpop.f32.mrf.mxu0  ;;  %v1072_v35 = vpop.f32.mrf.mxu3  ;;  %v1125_v41 = vadd.f32 %v1118_v11, %v895_v7  ;;  %v958_v42 = vadd.f32 %v944_v54, %v1919_v26  ;;  %v616_v11 = vadd.f32 %v1923_v32, %v1917_v22 }
 0x11f   : > { %v1084_v15 = vadd.f32 %v1070_v43, %v958_v42  ;;  %v742_v58 = vadd.f32 %v1929_v49, %v616_v11 }
 0x122   : > { %v890_v55 = vpop.f32.mrf.mxu1 }
 0x123   : > { %v896_v52 = vadd.f32 %v890_v55, %v853_v46 }
 0x124   : > { %v946_v3 = vpop.f32.mrf.mxu2 }
 0x125   : > { %v1228_v60 = vpop.f32.mrf.mxu0  ;;  %v1075_v40 = vpop.f32.mrf.mxu3  ;;  %v959_v44 = vadd.f32 %v946_v3, %v1921_v31  ;;  %v1126_v63 = vadd.f32 %v1931_v25, %v896_v52 }
 0x127   : > { %v1085_v26 = vadd.f32 %v1072_v35, %v959_v44 }
 0x12a   : > { %v1185_v4 = vpop.f32.mrf.mxu1 }
 0x12b   : > { %v1195_v5 = vadd.f32 %v1185_v4, %v1123_v2 }
 0x12c   : > { %v949_v34 = vpop.f32.mrf.mxu2 }
 0x12d   : > { %v1238_v9 = vadd.f32 %v1228_v60, %v1195_v5  ;;  %v1230_v19 = vpop.f32.mrf.mxu0  ;;  %v960_v55 = vadd.f32 %v949_v34, %v1927_v36  ;;  %v1077_v43 = vpop.f32.mrf.mxu3 }
 0x12f   : > { %v1242_v56 = vadd.f32 %v1238_v9, %v1080_v12  ;;  %v1243_v57 = vadd.f32 %v1238_v9, %v1081_v8  ;;  %v1086_v29 = vadd.f32 %v1075_v40, %v960_v55 }
 0x131   : > { %v1254_v23 = vadd.f32 %v1939_v10, %v1242_v56  ;;  %v1255_v14 = vadd.f32 %v1939_v10, %v1243_v57 }
 0x132   : > { %v1187_v62 = vpop.f32.mrf.mxu1 }
 0x133   : > { %v1262_v27 = vmax.f32 %v1254_v23, 0.0  ;;  %v1263_v30 = vmax.f32 %v1255_v14, 0.0  ;;  %v1196_v59 = vadd.f32 %v1187_v62, %v1124_v61 }
 0x134   : > { %v951_v54 = vpop.f32.mrf.mxu2 }
 0x135   : > { %1270 = vst.msk [vmem:[%s1949_s15] sm:$0xff] %vm326_vm3, %v1262_v27  ;;  %v1239_v37 = vadd.f32 %v1230_v19, %v1196_v59  ;;  %v1233_v48 = vpop.f32.mrf.mxu0  ;;  %v961_v0 = vadd.f32 %v951_v54, %v742_v58 }
 0x136   : > { %1271 = vst.msk [vmem:[%s1949_s15 + $0x8] sm:$0xff] %vm326_vm3, %v1263_v30 }
 0x137   : > { %v1244_v38 = vadd.f32 %v1239_v37, %v1082_v20  ;;  %v1245_v53 = vadd.f32 %v1239_v37, %v1083_v6  ;;  %v1087_v5 = vadd.f32 %v1077_v43, %v961_v0 }
 0x139   : > { %v1256_v16 = vadd.f32 %v1939_v10, %v1244_v38  ;;  %v1257_v45 = vadd.f32 %v1939_v10, %v1245_v53 }
 0x13a   : > { %v1190_v13 = vpop.f32.mrf.mxu1 }
 0x13b   : > { %v1264_v39 = vmax.f32 %v1256_v16, 0.0  ;;  %v1265_v50 = vmax.f32 %v1257_v45, 0.0  ;;  %v1197_v51 = vadd.f32 %v1190_v13, %v1125_v41 }
 0x13d   : > { %1272 = vst.msk [vmem:[%s1949_s15 + $0x10] sm:$0xff] %vm326_vm3, %v1264_v39  ;;  %v1240_v31 = vadd.f32 %v1233_v48, %v1197_v51  ;;  %v1235_v4 = vpop.f32.mrf.mxu0 }
 0x13e   : > { %1273 = vst.msk [vmem:[%s1949_s15 + $0x18] sm:$0xff] %vm326_vm3, %v1265_v50 }
 0x13f   : > { %v1246_v33 = vadd.f32 %v1240_v31, %v1084_v15  ;;  %v1247_v60 = vadd.f32 %v1240_v31, %v1085_v26 }
 0x141   : > { %v1258_v22 = vadd.f32 %v1939_v10, %v1246_v33  ;;  %v1259_v32 = vadd.f32 %v1939_v10, %v1247_v60 }
 0x142   : > { %v1192_v1 = vpop.f32.mrf.mxu1 }
 0x143   : > { %v1266_v2 = vmax.f32 %v1258_v22, 0.0  ;;  %v1267_v3 = vmax.f32 %v1259_v32, 0.0  ;;  %v1198_v49 = vadd.f32 %v1192_v1, %v1126_v63 }
 0x145   : > { %1274 = vst.msk [vmem:[%s1949_s15 + $0x20] sm:$0xff] %vm326_vm3, %v1266_v2  ;;  %v1241_v25 = vadd.f32 %v1235_v4, %v1198_v49 }
 0x146   : > { %1275 = vst.msk [vmem:[%s1949_s15 + $0x28] sm:$0xff] %vm326_vm3, %v1267_v3 }
 0x147   : > { %v1248_v36 = vadd.f32 %v1241_v25, %v1086_v29  ;;  %v1249_v12 = vadd.f32 %v1241_v25, %v1087_v5 }
 0x149   : > { %v1260_v8 = vadd.f32 %v1939_v10, %v1248_v36  ;;  %v1261_v47 = vadd.f32 %v1939_v10, %v1249_v12 }
 0x14b   : > { %v1268_v9 = vmax.f32 %v1260_v8, 0.0  ;;  %v1269_v17 = vmax.f32 %v1261_v47, 0.0 }
 0x14d   : > { %1276 = vst.msk [vmem:[%s1949_s15 + $0x30] sm:$0xff] %vm326_vm3, %v1268_v9 }
 0x14e   : > { %1277 = vst.msk [vmem:[%s1949_s15 + $0x38] sm:$0xff] %vm326_vm3, %v1269_v17 }
 0x14f PF: > { %s15_s18 = sadd.s32 1, %s1614_s18  }
 0x150   : > { %p12_p4 = scmp.ge.s32.totalorder %s15_s18, 4  }
 0x152   :  { %14 = sbr.rel (!%p12_p4) target bundleno = 1 (0x1), region = 86 }

</bundles_post_ra>
